<compile_context>
chip_gen: v5e
topology: v5e:2x2
jax: 0.10.0
libtpu: 0.0.40
codegen_flags: <defaults>
</compile_context>

<pallas_src>
import math

import jax
import jax.numpy as jnp
from jax.experimental import pallas as pl
from jax.experimental.pallas import tpu as pltpu

CONV_DTYPE = jnp.bfloat16  # MXU-native operand dtype for all matmuls.
_TAPS = [(dy, dx) for dy in (-1, 0, 1) for dx in (-1, 0, 1)]  # k = (dy+1)*3+(dx+1)


def _cdiv(a, b):
    return -(-a // b)


def _cores_per_chip():
    """2 for megacore-style chips (v4/v5p/v7x), else 1.  Only used to decide
    whether the grid should be rounded up so every TensorCore gets a step."""
    try:
        kind = jax.devices()[0].device_kind.lower()
    except Exception:
        return 1
    if "lite" in kind or "v5e" in kind or "v6e" in kind:
        return 1
    if any(t in kind for t in ("v4", "v5p", "v7", "7x")):
        return 2
    return 1


def _pick_batch_block(n, hw, cin):
    """Images per grid step (nb) and grid size (g).  Fills the MXU M dim
    (target >= 512 rows), keeps nb a multiple of 8, pads the batch to g*nb."""
    nb = max(8, _cdiv(_cdiv(512, hw), 8) * 8)
    # Keep the double-buffered f32 input block under ~8 MiB of VMEM.
    cap = max(8, ((8 * 1024 * 1024) // max(1, hw * cin * 4 * 2) // 8) * 8)
    nb = min(nb, cap)
    g = _cdiv(n, nb)
    cores = _cores_per_chip()
    if cores > 1:
        g = _cdiv(g, cores) * cores  # feed both TensorCores on v4/v5p/v7x
    return nb, g


# ---------------------------------------------------------------------------
# Fused kernel: conv1+BN+ReLU+pool -> conv2+BN+ReLU+pool -> fc1+ReLU -> fc2+sigmoid
# Row layout everywhere: q = (y*W + x)*nb + n  (spatial-major, batch-minor),
# channels on the 128-lane axis.  Rolls move by multiples of nb so images never
# mix; zero padding is 0/1 validity computed from iota.
# ---------------------------------------------------------------------------
def _make_fused_kernel(nb, h, w):
    h2, w2 = h // 2, w // 2
    p4 = (h2 // 2) * (w2 // 2)

    def pad_masks(hs, ws, c):
        rows = hs * ws * nb
        # y is monotone in the row index -> plain compares on a 2-D iota.
        q = jax.lax.broadcasted_iota(jnp.int32, (rows, c), 0)
        not_top = q >= ws * nb                    # y >= 1
        not_bot = q < (hs - 1) * ws * nb          # y <= hs-2
        # x-pattern is periodic (period ws*nb): build one period with a 2-D iota
        # and broadcast it over y ONCE (no per-tap broadcasts, no integer div).
        t = jax.lax.broadcasted_iota(jnp.int32, (ws * nb, c), 0)
        t = jnp.broadcast_to(t[None], (hs, ws * nb, c)).reshape(rows, c)
        not_left = t >= nb                        # x >= 1
        not_right = t < (ws - 1) * nb             # x <= ws-2
        return not_top, not_bot, not_left, not_right

    def conv_bn_relu(x, w_ref, s_ref, b_ref, hs, ws):
        rows, cl = x.shape
        not_top, not_bot, not_left, not_right = pad_masks(hs, ws, cl)
        row_m = {-1: not_top, 0: None, 1: not_bot}
        col_m = {-1: not_left, 0: None, 1: not_right}
        cout = w_ref.shape[2]
        acc = jnp.zeros((rows, cout), jnp.float32)
        for k, (dy, dx) in enumerate(_TAPS):
            delta = (dy * ws + dx) * nb
            shifted = x if delta == 0 else pltpu.roll(x, shift=(-delta) % rows, axis=0)
            m = row_m[dy]
            if col_m[dx] is not None:
                m = col_m[dx] if m is None else jnp.logical_and(m, col_m[dx])
            tap = shifted if m is None else jnp.where(m, shifted, 0.0)   # zero padding
            acc += jnp.dot(tap.astype(CONV_DTYPE), w_ref[k],
                           preferred_element_type=jnp.float32)
        return jnp.maximum(acc * s_ref[...] + b_ref[...], 0.0)          # folded BN + ReLU

    def maxpool2x2(y, hs, ws):
        rows = y.shape[0]
        right = pltpu.roll(y, shift=rows - nb, axis=0)              # (y,   x+1)
        down = pltpu.roll(y, shift=rows - ws * nb, axis=0)          # (y+1, x  )
        diag = pltpu.roll(y, shift=rows - (ws + 1) * nb, axis=0)    # (y+1, x+1)
        pm = jnp.maximum(jnp.maximum(y, right), jnp.maximum(down, diag))
        # Select the even-(y, x) anchors: static, 8-aligned contiguous row blocks.
        parts = []
        for yo in range(hs // 2):
            for xo in range(ws // 2):
                s = (2 * yo) * ws + 2 * xo
                parts.append(pm[s * nb:(s + 1) * nb, :])
        return jnp.concatenate(parts, axis=0)

    def kernel(x_ref, w1_ref, s1_ref, b1_ref, w2_ref, s2_ref, b2_ref,
               fc1_ref, fb1_ref, fc2_ref, fcb_ref, o_ref):
        cin = x_ref.shape[2]
        x = x_ref[...].reshape(h * w * nb, cin)                  # r-major rows, C lanes
        y1 = conv_bn_relu(x, w1_ref, s1_ref, b1_ref, h, w)       # (h*w*nb, 64)
        p1 = maxpool2x2(y1, h, w)                                # (h2*w2*nb, 64)
        y2 = conv_bn_relu(p1, w2_ref, s2_ref, b2_ref, h2, w2)    # (h2*w2*nb, 64)
        p2 = maxpool2x2(y2, h2, w2)                              # (p4*nb, 64)
        # Head (transposed): hid_T[j, n] = sum_{r,c} fc1[r, j, c] * feats[r, n, c]
        cmid = p2.shape[1]
        f3 = p2.reshape(p4, nb, cmid).astype(CONV_DTYPE)
        h3 = jnp.einsum("rjc,rnc->rjn", fc1_ref[...], f3,
                        preferred_element_type=jnp.float32)      # (p4, hp, nb)
        hid = jnp.maximum(jnp.sum(h3, axis=0) + fb1_ref[...], 0.0)   # fc1 + ReLU, (hp, nb)
        z = jnp.sum(hid * fc2_ref[...], axis=0, keepdims=True) + fcb_ref[...]  # (1, nb)
        o_ref[...] = jax.nn.sigmoid(z).reshape(1, 1, nb)

    return kernel


# ---------------------------------------------------------------------------
# Wrapper
# ---------------------------------------------------------------------------
def relation_network_forward(x_nchw, params):
    n, cin, h, w = x_nchw.shape
    assert h % 4 == 0 and w % 4 == 0, "spatial dims must survive two 2x2 pools"
    cmid = params["w1"].shape[2]
    assert params["w1"].shape[1] == cin
    p4, hp, _ = params["fc1_w"].shape
    assert p4 == (h // 4) * (w // 4), "fc1 layout inconsistent with input size"

    nb, g = _pick_batch_block(n, h * w, cin)
    n_pad = g * nb

    # One wrapper-side layout pass: NCHW -> (H*W, N_pad, C) so channels sit on
    # lanes and each grid step gets a contiguous, 8-aligned batch slab.
    xp = jnp.pad(x_nchw.astype(jnp.float32), ((0, n_pad - n), (0, 0), (0, 0), (0, 0)))
    x3d = jnp.transpose(xp, (2, 3, 0, 1)).reshape(h * w, n_pad, cin)

    kernel = _make_fused_kernel(nb, h, w)
    c3 = lambda i: (0, 0, 0)
    c2 = lambda i: (0, 0)

    out = pl.pallas_call(
        kernel,
        grid=(g,),
        in_specs=[
            pl.BlockSpec((h * w, nb, cin), lambda i: (0, i, 0)),  # input slab per step
            pl.BlockSpec((9, cin, cmid), c3),                     # conv1 taps (bf16)
            pl.BlockSpec((1, cmid), c2),                          # conv1 BN scale
            pl.BlockSpec((1, cmid), c2),                          # conv1 BN bias
            pl.BlockSpec((9, cmid, cmid), c3),                    # conv2 taps (bf16)
            pl.BlockSpec((1, cmid), c2),                          # conv2 BN scale
            pl.BlockSpec((1, cmid), c2),                          # conv2 BN bias
            pl.BlockSpec((p4, hp, cmid), c3),                     # fc1 (P4, hidden_pad, C) bf16
            pl.BlockSpec((hp, 1), c2),                            # fc1 bias (padded)
            pl.BlockSpec((hp, 1), c2),                            # fc2 weight (padded)
            pl.BlockSpec((1, 1), c2),                             # fc2 bias
        ],
        out_specs=pl.BlockSpec((1, 1, nb), lambda i: (i, 0, 0)),
        out_shape=jax.ShapeDtypeStruct((g, 1, nb), jnp.float32),
        compiler_params=pltpu.CompilerParams(dimension_semantics=("parallel",)),
    )(x3d, params["w1"], params["s1"], params["b1"],
      params["w2"], params["s2"], params["b2"],
      params["fc1_w"], params["fc1_b"], params["fc2_w"], params["fc2_b"])

    return out.reshape(-1)[:n].reshape(n, 1)


# ---------------------------------------------------------------------------
# Parameter init (BN folded, fc1 permuted for the r-major layout, hidden padded)
# ---------------------------------------------------------------------------
def init_params(key, input_size, hidden_size, *, cin=128, cmid=64, eps=1e-5):
    ks = jax.random.split(key, 14)
    hidden_pad = max(128, ((hidden_size + 127) // 128) * 128)

    def conv_block(kw, kb, kg, kbeta, km, kv, ci, co):
        fan_in = 9 * ci
        wgt = jax.random.normal(kw, (3, 3, ci, co), jnp.float32) / math.sqrt(fan_in)
        b = 0.1 * jax.random.normal(kb, (co,), jnp.float32)
        gamma = 1.0 + 0.1 * jax.random.normal(kg, (co,), jnp.float32)
        beta = 0.1 * jax.random.normal(kbeta, (co,), jnp.float32)
        mean = 0.1 * jax.random.normal(km, (co,), jnp.float32)
        var = jax.random.uniform(kv, (co,), jnp.float32, 0.5, 1.5)
        # TODO(synk): BatchNorm folded with running stats (inference mode); training-mode
        # batch statistics would need an extra cross-batch reduction pass.
        scale = gamma / jnp.sqrt(var + eps)
        bias = beta + scale * (b - mean)  # conv bias folded into BN bias
        # HWIO -> (9, Cin, Cout) taps, k = ky*3 + kx; stored bf16 for the MXU.
        return wgt.reshape(9, ci, co).astype(CONV_DTYPE), scale[None, :], bias[None, :]

    w1, s1, b1 = conv_block(*ks[0:6], cin, cmid)
    w2, s2, b2 = conv_block(*ks[6:12], cmid, cmid)

    # torch fc1 weight is (hidden, input) with input index = c*P4 + r (NCHW flatten);
    # store as (P4, hidden_pad, C) bf16 so the kernel's batched einsum consumes the
    # r-major pooled features directly.
    p4 = input_size // cmid
    fc1_t = jax.random.normal(ks[12], (hidden_size, input_size), jnp.float32) / math.sqrt(input_size)
    fc1 = fc1_t.reshape(hidden_size, cmid, p4).transpose(2, 0, 1)          # (P4, hidden, C)
    fc1 = jnp.pad(fc1, ((0, 0), (0, hidden_pad - hidden_size), (0, 0))).astype(CONV_DTYPE)
    fc1_b = jnp.pad(0.1 * jnp.ones((hidden_size, 1), jnp.float32),
                    ((0, hidden_pad - hidden_size), (0, 0)))               # (hidden_pad, 1)
    fc2_t = jax.random.normal(ks[13], (1, hidden_size), jnp.float32) / math.sqrt(hidden_size)
    fc2 = jnp.pad(fc2_t.T, ((0, hidden_pad - hidden_size), (0, 0)))        # (hidden_pad, 1)
    fc2_b = jnp.full((1, 1), 0.05, jnp.float32)
    return dict(w1=w1, s1=s1, b1=b1, w2=w2, s2=s2, b2=b2,
                fc1_w=fc1, fc1_b=fc1_b, fc2_w=fc2, fc2_b=fc2_b)


# ---------------------------------------------------------------------------
# Pure-JAX reference (same folded params) for a numerical sanity check.
# ---------------------------------------------------------------------------
def _reference_forward(x_nchw, p):
    x = jnp.transpose(x_nchw, (0, 2, 3, 1)).astype(jnp.float32)

    def block(x, w9, s, b):
        ci = x.shape[-1]
        wgt = w9.astype(jnp.float32).reshape(3, 3, ci, -1)
        y = jax.lax.conv_general_dilated(x, wgt, (1, 1), "SAME",
                                         dimension_numbers=("NHWC", "HWIO", "NHWC"))
        y = jnp.maximum(y * s[0] + b[0], 0.0)
        return jax.lax.reduce_window(y, -jnp.inf, jax.lax.max,
                                     (1, 2, 2, 1), (1, 2, 2, 1), "VALID")

    y = block(block(x, p["w1"], p["s1"], p["b1"]), p["w2"], p["s2"], p["b2"])
    n, h4, w4, c = y.shape
    feats = y.reshape(n, h4 * w4, c)
    fc1 = p["fc1_w"].astype(jnp.float32)                       # (P4, hidden_pad, C)
    hid = jnp.maximum(jnp.einsum("nrc,rjc->nj", feats, fc1) + p["fc1_b"][:, 0][None, :], 0.0)
    z = hid @ p["fc2_w"] + p["fc2_b"]
    return jax.nn.sigmoid(z)


if __name__ == "__main__":
    N, C_IN, H, W = 2, 128, 8, 8            # conv1 requires 128 input channels
    HIDDEN = 8                              # hidden_size
    INPUT_SIZE = 64 * (H // 4) * (W // 4)   # 64 * 2 * 2 = 256 (flattened after 2 pools)

    key = jax.random.PRNGKey(0)
    kx, kp = jax.random.split(key)
    params = init_params(kp, input_size=INPUT_SIZE, hidden_size=HIDDEN)
    x = jax.random.normal(kx, (N, C_IN, H, W), jnp.float32)    # PyTorch-style NCHW input

    fwd = jax.jit(lambda xx: relation_network_forward(xx, params))
    out = jax.block_until_ready(fwd(x))

    assert out.shape == (N, 1) and out.dtype == jnp.float32
    assert bool(jnp.all((out >= 0.0) & (out <= 1.0)))

    ref = jax.block_until_ready(_reference_forward(x, params))
    assert bool(jnp.allclose(out, ref, atol=5e-2)), "kernel diverges from JAX reference"

    print("KERNEL_OK")
</pallas_src>

<mosaic_0001>
module attributes {stable_mosaic.version = 11 : i64} {
  func.func @kernel(%arg0: i32, %arg1: memref<64x8x128xf32, #tpu.memory_space<vmem>>, %arg2: memref<9x128x64xbf16, #tpu.memory_space<vmem>>, %arg3: memref<1x64xf32, #tpu.memory_space<vmem>>, %arg4: memref<1x64xf32, #tpu.memory_space<vmem>>, %arg5: memref<9x64x64xbf16, #tpu.memory_space<vmem>>, %arg6: memref<1x64xf32, #tpu.memory_space<vmem>>, %arg7: memref<1x64xf32, #tpu.memory_space<vmem>>, %arg8: memref<4x128x64xbf16, #tpu.memory_space<vmem>>, %arg9: memref<128x1xf32, #tpu.memory_space<vmem>>, %arg10: memref<128x1xf32, #tpu.memory_space<vmem>>, %arg11: memref<1x1xf32, #tpu.memory_space<vmem>>, %arg12: memref<1x1x8xf32, #tpu.memory_space<vmem>>) attributes {dimension_semantics = [#tpu.dimension_semantics<parallel>], iteration_bounds = array<i64: 1>, scalar_prefetch = 0 : i64, scratch_operands = 0 : i64, tpu.core_type = #tpu.core_type<tc>, window_params = [{transform_indices = @transform_0, window_bounds = array<i64: 64, 8, 128>}, {pipeline_mode = #tpu.pipeline_mode<synchronous>, transform_indices = @transform_1, window_bounds = array<i64: 9, 128, 64>}, {pipeline_mode = #tpu.pipeline_mode<synchronous>, transform_indices = @transform_2, window_bounds = array<i64: 1, 64>}, {pipeline_mode = #tpu.pipeline_mode<synchronous>, transform_indices = @transform_3, window_bounds = array<i64: 1, 64>}, {pipeline_mode = #tpu.pipeline_mode<synchronous>, transform_indices = @transform_4, window_bounds = array<i64: 9, 64, 64>}, {pipeline_mode = #tpu.pipeline_mode<synchronous>, transform_indices = @transform_5, window_bounds = array<i64: 1, 64>}, {pipeline_mode = #tpu.pipeline_mode<synchronous>, transform_indices = @transform_6, window_bounds = array<i64: 1, 64>}, {pipeline_mode = #tpu.pipeline_mode<synchronous>, transform_indices = @transform_7, window_bounds = array<i64: 4, 128, 64>}, {pipeline_mode = #tpu.pipeline_mode<synchronous>, transform_indices = @transform_8, window_bounds = array<i64: 128, 1>}, {pipeline_mode = #tpu.pipeline_mode<synchronous>, transform_indices = @transform_9, window_bounds = array<i64: 128, 1>}, {pipeline_mode = #tpu.pipeline_mode<synchronous>, transform_indices = @transform_10, window_bounds = array<i64: 1, 1>}, {transform_indices = @transform_11, window_bounds = array<i64: 1, 1, 8>}]} {
    %c0 = arith.constant 0 : index
    %c0_0 = arith.constant 0 : index
    %c0_1 = arith.constant 0 : index
    %0 = vector.load %arg1[%c0, %c0_0, %c0_1] : memref<64x8x128xf32, #tpu.memory_space<vmem>>, vector<64x8x128xf32>
    %1 = vector.shape_cast %0 : vector<64x8x128xf32> to vector<512x128xf32>
    %2 = tpu.iota {dimensions = array<i32: 0>} : vector<512x128xi32>
    %c64_i32 = arith.constant 64 : i32
    %3 = vector.broadcast %c64_i32 : i32 to vector<512x128xi32>
    %4 = arith.cmpi sge, %2, %3 : vector<512x128xi32>
    %c448_i32 = arith.constant 448 : i32
    %5 = vector.broadcast %c448_i32 : i32 to vector<512x128xi32>
    %6 = arith.cmpi slt, %2, %5 : vector<512x128xi32>
    %7 = tpu.iota {dimensions = array<i32: 0>} : vector<64x128xi32>
    %8 = vector.shape_cast %7 : vector<64x128xi32> to vector<1x64x128xi32>
    %9 = vector.shape_cast %8 : vector<1x64x128xi32> to vector<1x64x128xi32>
    %10 = vector.broadcast %9 : vector<1x64x128xi32> to vector<8x64x128xi32>
    %11 = vector.shape_cast %10 : vector<8x64x128xi32> to vector<512x128xi32>
    %c8_i32 = arith.constant 8 : i32
    %12 = vector.broadcast %c8_i32 : i32 to vector<512x128xi32>
    %13 = arith.cmpi sge, %11, %12 : vector<512x128xi32>
    %c56_i32 = arith.constant 56 : i32
    %14 = vector.broadcast %c56_i32 : i32 to vector<512x128xi32>
    %15 = arith.cmpi slt, %11, %14 : vector<512x128xi32>
    %cst = arith.constant 0.000000e+00 : f32
    %16 = vector.broadcast %cst : f32 to vector<512x64xf32>
    %c72_i32 = arith.constant 72 : i32
    %17 = tpu.dynamic_rotate %1 by %c72_i32 dim 0 : vector<512x128xf32>, i32 -> vector<512x128xf32>
    %18 = arith.andi %4, %13 : vector<512x128xi1>
    %cst_2 = arith.constant 0.000000e+00 : f32
    %19 = vector.broadcast %cst_2 : f32 to vector<512x128xf32>
    %20 = arith.select %18, %17, %19 : vector<512x128xi1>, vector<512x128xf32>
    %21 = arith.truncf %20 : vector<512x128xf32> to vector<512x128xbf16>
    %c0_3 = arith.constant 0 : index
    %c0_4 = arith.constant 0 : index
    %c0_5 = arith.constant 0 : index
    %22 = vector.load %arg2[%c0_3, %c0_4, %c0_5] : memref<9x128x64xbf16, #tpu.memory_space<vmem>>, vector<1x128x64xbf16>
    %23 = vector.shape_cast %22 : vector<1x128x64xbf16> to vector<128x64xbf16>
    %cst_6 = arith.constant dense<0.000000e+00> : vector<512x64xf32>
    %24 = tpu.matmul %21, %23, %cst_6 {dimension_numbers = #tpu.dot_dimension_numbers<[1], [0], [0], [1], [0, 0, 1, 1], [], []>} : vector<512x128xbf16>, vector<128x64xbf16>, vector<512x64xf32> -> vector<512x64xf32>
    %25 = arith.addf %16, %24 : vector<512x64xf32>
    %c64_i32_7 = arith.constant 64 : i32
    %26 = tpu.dynamic_rotate %1 by %c64_i32_7 dim 0 : vector<512x128xf32>, i32 -> vector<512x128xf32>
    %cst_8 = arith.constant 0.000000e+00 : f32
    %27 = vector.broadcast %cst_8 : f32 to vector<512x128xf32>
    %28 = arith.select %4, %26, %27 : vector<512x128xi1>, vector<512x128xf32>
    %29 = arith.truncf %28 : vector<512x128xf32> to vector<512x128xbf16>
    %c1 = arith.constant 1 : index
    %c0_9 = arith.constant 0 : index
    %c0_10 = arith.constant 0 : index
    %30 = vector.load %arg2[%c1, %c0_9, %c0_10] : memref<9x128x64xbf16, #tpu.memory_space<vmem>>, vector<1x128x64xbf16>
    %31 = vector.shape_cast %30 : vector<1x128x64xbf16> to vector<128x64xbf16>
    %cst_11 = arith.constant dense<0.000000e+00> : vector<512x64xf32>
    %32 = tpu.matmul %29, %31, %cst_11 {dimension_numbers = #tpu.dot_dimension_numbers<[1], [0], [0], [1], [0, 0, 1, 1], [], []>} : vector<512x128xbf16>, vector<128x64xbf16>, vector<512x64xf32> -> vector<512x64xf32>
    %33 = arith.addf %25, %32 : vector<512x64xf32>
    %c56_i32_12 = arith.constant 56 : i32
    %34 = tpu.dynamic_rotate %1 by %c56_i32_12 dim 0 : vector<512x128xf32>, i32 -> vector<512x128xf32>
    %35 = arith.andi %4, %15 : vector<512x128xi1>
    %cst_13 = arith.constant 0.000000e+00 : f32
    %36 = vector.broadcast %cst_13 : f32 to vector<512x128xf32>
    %37 = arith.select %35, %34, %36 : vector<512x128xi1>, vector<512x128xf32>
    %38 = arith.truncf %37 : vector<512x128xf32> to vector<512x128xbf16>
    %c2 = arith.constant 2 : index
    %c0_14 = arith.constant 0 : index
    %c0_15 = arith.constant 0 : index
    %39 = vector.load %arg2[%c2, %c0_14, %c0_15] : memref<9x128x64xbf16, #tpu.memory_space<vmem>>, vector<1x128x64xbf16>
    %40 = vector.shape_cast %39 : vector<1x128x64xbf16> to vector<128x64xbf16>
    %cst_16 = arith.constant dense<0.000000e+00> : vector<512x64xf32>
    %41 = tpu.matmul %38, %40, %cst_16 {dimension_numbers = #tpu.dot_dimension_numbers<[1], [0], [0], [1], [0, 0, 1, 1], [], []>} : vector<512x128xbf16>, vector<128x64xbf16>, vector<512x64xf32> -> vector<512x64xf32>
    %42 = arith.addf %33, %41 : vector<512x64xf32>
    %c8_i32_17 = arith.constant 8 : i32
    %43 = tpu.dynamic_rotate %1 by %c8_i32_17 dim 0 : vector<512x128xf32>, i32 -> vector<512x128xf32>
    %cst_18 = arith.constant 0.000000e+00 : f32
    %44 = vector.broadcast %cst_18 : f32 to vector<512x128xf32>
    %45 = arith.select %13, %43, %44 : vector<512x128xi1>, vector<512x128xf32>
    %46 = arith.truncf %45 : vector<512x128xf32> to vector<512x128xbf16>
    %c3 = arith.constant 3 : index
    %c0_19 = arith.constant 0 : index
    %c0_20 = arith.constant 0 : index
    %47 = vector.load %arg2[%c3, %c0_19, %c0_20] : memref<9x128x64xbf16, #tpu.memory_space<vmem>>, vector<1x128x64xbf16>
    %48 = vector.shape_cast %47 : vector<1x128x64xbf16> to vector<128x64xbf16>
    %cst_21 = arith.constant dense<0.000000e+00> : vector<512x64xf32>
    %49 = tpu.matmul %46, %48, %cst_21 {dimension_numbers = #tpu.dot_dimension_numbers<[1], [0], [0], [1], [0, 0, 1, 1], [], []>} : vector<512x128xbf16>, vector<128x64xbf16>, vector<512x64xf32> -> vector<512x64xf32>
    %50 = arith.addf %42, %49 : vector<512x64xf32>
    %51 = arith.truncf %1 : vector<512x128xf32> to vector<512x128xbf16>
    %c4 = arith.constant 4 : index
    %c0_22 = arith.constant 0 : index
    %c0_23 = arith.constant 0 : index
    %52 = vector.load %arg2[%c4, %c0_22, %c0_23] : memref<9x128x64xbf16, #tpu.memory_space<vmem>>, vector<1x128x64xbf16>
    %53 = vector.shape_cast %52 : vector<1x128x64xbf16> to vector<128x64xbf16>
    %cst_24 = arith.constant dense<0.000000e+00> : vector<512x64xf32>
    %54 = tpu.matmul %51, %53, %cst_24 {dimension_numbers = #tpu.dot_dimension_numbers<[1], [0], [0], [1], [0, 0, 1, 1], [], []>} : vector<512x128xbf16>, vector<128x64xbf16>, vector<512x64xf32> -> vector<512x64xf32>
    %55 = arith.addf %50, %54 : vector<512x64xf32>
    %c504_i32 = arith.constant 504 : i32
    %56 = tpu.dynamic_rotate %1 by %c504_i32 dim 0 : vector<512x128xf32>, i32 -> vector<512x128xf32>
    %cst_25 = arith.constant 0.000000e+00 : f32
    %57 = vector.broadcast %cst_25 : f32 to vector<512x128xf32>
    %58 = arith.select %15, %56, %57 : vector<512x128xi1>, vector<512x128xf32>
    %59 = arith.truncf %58 : vector<512x128xf32> to vector<512x128xbf16>
    %c5 = arith.constant 5 : index
    %c0_26 = arith.constant 0 : index
    %c0_27 = arith.constant 0 : index
    %60 = vector.load %arg2[%c5, %c0_26, %c0_27] : memref<9x128x64xbf16, #tpu.memory_space<vmem>>, vector<1x128x64xbf16>
    %61 = vector.shape_cast %60 : vector<1x128x64xbf16> to vector<128x64xbf16>
    %cst_28 = arith.constant dense<0.000000e+00> : vector<512x64xf32>
    %62 = tpu.matmul %59, %61, %cst_28 {dimension_numbers = #tpu.dot_dimension_numbers<[1], [0], [0], [1], [0, 0, 1, 1], [], []>} : vector<512x128xbf16>, vector<128x64xbf16>, vector<512x64xf32> -> vector<512x64xf32>
    %63 = arith.addf %55, %62 : vector<512x64xf32>
    %c456_i32 = arith.constant 456 : i32
    %64 = tpu.dynamic_rotate %1 by %c456_i32 dim 0 : vector<512x128xf32>, i32 -> vector<512x128xf32>
    %65 = arith.andi %6, %13 : vector<512x128xi1>
    %cst_29 = arith.constant 0.000000e+00 : f32
    %66 = vector.broadcast %cst_29 : f32 to vector<512x128xf32>
    %67 = arith.select %65, %64, %66 : vector<512x128xi1>, vector<512x128xf32>
    %68 = arith.truncf %67 : vector<512x128xf32> to vector<512x128xbf16>
    %c6 = arith.constant 6 : index
    %c0_30 = arith.constant 0 : index
    %c0_31 = arith.constant 0 : index
    %69 = vector.load %arg2[%c6, %c0_30, %c0_31] : memref<9x128x64xbf16, #tpu.memory_space<vmem>>, vector<1x128x64xbf16>
    %70 = vector.shape_cast %69 : vector<1x128x64xbf16> to vector<128x64xbf16>
    %cst_32 = arith.constant dense<0.000000e+00> : vector<512x64xf32>
    %71 = tpu.matmul %68, %70, %cst_32 {dimension_numbers = #tpu.dot_dimension_numbers<[1], [0], [0], [1], [0, 0, 1, 1], [], []>} : vector<512x128xbf16>, vector<128x64xbf16>, vector<512x64xf32> -> vector<512x64xf32>
    %72 = arith.addf %63, %71 : vector<512x64xf32>
    %c448_i32_33 = arith.constant 448 : i32
    %73 = tpu.dynamic_rotate %1 by %c448_i32_33 dim 0 : vector<512x128xf32>, i32 -> vector<512x128xf32>
    %cst_34 = arith.constant 0.000000e+00 : f32
    %74 = vector.broadcast %cst_34 : f32 to vector<512x128xf32>
    %75 = arith.select %6, %73, %74 : vector<512x128xi1>, vector<512x128xf32>
    %76 = arith.truncf %75 : vector<512x128xf32> to vector<512x128xbf16>
    %c7 = arith.constant 7 : index
    %c0_35 = arith.constant 0 : index
    %c0_36 = arith.constant 0 : index
    %77 = vector.load %arg2[%c7, %c0_35, %c0_36] : memref<9x128x64xbf16, #tpu.memory_space<vmem>>, vector<1x128x64xbf16>
    %78 = vector.shape_cast %77 : vector<1x128x64xbf16> to vector<128x64xbf16>
    %cst_37 = arith.constant dense<0.000000e+00> : vector<512x64xf32>
    %79 = tpu.matmul %76, %78, %cst_37 {dimension_numbers = #tpu.dot_dimension_numbers<[1], [0], [0], [1], [0, 0, 1, 1], [], []>} : vector<512x128xbf16>, vector<128x64xbf16>, vector<512x64xf32> -> vector<512x64xf32>
    %80 = arith.addf %72, %79 : vector<512x64xf32>
    %c440_i32 = arith.constant 440 : i32
    %81 = tpu.dynamic_rotate %1 by %c440_i32 dim 0 : vector<512x128xf32>, i32 -> vector<512x128xf32>
    %82 = arith.andi %6, %15 : vector<512x128xi1>
    %cst_38 = arith.constant 0.000000e+00 : f32
    %83 = vector.broadcast %cst_38 : f32 to vector<512x128xf32>
    %84 = arith.select %82, %81, %83 : vector<512x128xi1>, vector<512x128xf32>
    %85 = arith.truncf %84 : vector<512x128xf32> to vector<512x128xbf16>
    %c8 = arith.constant 8 : index
    %c0_39 = arith.constant 0 : index
    %c0_40 = arith.constant 0 : index
    %86 = vector.load %arg2[%c8, %c0_39, %c0_40] : memref<9x128x64xbf16, #tpu.memory_space<vmem>>, vector<1x128x64xbf16>
    %87 = vector.shape_cast %86 : vector<1x128x64xbf16> to vector<128x64xbf16>
    %cst_41 = arith.constant dense<0.000000e+00> : vector<512x64xf32>
    %88 = tpu.matmul %85, %87, %cst_41 {dimension_numbers = #tpu.dot_dimension_numbers<[1], [0], [0], [1], [0, 0, 1, 1], [], []>} : vector<512x128xbf16>, vector<128x64xbf16>, vector<512x64xf32> -> vector<512x64xf32>
    %89 = arith.addf %80, %88 : vector<512x64xf32>
    %c0_42 = arith.constant 0 : index
    %c0_43 = arith.constant 0 : index
    %90 = vector.load %arg3[%c0_42, %c0_43] : memref<1x64xf32, #tpu.memory_space<vmem>>, vector<1x64xf32>
    %91 = vector.broadcast %90 : vector<1x64xf32> to vector<512x64xf32>
    %92 = arith.mulf %89, %91 : vector<512x64xf32>
    %c0_44 = arith.constant 0 : index
    %c0_45 = arith.constant 0 : index
    %93 = vector.load %arg4[%c0_44, %c0_45] : memref<1x64xf32, #tpu.memory_space<vmem>>, vector<1x64xf32>
    %94 = vector.broadcast %93 : vector<1x64xf32> to vector<512x64xf32>
    %95 = arith.addf %92, %94 : vector<512x64xf32>
    %cst_46 = arith.constant 0.000000e+00 : f32
    %96 = vector.broadcast %cst_46 : f32 to vector<512x64xf32>
    %97 = arith.maximumf %95, %96 : vector<512x64xf32>
    %c504_i32_47 = arith.constant 504 : i32
    %98 = tpu.dynamic_rotate %97 by %c504_i32_47 dim 0 : vector<512x64xf32>, i32 -> vector<512x64xf32>
    %c448_i32_48 = arith.constant 448 : i32
    %99 = tpu.dynamic_rotate %97 by %c448_i32_48 dim 0 : vector<512x64xf32>, i32 -> vector<512x64xf32>
    %c440_i32_49 = arith.constant 440 : i32
    %100 = tpu.dynamic_rotate %97 by %c440_i32_49 dim 0 : vector<512x64xf32>, i32 -> vector<512x64xf32>
    %101 = arith.maximumf %97, %98 : vector<512x64xf32>
    %102 = arith.maximumf %99, %100 : vector<512x64xf32>
    %103 = arith.maximumf %101, %102 : vector<512x64xf32>
    %104 = vector.extract_strided_slice %103 {offsets = [0, 0], sizes = [8, 64], strides = [1, 1]} : vector<512x64xf32> to vector<8x64xf32>
    %105 = vector.extract_strided_slice %103 {offsets = [16, 0], sizes = [8, 64], strides = [1, 1]} : vector<512x64xf32> to vector<8x64xf32>
    %106 = vector.extract_strided_slice %103 {offsets = [32, 0], sizes = [8, 64], strides = [1, 1]} : vector<512x64xf32> to vector<8x64xf32>
    %107 = vector.extract_strided_slice %103 {offsets = [48, 0], sizes = [8, 64], strides = [1, 1]} : vector<512x64xf32> to vector<8x64xf32>
    %108 = vector.extract_strided_slice %103 {offsets = [128, 0], sizes = [8, 64], strides = [1, 1]} : vector<512x64xf32> to vector<8x64xf32>
    %109 = vector.extract_strided_slice %103 {offsets = [144, 0], sizes = [8, 64], strides = [1, 1]} : vector<512x64xf32> to vector<8x64xf32>
    %110 = vector.extract_strided_slice %103 {offsets = [160, 0], sizes = [8, 64], strides = [1, 1]} : vector<512x64xf32> to vector<8x64xf32>
    %111 = vector.extract_strided_slice %103 {offsets = [176, 0], sizes = [8, 64], strides = [1, 1]} : vector<512x64xf32> to vector<8x64xf32>
    %112 = vector.extract_strided_slice %103 {offsets = [256, 0], sizes = [8, 64], strides = [1, 1]} : vector<512x64xf32> to vector<8x64xf32>
    %113 = vector.extract_strided_slice %103 {offsets = [272, 0], sizes = [8, 64], strides = [1, 1]} : vector<512x64xf32> to vector<8x64xf32>
    %114 = vector.extract_strided_slice %103 {offsets = [288, 0], sizes = [8, 64], strides = [1, 1]} : vector<512x64xf32> to vector<8x64xf32>
    %115 = vector.extract_strided_slice %103 {offsets = [304, 0], sizes = [8, 64], strides = [1, 1]} : vector<512x64xf32> to vector<8x64xf32>
    %116 = vector.extract_strided_slice %103 {offsets = [384, 0], sizes = [8, 64], strides = [1, 1]} : vector<512x64xf32> to vector<8x64xf32>
    %117 = vector.extract_strided_slice %103 {offsets = [400, 0], sizes = [8, 64], strides = [1, 1]} : vector<512x64xf32> to vector<8x64xf32>
    %118 = vector.extract_strided_slice %103 {offsets = [416, 0], sizes = [8, 64], strides = [1, 1]} : vector<512x64xf32> to vector<8x64xf32>
    %119 = vector.extract_strided_slice %103 {offsets = [432, 0], sizes = [8, 64], strides = [1, 1]} : vector<512x64xf32> to vector<8x64xf32>
    %120 = tpu.concatenate %104, %105, %106, %107, %108, %109, %110, %111, %112, %113, %114, %115, %116, %117, %118, %119 in 0 : vector<8x64xf32>, vector<8x64xf32>, vector<8x64xf32>, vector<8x64xf32>, vector<8x64xf32>, vector<8x64xf32>, vector<8x64xf32>, vector<8x64xf32>, vector<8x64xf32>, vector<8x64xf32>, vector<8x64xf32>, vector<8x64xf32>, vector<8x64xf32>, vector<8x64xf32>, vector<8x64xf32>, vector<8x64xf32> -> vector<128x64xf32>
    %121 = tpu.iota {dimensions = array<i32: 0>} : vector<128x64xi32>
    %c32_i32 = arith.constant 32 : i32
    %122 = vector.broadcast %c32_i32 : i32 to vector<128x64xi32>
    %123 = arith.cmpi sge, %121, %122 : vector<128x64xi32>
    %c96_i32 = arith.constant 96 : i32
    %124 = vector.broadcast %c96_i32 : i32 to vector<128x64xi32>
    %125 = arith.cmpi slt, %121, %124 : vector<128x64xi32>
    %126 = tpu.iota {dimensions = array<i32: 0>} : vector<32x64xi32>
    %127 = vector.shape_cast %126 : vector<32x64xi32> to vector<1x32x64xi32>
    %128 = vector.shape_cast %127 : vector<1x32x64xi32> to vector<1x32x64xi32>
    %129 = vector.broadcast %128 : vector<1x32x64xi32> to vector<4x32x64xi32>
    %130 = vector.shape_cast %129 : vector<4x32x64xi32> to vector<128x64xi32>
    %c8_i32_50 = arith.constant 8 : i32
    %131 = vector.broadcast %c8_i32_50 : i32 to vector<128x64xi32>
    %132 = arith.cmpi sge, %130, %131 : vector<128x64xi32>
    %c24_i32 = arith.constant 24 : i32
    %133 = vector.broadcast %c24_i32 : i32 to vector<128x64xi32>
    %134 = arith.cmpi slt, %130, %133 : vector<128x64xi32>
    %cst_51 = arith.constant 0.000000e+00 : f32
    %135 = vector.broadcast %cst_51 : f32 to vector<128x64xf32>
    %c40_i32 = arith.constant 40 : i32
    %136 = tpu.dynamic_rotate %120 by %c40_i32 dim 0 : vector<128x64xf32>, i32 -> vector<128x64xf32>
    %137 = arith.andi %123, %132 : vector<128x64xi1>
    %cst_52 = arith.constant 0.000000e+00 : f32
    %138 = vector.broadcast %cst_52 : f32 to vector<128x64xf32>
    %139 = arith.select %137, %136, %138 : vector<128x64xi1>, vector<128x64xf32>
    %140 = arith.truncf %139 : vector<128x64xf32> to vector<128x64xbf16>
    %c0_53 = arith.constant 0 : index
    %c0_54 = arith.constant 0 : index
    %c0_55 = arith.constant 0 : index
    %141 = vector.load %arg5[%c0_53, %c0_54, %c0_55] : memref<9x64x64xbf16, #tpu.memory_space<vmem>>, vector<1x64x64xbf16>
    %142 = vector.shape_cast %141 : vector<1x64x64xbf16> to vector<64x64xbf16>
    %cst_56 = arith.constant dense<0.000000e+00> : vector<128x64xf32>
    %143 = tpu.matmul %140, %142, %cst_56 {dimension_numbers = #tpu.dot_dimension_numbers<[1], [0], [0], [1], [0, 0, 1, 1], [], []>} : vector<128x64xbf16>, vector<64x64xbf16>, vector<128x64xf32> -> vector<128x64xf32>
    %144 = arith.addf %135, %143 : vector<128x64xf32>
    %c32_i32_57 = arith.constant 32 : i32
    %145 = tpu.dynamic_rotate %120 by %c32_i32_57 dim 0 : vector<128x64xf32>, i32 -> vector<128x64xf32>
    %cst_58 = arith.constant 0.000000e+00 : f32
    %146 = vector.broadcast %cst_58 : f32 to vector<128x64xf32>
    %147 = arith.select %123, %145, %146 : vector<128x64xi1>, vector<128x64xf32>
    %148 = arith.truncf %147 : vector<128x64xf32> to vector<128x64xbf16>
    %c1_59 = arith.constant 1 : index
    %c0_60 = arith.constant 0 : index
    %c0_61 = arith.constant 0 : index
    %149 = vector.load %arg5[%c1_59, %c0_60, %c0_61] : memref<9x64x64xbf16, #tpu.memory_space<vmem>>, vector<1x64x64xbf16>
    %150 = vector.shape_cast %149 : vector<1x64x64xbf16> to vector<64x64xbf16>
    %cst_62 = arith.constant dense<0.000000e+00> : vector<128x64xf32>
    %151 = tpu.matmul %148, %150, %cst_62 {dimension_numbers = #tpu.dot_dimension_numbers<[1], [0], [0], [1], [0, 0, 1, 1], [], []>} : vector<128x64xbf16>, vector<64x64xbf16>, vector<128x64xf32> -> vector<128x64xf32>
    %152 = arith.addf %144, %151 : vector<128x64xf32>
    %c24_i32_63 = arith.constant 24 : i32
    %153 = tpu.dynamic_rotate %120 by %c24_i32_63 dim 0 : vector<128x64xf32>, i32 -> vector<128x64xf32>
    %154 = arith.andi %123, %134 : vector<128x64xi1>
    %cst_64 = arith.constant 0.000000e+00 : f32
    %155 = vector.broadcast %cst_64 : f32 to vector<128x64xf32>
    %156 = arith.select %154, %153, %155 : vector<128x64xi1>, vector<128x64xf32>
    %157 = arith.truncf %156 : vector<128x64xf32> to vector<128x64xbf16>
    %c2_65 = arith.constant 2 : index
    %c0_66 = arith.constant 0 : index
    %c0_67 = arith.constant 0 : index
    %158 = vector.load %arg5[%c2_65, %c0_66, %c0_67] : memref<9x64x64xbf16, #tpu.memory_space<vmem>>, vector<1x64x64xbf16>
    %159 = vector.shape_cast %158 : vector<1x64x64xbf16> to vector<64x64xbf16>
    %cst_68 = arith.constant dense<0.000000e+00> : vector<128x64xf32>
    %160 = tpu.matmul %157, %159, %cst_68 {dimension_numbers = #tpu.dot_dimension_numbers<[1], [0], [0], [1], [0, 0, 1, 1], [], []>} : vector<128x64xbf16>, vector<64x64xbf16>, vector<128x64xf32> -> vector<128x64xf32>
    %161 = arith.addf %152, %160 : vector<128x64xf32>
    %c8_i32_69 = arith.constant 8 : i32
    %162 = tpu.dynamic_rotate %120 by %c8_i32_69 dim 0 : vector<128x64xf32>, i32 -> vector<128x64xf32>
    %cst_70 = arith.constant 0.000000e+00 : f32
    %163 = vector.broadcast %cst_70 : f32 to vector<128x64xf32>
    %164 = arith.select %132, %162, %163 : vector<128x64xi1>, vector<128x64xf32>
    %165 = arith.truncf %164 : vector<128x64xf32> to vector<128x64xbf16>
    %c3_71 = arith.constant 3 : index
    %c0_72 = arith.constant 0 : index
    %c0_73 = arith.constant 0 : index
    %166 = vector.load %arg5[%c3_71, %c0_72, %c0_73] : memref<9x64x64xbf16, #tpu.memory_space<vmem>>, vector<1x64x64xbf16>
    %167 = vector.shape_cast %166 : vector<1x64x64xbf16> to vector<64x64xbf16>
    %cst_74 = arith.constant dense<0.000000e+00> : vector<128x64xf32>
    %168 = tpu.matmul %165, %167, %cst_74 {dimension_numbers = #tpu.dot_dimension_numbers<[1], [0], [0], [1], [0, 0, 1, 1], [], []>} : vector<128x64xbf16>, vector<64x64xbf16>, vector<128x64xf32> -> vector<128x64xf32>
    %169 = arith.addf %161, %168 : vector<128x64xf32>
    %170 = arith.truncf %120 : vector<128x64xf32> to vector<128x64xbf16>
    %c4_75 = arith.constant 4 : index
    %c0_76 = arith.constant 0 : index
    %c0_77 = arith.constant 0 : index
    %171 = vector.load %arg5[%c4_75, %c0_76, %c0_77] : memref<9x64x64xbf16, #tpu.memory_space<vmem>>, vector<1x64x64xbf16>
    %172 = vector.shape_cast %171 : vector<1x64x64xbf16> to vector<64x64xbf16>
    %cst_78 = arith.constant dense<0.000000e+00> : vector<128x64xf32>
    %173 = tpu.matmul %170, %172, %cst_78 {dimension_numbers = #tpu.dot_dimension_numbers<[1], [0], [0], [1], [0, 0, 1, 1], [], []>} : vector<128x64xbf16>, vector<64x64xbf16>, vector<128x64xf32> -> vector<128x64xf32>
    %174 = arith.addf %169, %173 : vector<128x64xf32>
    %c120_i32 = arith.constant 120 : i32
    %175 = tpu.dynamic_rotate %120 by %c120_i32 dim 0 : vector<128x64xf32>, i32 -> vector<128x64xf32>
    %cst_79 = arith.constant 0.000000e+00 : f32
    %176 = vector.broadcast %cst_79 : f32 to vector<128x64xf32>
    %177 = arith.select %134, %175, %176 : vector<128x64xi1>, vector<128x64xf32>
    %178 = arith.truncf %177 : vector<128x64xf32> to vector<128x64xbf16>
    %c5_80 = arith.constant 5 : index
    %c0_81 = arith.constant 0 : index
    %c0_82 = arith.constant 0 : index
    %179 = vector.load %arg5[%c5_80, %c0_81, %c0_82] : memref<9x64x64xbf16, #tpu.memory_space<vmem>>, vector<1x64x64xbf16>
    %180 = vector.shape_cast %179 : vector<1x64x64xbf16> to vector<64x64xbf16>
    %cst_83 = arith.constant dense<0.000000e+00> : vector<128x64xf32>
    %181 = tpu.matmul %178, %180, %cst_83 {dimension_numbers = #tpu.dot_dimension_numbers<[1], [0], [0], [1], [0, 0, 1, 1], [], []>} : vector<128x64xbf16>, vector<64x64xbf16>, vector<128x64xf32> -> vector<128x64xf32>
    %182 = arith.addf %174, %181 : vector<128x64xf32>
    %c104_i32 = arith.constant 104 : i32
    %183 = tpu.dynamic_rotate %120 by %c104_i32 dim 0 : vector<128x64xf32>, i32 -> vector<128x64xf32>
    %184 = arith.andi %125, %132 : vector<128x64xi1>
    %cst_84 = arith.constant 0.000000e+00 : f32
    %185 = vector.broadcast %cst_84 : f32 to vector<128x64xf32>
    %186 = arith.select %184, %183, %185 : vector<128x64xi1>, vector<128x64xf32>
    %187 = arith.truncf %186 : vector<128x64xf32> to vector<128x64xbf16>
    %c6_85 = arith.constant 6 : index
    %c0_86 = arith.constant 0 : index
    %c0_87 = arith.constant 0 : index
    %188 = vector.load %arg5[%c6_85, %c0_86, %c0_87] : memref<9x64x64xbf16, #tpu.memory_space<vmem>>, vector<1x64x64xbf16>
    %189 = vector.shape_cast %188 : vector<1x64x64xbf16> to vector<64x64xbf16>
    %cst_88 = arith.constant dense<0.000000e+00> : vector<128x64xf32>
    %190 = tpu.matmul %187, %189, %cst_88 {dimension_numbers = #tpu.dot_dimension_numbers<[1], [0], [0], [1], [0, 0, 1, 1], [], []>} : vector<128x64xbf16>, vector<64x64xbf16>, vector<128x64xf32> -> vector<128x64xf32>
    %191 = arith.addf %182, %190 : vector<128x64xf32>
    %c96_i32_89 = arith.constant 96 : i32
    %192 = tpu.dynamic_rotate %120 by %c96_i32_89 dim 0 : vector<128x64xf32>, i32 -> vector<128x64xf32>
    %cst_90 = arith.constant 0.000000e+00 : f32
    %193 = vector.broadcast %cst_90 : f32 to vector<128x64xf32>
    %194 = arith.select %125, %192, %193 : vector<128x64xi1>, vector<128x64xf32>
    %195 = arith.truncf %194 : vector<128x64xf32> to vector<128x64xbf16>
    %c7_91 = arith.constant 7 : index
    %c0_92 = arith.constant 0 : index
    %c0_93 = arith.constant 0 : index
    %196 = vector.load %arg5[%c7_91, %c0_92, %c0_93] : memref<9x64x64xbf16, #tpu.memory_space<vmem>>, vector<1x64x64xbf16>
    %197 = vector.shape_cast %196 : vector<1x64x64xbf16> to vector<64x64xbf16>
    %cst_94 = arith.constant dense<0.000000e+00> : vector<128x64xf32>
    %198 = tpu.matmul %195, %197, %cst_94 {dimension_numbers = #tpu.dot_dimension_numbers<[1], [0], [0], [1], [0, 0, 1, 1], [], []>} : vector<128x64xbf16>, vector<64x64xbf16>, vector<128x64xf32> -> vector<128x64xf32>
    %199 = arith.addf %191, %198 : vector<128x64xf32>
    %c88_i32 = arith.constant 88 : i32
    %200 = tpu.dynamic_rotate %120 by %c88_i32 dim 0 : vector<128x64xf32>, i32 -> vector<128x64xf32>
    %201 = arith.andi %125, %134 : vector<128x64xi1>
    %cst_95 = arith.constant 0.000000e+00 : f32
    %202 = vector.broadcast %cst_95 : f32 to vector<128x64xf32>
    %203 = arith.select %201, %200, %202 : vector<128x64xi1>, vector<128x64xf32>
    %204 = arith.truncf %203 : vector<128x64xf32> to vector<128x64xbf16>
    %c8_96 = arith.constant 8 : index
    %c0_97 = arith.constant 0 : index
    %c0_98 = arith.constant 0 : index
    %205 = vector.load %arg5[%c8_96, %c0_97, %c0_98] : memref<9x64x64xbf16, #tpu.memory_space<vmem>>, vector<1x64x64xbf16>
    %206 = vector.shape_cast %205 : vector<1x64x64xbf16> to vector<64x64xbf16>
    %cst_99 = arith.constant dense<0.000000e+00> : vector<128x64xf32>
    %207 = tpu.matmul %204, %206, %cst_99 {dimension_numbers = #tpu.dot_dimension_numbers<[1], [0], [0], [1], [0, 0, 1, 1], [], []>} : vector<128x64xbf16>, vector<64x64xbf16>, vector<128x64xf32> -> vector<128x64xf32>
    %208 = arith.addf %199, %207 : vector<128x64xf32>
    %c0_100 = arith.constant 0 : index
    %c0_101 = arith.constant 0 : index
    %209 = vector.load %arg6[%c0_100, %c0_101] : memref<1x64xf32, #tpu.memory_space<vmem>>, vector<1x64xf32>
    %210 = vector.broadcast %209 : vector<1x64xf32> to vector<128x64xf32>
    %211 = arith.mulf %208, %210 : vector<128x64xf32>
    %c0_102 = arith.constant 0 : index
    %c0_103 = arith.constant 0 : index
    %212 = vector.load %arg7[%c0_102, %c0_103] : memref<1x64xf32, #tpu.memory_space<vmem>>, vector<1x64xf32>
    %213 = vector.broadcast %212 : vector<1x64xf32> to vector<128x64xf32>
    %214 = arith.addf %211, %213 : vector<128x64xf32>
    %cst_104 = arith.constant 0.000000e+00 : f32
    %215 = vector.broadcast %cst_104 : f32 to vector<128x64xf32>
    %216 = arith.maximumf %214, %215 : vector<128x64xf32>
    %c120_i32_105 = arith.constant 120 : i32
    %217 = tpu.dynamic_rotate %216 by %c120_i32_105 dim 0 : vector<128x64xf32>, i32 -> vector<128x64xf32>
    %c96_i32_106 = arith.constant 96 : i32
    %218 = tpu.dynamic_rotate %216 by %c96_i32_106 dim 0 : vector<128x64xf32>, i32 -> vector<128x64xf32>
    %c88_i32_107 = arith.constant 88 : i32
    %219 = tpu.dynamic_rotate %216 by %c88_i32_107 dim 0 : vector<128x64xf32>, i32 -> vector<128x64xf32>
    %220 = arith.maximumf %216, %217 : vector<128x64xf32>
    %221 = arith.maximumf %218, %219 : vector<128x64xf32>
    %222 = arith.maximumf %220, %221 : vector<128x64xf32>
    %223 = vector.extract_strided_slice %222 {offsets = [0, 0], sizes = [8, 64], strides = [1, 1]} : vector<128x64xf32> to vector<8x64xf32>
    %224 = vector.extract_strided_slice %222 {offsets = [16, 0], sizes = [8, 64], strides = [1, 1]} : vector<128x64xf32> to vector<8x64xf32>
    %225 = vector.extract_strided_slice %222 {offsets = [64, 0], sizes = [8, 64], strides = [1, 1]} : vector<128x64xf32> to vector<8x64xf32>
    %226 = vector.extract_strided_slice %222 {offsets = [80, 0], sizes = [8, 64], strides = [1, 1]} : vector<128x64xf32> to vector<8x64xf32>
    %227 = tpu.concatenate %223, %224, %225, %226 in 0 : vector<8x64xf32>, vector<8x64xf32>, vector<8x64xf32>, vector<8x64xf32> -> vector<32x64xf32>
    %228 = vector.shape_cast %227 : vector<32x64xf32> to vector<4x8x64xf32>
    %229 = arith.truncf %228 : vector<4x8x64xf32> to vector<4x8x64xbf16>
    %c0_108 = arith.constant 0 : index
    %c0_109 = arith.constant 0 : index
    %c0_110 = arith.constant 0 : index
    %230 = vector.load %arg8[%c0_108, %c0_109, %c0_110] : memref<4x128x64xbf16, #tpu.memory_space<vmem>>, vector<4x128x64xbf16>
    "tpu.trace_start"() <{level = 10 : i32, message = "rjc,rnc->rjn"}> : () -> ()
    %cst_111 = arith.constant dense<0.000000e+00> : vector<4x128x8xf32>
    %231 = tpu.matmul %230, %229, %cst_111 {dimension_numbers = #tpu.dot_dimension_numbers<[2], [2], [1], [1], [0, 0, 0, 1, 1, 1], [0], [0]>} : vector<4x128x64xbf16>, vector<4x8x64xbf16>, vector<4x128x8xf32> -> vector<4x128x8xf32>
    "tpu.trace_stop"() : () -> ()
    %cst_112 = arith.constant dense<0.000000e+00> : vector<128x8xf32>
    %232 = vector.multi_reduction <add>, %231, %cst_112 [0] : vector<4x128x8xf32> to vector<128x8xf32>
    %c0_113 = arith.constant 0 : index
    %c0_114 = arith.constant 0 : index
    %233 = vector.load %arg9[%c0_113, %c0_114] : memref<128x1xf32, #tpu.memory_space<vmem>>, vector<128x1xf32>
    %234 = vector.broadcast %233 : vector<128x1xf32> to vector<128x8xf32>
    %235 = arith.addf %232, %234 : vector<128x8xf32>
    %cst_115 = arith.constant 0.000000e+00 : f32
    %236 = vector.broadcast %cst_115 : f32 to vector<128x8xf32>
    %237 = arith.maximumf %235, %236 : vector<128x8xf32>
    %c0_116 = arith.constant 0 : index
    %c0_117 = arith.constant 0 : index
    %238 = vector.load %arg10[%c0_116, %c0_117] : memref<128x1xf32, #tpu.memory_space<vmem>>, vector<128x1xf32>
    %239 = vector.broadcast %238 : vector<128x1xf32> to vector<128x8xf32>
    %240 = arith.mulf %237, %239 : vector<128x8xf32>
    %cst_118 = arith.constant dense<0.000000e+00> : vector<8xf32>
    %241 = vector.multi_reduction <add>, %240, %cst_118 [0] : vector<128x8xf32> to vector<8xf32>
    %242 = vector.shape_cast %241 : vector<8xf32> to vector<1x8xf32>
    %c0_119 = arith.constant 0 : index
    %c0_120 = arith.constant 0 : index
    %243 = vector.load %arg11[%c0_119, %c0_120] : memref<1x1xf32, #tpu.memory_space<vmem>>, vector<1x1xf32>
    %244 = vector.broadcast %243 : vector<1x1xf32> to vector<1x8xf32>
    %245 = arith.addf %242, %244 : vector<1x8xf32>
    %246 = arith.negf %245 : vector<1x8xf32>
    %247 = math.exp %246 : vector<1x8xf32>
    %cst_121 = arith.constant 1.000000e+00 : f32
    %248 = vector.broadcast %cst_121 : f32 to vector<1x8xf32>
    %249 = arith.addf %248, %247 : vector<1x8xf32>
    %250 = arith.divf %248, %249 : vector<1x8xf32>
    %251 = vector.shape_cast %250 : vector<1x8xf32> to vector<1x1x8xf32>
    %c0_122 = arith.constant 0 : index
    %c0_123 = arith.constant 0 : index
    %c0_124 = arith.constant 0 : index
    %252 = vector.load %arg12[%c0_122, %c0_123, %c0_124] : memref<1x1x8xf32, #tpu.memory_space<vmem>>, vector<1x1x8xf32>
    tpu.vector_store %arg12[%c0_122, %c0_123, %c0_124], %251 {strides = array<i32>} : memref<1x1x8xf32, #tpu.memory_space<vmem>>, vector<1x1x8xf32>,
    return
  }
  func.func @transform_0(%arg0: i32) -> (i32, i32, i32) {
    %c0_i32 = arith.constant 0 : i32
    %c0_i32_0 = arith.constant 0 : i32
    %c0_i32_1 = arith.constant 0 : i32
    return %c0_i32, %arg0, %c0_i32_0 : i32, i32, i32
  }
  func.func @transform_1(%arg0: i32) -> (i32, i32, i32) {
    %c0_i32 = arith.constant 0 : i32
    %c0_i32_0 = arith.constant 0 : i32
    %c0_i32_1 = arith.constant 0 : i32
    %c0_i32_2 = arith.constant 0 : i32
    return %c0_i32, %c0_i32_0, %c0_i32_1 : i32, i32, i32
  }
  func.func @transform_2(%arg0: i32) -> (i32, i32) {
    %c0_i32 = arith.constant 0 : i32
    %c0_i32_0 = arith.constant 0 : i32
    %c0_i32_1 = arith.constant 0 : i32
    return %c0_i32, %c0_i32_0 : i32, i32
  }
  func.func @transform_3(%arg0: i32) -> (i32, i32) {
    %c0_i32 = arith.constant 0 : i32
    %c0_i32_0 = arith.constant 0 : i32
    %c0_i32_1 = arith.constant 0 : i32
    return %c0_i32, %c0_i32_0 : i32, i32
  }
  func.func @transform_4(%arg0: i32) -> (i32, i32, i32) {
    %c0_i32 = arith.constant 0 : i32
    %c0_i32_0 = arith.constant 0 : i32
    %c0_i32_1 = arith.constant 0 : i32
    %c0_i32_2 = arith.constant 0 : i32
    return %c0_i32, %c0_i32_0, %c0_i32_1 : i32, i32, i32
  }
  func.func @transform_5(%arg0: i32) -> (i32, i32) {
    %c0_i32 = arith.constant 0 : i32
    %c0_i32_0 = arith.constant 0 : i32
    %c0_i32_1 = arith.constant 0 : i32
    return %c0_i32, %c0_i32_0 : i32, i32
  }
  func.func @transform_6(%arg0: i32) -> (i32, i32) {
    %c0_i32 = arith.constant 0 : i32
    %c0_i32_0 = arith.constant 0 : i32
    %c0_i32_1 = arith.constant 0 : i32
    return %c0_i32, %c0_i32_0 : i32, i32
  }
  func.func @transform_7(%arg0: i32) -> (i32, i32, i32) {
    %c0_i32 = arith.constant 0 : i32
    %c0_i32_0 = arith.constant 0 : i32
    %c0_i32_1 = arith.constant 0 : i32
    %c0_i32_2 = arith.constant 0 : i32
    return %c0_i32, %c0_i32_0, %c0_i32_1 : i32, i32, i32
  }
  func.func @transform_8(%arg0: i32) -> (i32, i32) {
    %c0_i32 = arith.constant 0 : i32
    %c0_i32_0 = arith.constant 0 : i32
    %c0_i32_1 = arith.constant 0 : i32
    return %c0_i32, %c0_i32_0 : i32, i32
  }
  func.func @transform_9(%arg0: i32) -> (i32, i32) {
    %c0_i32 = arith.constant 0 : i32
    %c0_i32_0 = arith.constant 0 : i32
    %c0_i32_1 = arith.constant 0 : i32
    return %c0_i32, %c0_i32_0 : i32, i32
  }
  func.func @transform_10(%arg0: i32) -> (i32, i32) {
    %c0_i32 = arith.constant 0 : i32
    %c0_i32_0 = arith.constant 0 : i32
    %c0_i32_1 = arith.constant 0 : i32
    return %c0_i32, %c0_i32_0 : i32, i32
  }
  func.func @transform_11(%arg0: i32) -> (i32, i32, i32) {
    %c0_i32 = arith.constant 0 : i32
    %c0_i32_0 = arith.constant 0 : i32
    %c0_i32_1 = arith.constant 0 : i32
    return %arg0, %c0_i32, %c0_i32_0 : i32, i32, i32
  }
}

</mosaic_0001>

<bundles_post_ra>
// kernel: _lambda_.1
= control target key start
LH: loop header
LB: loop body
LE: loop exit
PB: predicated region body
PF: predicated region fallthrough
CT: control target
= control target key end

     0   :  { %v10349_v30 = vmov 0.0|0.0   ;;  %v10352_v56 = vmov 0.0   ;;  %vm4312_vm0 = vcmask 523264   ;;  %vm6137_vm1 = vcmask 64512   ;;  %s10337_s1 = inlined_call_operand.vmem [shape: bf16[9,128,64], index: 1, kind: input, shape index: {}]   ;;  %s10338_s0 = inlined_call_operand.vmem [shape: f32[64,8,128], index: 0, kind: input, shape index: {}]   ;;  %s10339_s2 = inlined_call_operand.vmem [shape: f32[1,64], index: 2, kind: input, shape index: {}]   ;;  %s10340_s3 = inlined_call_operand.vmem [shape: f32[1,64], index: 3, kind: input, shape index: {}]   ;;  %s10341_s4 = inlined_call_operand.vmem [shape: bf16[9,64,64], index: 4, kind: input, shape index: {}]   ;;  %s10342_s5 = inlined_call_operand.vmem [shape: f32[1,64], index: 5, kind: input, shape index: {}]   ;;  %s10343_s6 = inlined_call_operand.vmem [shape: f32[1,64], index: 6, kind: input, shape index: {}]   ;;  %s10344_s8 = inlined_call_operand.vmem [shape: f32[128,1], index: 8, kind: input, shape index: {}]   ;;  %s10345_s7 = inlined_call_operand.vmem [shape: bf16[4,128,64], index: 7, kind: input, shape index: {}]   ;;  %s10346_s9 = inlined_call_operand.vmem [shape: f32[128,1], index: 9, kind: input, shape index: {}]   ;;  %s10347_s10 = inlined_call_operand.<no memory space> [shape: f32[1,1], index: 10, kind: input, shape index: {}]   ;;  %s10348_s11 = inlined_call_operand.vmem [shape: f32[1,1,8], index: 11, kind: output, shape index: {}]  }
   0x1   :  { %v7420_v0 = vld [vmem:[%s10337_s1 + $0x78] sm:$0xff]  ;;  %v7419_v1 = vld [vmem:[%s10337_s1 + $0x70] sm:$0xff]  ;;  %v7418_v2 = vld [vmem:[%s10337_s1 + $0x68] sm:$0xff]  ;;  %vm6554_vm4 = vcmask 57344  }
   0x2   :  { %651 = vmatpush.bf16.msra.mxu0 %v7420_v0  ;;  %7545 = vmatpush.bf16.msra.mxu1 %v7420_v0  ;;  %v7417_v3 = vld [vmem:[%s10337_s1 + $0x60] sm:$0xff]  ;;  %v7416_v4 = vld [vmem:[%s10337_s1 + $0x58] sm:$0xff]  ;;  %v86_v5 = vld [vmem:[%s10338_s0 + $0x168] sm:$0xff] }
   0x3   :  { %7546 = vmatpush.bf16.msra.mxu2 %v7420_v0  ;;  %7547 = vmatpush.bf16.msra.mxu3 %v7420_v0  ;;  %v90_v6 = vld [vmem:[%s10338_s0 + $0x188] sm:$0xff]  ;;  %v93_v7 = vld [vmem:[%s10338_s0 + $0x1a0] sm:$0xff]  ;;  %v7680_v8 = vld [vmem:[%s10338_s0 + $0x170] sm:$0xff] }
   0x4   :  { %v7685_v9 = vld [vmem:[%s10338_s0 + $0x190] sm:$0xff]  ;;  %v7690_v10 = vld [vmem:[%s10338_s0 + $0x198] sm:$0xff]  ;;  %v94_v11 = vld [vmem:[%s10338_s0 + $0x1a8] sm:$0xff]  ;;  %v7696_v12 = vpack.c.bf16 %v7680_v8, %v86_v5 }
   0x5   :  { %v7699_v13 = vpack.c.bf16 %v7685_v9, %v90_v6  ;;  %v7702_v14 = vpack.c.bf16 %v93_v7, %v7690_v10  ;;  %v95_v15 = vld [vmem:[%s10338_s0 + $0x1b0] sm:$0xff]  ;;  %v7414_v18 = vld [vmem:[%s10337_s1 + $0x48] sm:$0xff]  ;;  %v7413_v19 = vld [vmem:[%s10337_s1 + $0x40] sm:$0xff]  ;;  %v7737_v26 = vpack.c.bf16 %v94_v11, %v93_v7  ;;  %v7790_v43 = vpack.c.bf16 %v7690_v10, %v7685_v9 }
   0x6   :  { %652 = vmatpush.bf16.msra.mxu0 %v7419_v1  ;;  %7548 = vmatpush.bf16.msra.mxu1 %v7419_v1  ;;  %v7415_v16 = vld [vmem:[%s10337_s1 + $0x50] sm:$0xff]  ;;  %v7710_v17 = vpack.c.bf16 %v95_v15, %v94_v11  ;;  %v7721_v20 = vld [vmem:[%s10338_s0 + $0x160] sm:$0xff]  ;;  %v7412_v22 = vld [vmem:[%s10337_s1 + $0x38] sm:$0xff] }
   0x7   :  { %7549 = vmatpush.bf16.msra.mxu2 %v7419_v1  ;;  %7550 = vmatpush.bf16.msra.mxu3 %v7419_v1  ;;  %10446 = vst [vmem:[#allocation3_spill] sm:$0xff] %v7699_v13  ;;  %v89_v21 = vld [vmem:[%s10338_s0 + $0x180] sm:$0xff]  ;;  %v7428_v23 = vld [vmem:[%s10337_s1 + $0xb8] sm:$0xff]  ;;  %v7733_v24 = vpack.c.bf16 %v86_v5, %v7721_v20  ;;  %v7411_v28 = vld [vmem:[%s10337_s1 + $0x30] sm:$0xff] }
   0x8   :  { %10447 = vst [vmem:[#allocation4_spill] sm:$0xff] %v7702_v14  ;;  %v7735_v25 = vpack.c.bf16 %v90_v6, %v89_v21  ;;  %v7436_v27 = vld [vmem:[%s10337_s1 + $0xf8] sm:$0xff]  ;;  %v7427_v29 = vld [vmem:[%s10337_s1 + $0xb0] sm:$0xff]  ;;  %v7410_v32 = vld [vmem:[%s10337_s1 + $0x28] sm:$0xff] }
   0x9   :  { %10448 = vst [vmem:[#allocation5_spill] sm:$0xff] %v7710_v17  ;;  %v7435_v31 = vld [vmem:[%s10337_s1 + $0xf0] sm:$0xff]  ;;  %v7426_v33 = vld [vmem:[%s10337_s1 + $0xa8] sm:$0xff]  ;;  %v7409_v35 = vld [vmem:[%s10337_s1 + $0x20] sm:$0xff] }
   0xa   :  { %653 = vmatpush.bf16.msra.mxu0 %v7418_v2  ;;  %7551 = vmatpush.bf16.msra.mxu1 %v7418_v2  ;;  %10449 = vst [vmem:[#allocation6_spill] sm:$0xff] %v7733_v24  ;;  %v7434_v34 = vld [vmem:[%s10337_s1 + $0xe8] sm:$0xff]  ;;  %v7425_v36 = vld [vmem:[%s10337_s1 + $0xa0] sm:$0xff]  ;;  %v88_v37 = vld [vmem:[%s10338_s0 + $0x178] sm:$0xff] }
   0xb   :  { %7552 = vmatpush.bf16.msra.mxu2 %v7418_v2  ;;  %7553 = vmatpush.bf16.msra.mxu3 %v7418_v2  ;;  %10450 = vst [vmem:[#allocation7_spill] sm:$0xff] %v7735_v25  ;;  %v7433_v38 = vld [vmem:[%s10337_s1 + $0xe0] sm:$0xff]  ;;  %v96_v39 = vld [vmem:[%s10338_s0 + $0x1b8] sm:$0xff]  ;;  %v7786_v42 = vpack.c.bf16 %v88_v37, %v7680_v8  ;;  %v7407_v46 = vld [vmem:[%s10337_s1 + $0x10] sm:$0xff] }
   0xc   :  { %10451 = vst [vmem:[#allocation8_spill] sm:$0xff] %v7737_v26  ;;  %v7408_v40 = vld [vmem:[%s10337_s1 + $0x18] sm:$0xff]  ;;  %v7792_v44 = vpack.c.bf16 %v96_v39, %v95_v15  ;;  %v7423_v47 = vld [vmem:[%s10337_s1 + $0x90] sm:$0xff]  ;;  %v7406_v49 = vld [vmem:[%s10337_s1 + $0x8] sm:$0xff] }
   0xd   :  { %v7424_v41 = vld [vmem:[%s10337_s1 + $0x98] sm:$0xff]  ;;  %10452 = vst [vmem:[#allocation9_spill] sm:$0xff] %v7786_v42  ;;  %v7431_v48 = vld [vmem:[%s10337_s1 + $0xd0] sm:$0xff]  ;;  %v7422_v50 = vld [vmem:[%s10337_s1 + $0x88] sm:$0xff] }
   0xe   :  { %654 = vmatpush.bf16.msra.mxu0 %v7417_v3  ;;  %7554 = vmatpush.bf16.msra.mxu1 %v7417_v3  ;;  %10453 = vst [vmem:[#allocation10_spill] sm:$0xff] %v7790_v43  ;;  %v7432_v45 = vld [vmem:[%s10337_s1 + $0xd8] sm:$0xff]  ;;  %v7430_v51 = vld [vmem:[%s10337_s1 + $0xc8] sm:$0xff]  ;;  %v7405_v52 = vld [vmem:[%s10337_s1] sm:$0xff] }
   0xf   :  { %7555 = vmatpush.bf16.msra.mxu2 %v7417_v3  ;;  %7556 = vmatpush.bf16.msra.mxu3 %v7417_v3  ;;  %10454 = vst [vmem:[#allocation11_spill] sm:$0xff] %v7792_v44  ;;  %v7421_v53 = vld [vmem:[%s10337_s1 + $0x80] sm:$0xff]  ;;  %v42_v58 = vld [vmem:[%s10338_s0 + $0x8] sm:$0xff]  ;;  %v43_v59 = vld [vmem:[%s10338_s0 + $0x10] sm:$0xff] }
  0x10   :  { %v7429_v54 = vld [vmem:[%s10337_s1 + $0xc0] sm:$0xff]  ;;  %v7841_v60 = vpack.c.bf16 %v43_v59, %v42_v58  ;;  %v44_v61 = vld [vmem:[%s10338_s0 + $0x18] sm:$0xff]  ;;  %v46_v1 = vld [vmem:[%s10338_s0 + $0x28] sm:$0xff] }
  0x11   :  { %v41_v55 = vld [vmem:[%s10338_s0] sm:$0xff]  ;;  %v47_v2 = vld [vmem:[%s10338_s0 + $0x30] sm:$0xff]  ;;  %v7867_v3 = vpack.c.bf16 %v44_v61, %v43_v59  ;;  %v7889_v8 = vld [vmem:[%s10338_s0 + $0x38] sm:$0xff] }
  0x12   :  { %655 = vmatpush.bf16.msra.mxu0 %v7416_v4  ;;  %7557 = vmatpush.bf16.msra.mxu1 %v7416_v4  ;;  %v446_v57 = vpack.c.bf16 %v41_v55, %v10352_v56  ;;  %v45_v62 = vld [vmem:[%s10338_s0 + $0x20] sm:$0xff]  ;;  %v7853_v63 = vpack.c.bf16 %v42_v58, %v41_v55  ;;  %v50_v9 = vld [vmem:[%s10338_s0 + $0x48] sm:$0xff]  ;;  %v51_v10 = vld [vmem:[%s10338_s0 + $0x50] sm:$0xff]  ;;  %v7898_v11 = vpack.c.bf16 %v7889_v8, %v47_v2  ;;  %v10351_v39 = vpack.c.bf16 0.0, %v7889_v8 }
  0x13   :  { %7558 = vmatpush.bf16.msra.mxu2 %v7416_v4  ;;  %7559 = vmatpush.bf16.msra.mxu3 %v7416_v4  ;;  %v7855_v0 = vpack.c.bf16 %v45_v62, %v44_v61  ;;  %v7869_v4 = vpack.c.bf16 %v47_v2, %v46_v1  ;;  %v49_v5 = vld [vmem:[%s10338_s0 + $0x40] sm:$0xff]  ;;  %v7878_v6 = vpack.c.bf16 %v46_v1, %v45_v62 }
  0x14   :  { %v7881_v7 = vpack.c.bf16 %v49_v5, %v10352_v56  ;;  %v7900_v15 = vpack.c.bf16 %v51_v10, %v50_v9 }
  0x16   :  { %656 = vmatpush.bf16.msra.mxu0 %v7415_v16  ;;  %7560 = vmatpush.bf16.msra.mxu1 %v7415_v16 }
  0x17   :  { %7561 = vmatpush.bf16.msra.mxu2 %v7415_v16  ;;  %7562 = vmatpush.bf16.msra.mxu3 %v7415_v16  ;;  %v52_v16 = vld [vmem:[%s10338_s0 + $0x58] sm:$0xff] }
  0x1a   :  { %657 = vmatpush.bf16.msra.mxu0 %v7414_v18  ;;  %7563 = vmatpush.bf16.msra.mxu1 %v7414_v18 }
  0x1b   :  { %7564 = vmatpush.bf16.msra.mxu2 %v7414_v18  ;;  %7565 = vmatpush.bf16.msra.mxu3 %v7414_v18  ;;  %v53_v18 = vld [vmem:[%s10338_s0 + $0x60] sm:$0xff] }
  0x1e   :  { %658 = vmatpush.bf16.msra.mxu0 %v7413_v19  ;;  %7566 = vmatpush.bf16.msra.mxu1 %v7413_v19 }
  0x1f   :  { %7567 = vmatpush.bf16.msra.mxu2 %v7413_v19  ;;  %7568 = vmatpush.bf16.msra.mxu3 %v7413_v19  ;;  %v7912_v19 = vpack.c.bf16 %v50_v9, %v49_v5  ;;  %v56_v5 = vld [vmem:[%s10338_s0 + $0x78] sm:$0xff]  ;;  %v58_v9 = vld [vmem:[%s10338_s0 + $0x88] sm:$0xff] }
  0x21   :  { %659 = vmatmul.bf16.vlgmr.msra.gmra.mxu0 %v10349_v30  ;;  %789 = vmatmul.bf16.vlgmr.msra.gmra.mxu1 %v7733_v24 }
  0x22   :  { %868 = vmatpush.bf16.msrb.mxu1 %v7412_v22  ;;  %799 = vmatmul.bf16.vlgmr.msra.gmra.mxu2 %v7735_v25 }
  0x23   :  { %1262 = vmatpush.bf16.msrb.mxu2 %v7428_v23  ;;  %809 = vmatmul.bf16.vlgmr.msra.gmra.mxu3 %v7737_v26  ;;  %v7916_v23 = vpack.c.bf16 %v53_v18, %v52_v16 }
  0x24   :  { %1656 = vmatpush.bf16.msrb.mxu3 %v7436_v27 }
  0x25   :  { %10455 = vst [vmem:[#allocation12_spill] sm:$0xff] %v7916_v23 }
  0x26   :  { %869 = vmatpush.bf16.msrb.mxu1 %v7411_v28 }
  0x27   :  { %1263 = vmatpush.bf16.msrb.mxu2 %v7427_v29 }
  0x28   :  { %1657 = vmatpush.bf16.msrb.mxu3 %v7435_v31 }
  0x2a   :  { %870 = vmatpush.bf16.msrb.mxu1 %v7410_v32  ;;  %v54_v32 = vld [vmem:[%s10338_s0 + $0x68] sm:$0xff] }
  0x2b   :  { %1264 = vmatpush.bf16.msrb.mxu2 %v7426_v33  ;;  %v55_v33 = vld [vmem:[%s10338_s0 + $0x70] sm:$0xff] }
  0x2c   :  { %1658 = vmatpush.bf16.msrb.mxu3 %v7434_v34 }
  0x2e   :  { %871 = vmatpush.bf16.msrb.mxu1 %v7409_v35 }
  0x2f   :  { %1265 = vmatpush.bf16.msrb.mxu2 %v7425_v36  ;;  %v7938_v36 = vpack.c.bf16 %v52_v16, %v51_v10  ;;  %v59_v10 = vld [vmem:[%s10338_s0 + $0x90] sm:$0xff] }
  0x30   :  { %1659 = vmatpush.bf16.msrb.mxu3 %v7433_v38 }
  0x31   :  { %664 = vmatmul.bf16.gmra.mxu0 %v10349_v30  ;;  %794 = vmatmul.bf16.gmra.mxu1 %v7786_v42 }
  0x32   :  { %872 = vmatpush.bf16.msrb.mxu1 %v7408_v40  ;;  %804 = vmatmul.bf16.gmra.mxu2 %v7790_v43  ;;  %v7943_v40 = vpack.c.bf16 %v55_v33, %v54_v32 }
  0x33   :  { %1266 = vmatpush.bf16.msrb.mxu2 %v7424_v41  ;;  %814 = vmatmul.bf16.gmra.mxu3 %v7792_v44 }
  0x34   :  { %1660 = vmatpush.bf16.msrb.mxu3 %v7432_v45  ;;  %10460 = vst [vmem:[#allocation17_spill] sm:$0xff] %v7943_v40 }
  0x36   :  { %873 = vmatpush.bf16.msrb.mxu1 %v7407_v46 }
  0x37   :  { %1267 = vmatpush.bf16.msrb.mxu2 %v7423_v47 }
  0x38   :  { %1661 = vmatpush.bf16.msrb.mxu3 %v7431_v48  ;;  %v57_v48 = vld [vmem:[%s10338_s0 + $0x80] sm:$0xff] }
  0x3a   :  { %874 = vmatpush.bf16.msrb.mxu1 %v7406_v49 }
  0x3b   :  { %1268 = vmatpush.bf16.msrb.mxu2 %v7422_v50 }
  0x3c   :  { %1662 = vmatpush.bf16.msrb.mxu3 %v7430_v51  ;;  %v7963_v51 = vpack.c.bf16 %v54_v32, %v53_v18 }
  0x3e   :  { %875 = vmatpush.bf16.msrb.mxu1 %v7405_v52 }
  0x3f   :  { %1269 = vmatpush.bf16.msrb.mxu2 %v7421_v53 }
  0x40   :  { %1663 = vmatpush.bf16.msrb.mxu3 %v7429_v54  ;;  %v7966_v54 = vpack.c.bf16 %v57_v48, %v10352_v56  ;;  %v8001_v56 = vpack.c.bf16 %v58_v9, %v57_v48 }
  0x41   :  { %669 = vmatmul.bf16.gmra.mxu0 %v10349_v30  ;;  %876 = vmatmul.bf16.vlgmr.msrb.gmra.mxu1 %v10349_v30 }
  0x42   :  { %1270 = vmatmul.bf16.vlgmr.msrb.gmra.mxu2 %v10349_v30  ;;  %10466 = vst [vmem:[#allocation23_spill] sm:$0xff] %v7966_v54 }
  0x43   :  { %1664 = vmatmul.bf16.vlgmr.msrb.gmra.mxu3 %v446_v57 }
  0x51   :  { %674 = vmatmul.bf16.gmra.mxu0 %v10349_v30  ;;  %881 = vmatmul.bf16.gmra.mxu1 %v10349_v30 }
  0x52   :  { %1275 = vmatmul.bf16.gmra.mxu2 %v10349_v30 }
  0x53   :  { %1669 = vmatmul.bf16.gmra.mxu3 %v7841_v60 }
  0x61   :  { %679 = vmatmul.bf16.gmra.mxu0 %v7853_v63  ;;  %886 = vmatmul.bf16.gmra.mxu1 %v10349_v30 }
  0x62   :  { %1280 = vmatmul.bf16.gmra.mxu2 %v10349_v30 }
  0x63   :  { %1674 = vmatmul.bf16.gmra.mxu3 %v7855_v0 }
  0x71   :  { %684 = vmatmul.bf16.gmra.mxu0 %v7867_v3  ;;  %891 = vmatmul.bf16.gmra.mxu1 %v10349_v30 }
  0x72   :  { %1285 = vmatmul.bf16.gmra.mxu2 %v10349_v30 }
  0x73   :  { %1679 = vmatmul.bf16.gmra.mxu3 %v7869_v4 }
  0x81   :  { %689 = vmatmul.bf16.gmra.mxu0 %v7878_v6  ;;  %896 = vmatmul.bf16.gmra.mxu1 %v446_v57 }
  0x82   :  { %1290 = vmatmul.bf16.gmra.mxu2 %v7841_v60 }
  0x83   :  { %1684 = vmatmul.bf16.gmra.mxu3 %v7881_v7 }
  0x91   :  { %694 = vmatmul.bf16.gmra.mxu0 %v7898_v11  ;;  %901 = vmatmul.bf16.gmra.mxu1 %v7841_v60 }
  0x92   :  { %1295 = vmatmul.bf16.gmra.mxu2 %v7855_v0 }
  0x93   :  { %1689 = vmatmul.bf16.gmra.mxu3 %v7900_v15 }
  0x9e   :  { %v660_v21 = vpop.f32.mrf.mxu0  ;;  %v7914_v22 = vpop.f32.mrf.mxu1 }
  0xa1   :  { %699 = vmatmul.bf16.gmra.mxu0 %v7912_v19  ;;  %906 = vmatmul.bf16.gmra.mxu1 %v7855_v0 }
  0xa2   :  { %1300 = vmatmul.bf16.gmra.mxu2 %v7869_v4 }
  0xa3   :  { %1694 = vmatmul.bf16.gmra.mxu3 %v7916_v23 }
  0xa5   :  { %v7922_v27 = vpop.f32.mrf.mxu2 }
  0xa6   :  { %10456 = vst [vmem:[#allocation13_spill] sm:$0xff] %v7922_v27  ;;  %v7924_v28 = vpop.f32.mrf.mxu3  ;;  %v662_v29 = vpop.f32.mrf.mxu0 }
  0xa7   :  { %10457 = vst [vmem:[#allocation14_spill] sm:$0xff] %v7924_v28  ;;  %v7926_v31 = vpop.f32.mrf.mxu1  ;;  %v10471_v28 = vmov 0.0  }
  0xad   :  { %v7934_v34 = vpop.f32.mrf.mxu2 }
  0xae   :  { %10458 = vst [vmem:[#allocation15_spill] sm:$0xff] %v7934_v34  ;;  %v7936_v35 = vpop.f32.mrf.mxu3  ;;  %v665_v37 = vpop.f32.mrf.mxu0 }
  0xaf   :  { %10459 = vst [vmem:[#allocation16_spill] sm:$0xff] %v7936_v35  ;;  %v7940_v38 = vpop.f32.mrf.mxu1 }
  0xb1   :  { %704 = vmatmul.bf16.gmra.mxu0 %v7938_v36  ;;  %911 = vmatmul.bf16.gmra.mxu1 %v7869_v4 }
  0xb2   :  { %1305 = vmatmul.bf16.gmra.mxu2 %v10351_v39 }
  0xb3   :  { %1699 = vmatmul.bf16.gmra.mxu3 %v7943_v40 }
  0xb5   :  { %v7950_v41 = vpop.f32.mrf.mxu2 }
  0xb6   :  { %10461 = vst [vmem:[#allocation18_spill] sm:$0xff] %v7950_v41  ;;  %v7952_v45 = vpop.f32.mrf.mxu3  ;;  %v667_v46 = vpop.f32.mrf.mxu0 }
  0xb7   :  { %10462 = vst [vmem:[#allocation19_spill] sm:$0xff] %v7952_v45  ;;  %v7954_v47 = vpop.f32.mrf.mxu1 }
  0xb8   :  { %10463 = vst [vmem:[#allocation20_spill] sm:$0xff] %v7954_v47 }
  0xbd   :  { %v7959_v49 = vpop.f32.mrf.mxu2 }
  0xbe   :  { %10464 = vst [vmem:[#allocation21_spill] sm:$0xff] %v7959_v49  ;;  %v7961_v50 = vpop.f32.mrf.mxu3  ;;  %v670_v52 = vpop.f32.mrf.mxu0 }
  0xbf   :  { %10465 = vst [vmem:[#allocation22_spill] sm:$0xff] %v7961_v50  ;;  %v877_v53 = vpop.f32.mrf.mxu1 }
  0xc0   :  { %v878_v55 = vadd.f32 %v877_v53, %v660_v21  ;;  %v7983_v21 = vpack.c.bf16 %v56_v5, %v55_v33 }
  0xc1   :  { %709 = vmatmul.bf16.gmra.mxu0 %v7963_v51  ;;  %916 = vmatmul.bf16.gmra.mxu1 %v7881_v7 }
  0xc2   :  { %1310 = vmatmul.bf16.gmra.mxu2 %v7900_v15 }
  0xc3   :  { %1704 = vmatmul.bf16.gmra.mxu3 %v7966_v54 }
  0xc5   :  { %v1271_v57 = vpop.f32.mrf.mxu2 }
  0xc6   :  { %v1665_v58 = vpop.f32.mrf.mxu3  ;;  %v1431_v59 = vadd.f32 %v1271_v57, %v878_v55  ;;  %v672_v61 = vpop.f32.mrf.mxu0  ;;  %v7985_v55 = vpack.c.bf16 %v59_v10, %v58_v9 }
  0xc7   :  { %v879_v62 = vpop.f32.mrf.mxu1 }
  0xc8   :  { %v880_v1 = vadd.f32 %v879_v62, %v662_v29  ;;  %v7972_v2 = vadd.f32 %v1665_v58, %v1431_v59  ;;  %10467 = vst [vmem:[#allocation24_spill] sm:$0xff] %v7985_v55 }
  0xcd   :  { %v1273_v16 = vpop.f32.mrf.mxu2 }
  0xce   :  { %v1667_v18 = vpop.f32.mrf.mxu3  ;;  %v1432_v32 = vadd.f32 %v1273_v16, %v880_v1  ;;  %v675_v29 = vpop.f32.mrf.mxu0 }
  0xcf   :  { %v882_v53 = vpop.f32.mrf.mxu1 }
  0xd0   :  { %v883_v57 = vadd.f32 %v882_v53, %v665_v37  ;;  %v7987_v58 = vadd.f32 %v1667_v18, %v1432_v32  ;;  %v60_v37 = vld [vmem:[%s10338_s0 + $0x98] sm:$0xff]  ;;  %v61_v18 = vld [vmem:[%s10338_s0 + $0xa0] sm:$0xff] }
  0xd1   :  { %714 = vmatmul.bf16.gmra.mxu0 %v7983_v21  ;;  %921 = vmatmul.bf16.gmra.mxu1 %v7900_v15  ;;  %v8019_v25 = vpack.c.bf16 %v60_v37, %v59_v10 }
  0xd2   :  { %1315 = vmatmul.bf16.gmra.mxu2 %v7916_v23 }
  0xd3   :  { %1709 = vmatmul.bf16.gmra.mxu3 %v7985_v55 }
  0xd5   :  { %v1276_v59 = vpop.f32.mrf.mxu2 }
  0xd6   :  { %v1670_v62 = vpop.f32.mrf.mxu3  ;;  %v1433_v33 = vadd.f32 %v1276_v59, %v883_v57  ;;  %v677_v30 = vpop.f32.mrf.mxu0  ;;  %v8003_v59 = vpack.c.bf16 %v61_v18, %v60_v37 }
  0xd7   :  { %v884_v1 = vpop.f32.mrf.mxu1 }
  0xd8   :  { %v885_v16 = vadd.f32 %v884_v1, %v667_v46  ;;  %v7993_v39 = vadd.f32 %v1670_v62, %v1433_v33  ;;  %10468 = vst [vmem:[#allocation25_spill] sm:$0xff] %v8003_v59 }
  0xdd   :  { %v1278_v32 = vpop.f32.mrf.mxu2 }
  0xde   :  { %v1672_v53 = vpop.f32.mrf.mxu3  ;;  %v1434_v44 = vadd.f32 %v1278_v32, %v885_v16  ;;  %v680_v26 = vpop.f32.mrf.mxu0 }
  0xdf   :  { %v887_v57 = vpop.f32.mrf.mxu1 }
  0xe0   :  { %v888_v46 = vadd.f32 %v887_v57, %v670_v52  ;;  %v8005_v62 = vadd.f32 %v1672_v53, %v1434_v44  ;;  %v62_v44 = vld [vmem:[%s10338_s0 + $0xa8] sm:$0xff]  ;;  %v63_v52 = vld [vmem:[%s10338_s0 + $0xb0] sm:$0xff] }
  0xe1   :  { %719 = vmatmul.bf16.gmra.mxu0 %v8001_v56  ;;  %926 = vmatmul.bf16.gmra.mxu1 %v7916_v23 }
  0xe2   :  { %1320 = vmatmul.bf16.gmra.mxu2 %v7943_v40 }
  0xe3   :  { %1714 = vmatmul.bf16.gmra.mxu3 %v8003_v59 }
  0xe5   :  { %v1281_v33 = vpop.f32.mrf.mxu2 }
  0xe6   :  { %v1675_v1 = vpop.f32.mrf.mxu3  ;;  %v1435_v48 = vadd.f32 %v1281_v33, %v888_v46  ;;  %v682_v9 = vpop.f32.mrf.mxu0  ;;  %v8021_v33 = vpack.c.bf16 0.0, %v56_v5 }
  0xe7   :  { %v889_v16 = vpop.f32.mrf.mxu1 }
  0xe8   :  { %v890_v32 = vadd.f32 %v889_v16, %v672_v61  ;;  %v8011_v43 = vadd.f32 %v1675_v1, %v1435_v48  ;;  %10469 = vst [vmem:[#allocation26_spill] sm:$0xff] %v8021_v33  ;;  %v8023_v61 = vpack.c.bf16 %v63_v52, %v62_v44 }
  0xea   :  { %10470 = vst [vmem:[#allocation27_spill] sm:$0xff] %v8023_v61 }
  0xed   :  { %v1283_v53 = vpop.f32.mrf.mxu2 }
  0xee   :  { %v1677_v57 = vpop.f32.mrf.mxu3  ;;  %v1436_v42 = vadd.f32 %v1283_v53, %v890_v32  ;;  %v685_v24 = vpop.f32.mrf.mxu0 }
  0xef   :  { %v892_v46 = vpop.f32.mrf.mxu1 }
  0xf0   :  { %v893_v1 = vadd.f32 %v892_v46, %v675_v29  ;;  %v8025_v48 = vadd.f32 %v1677_v57, %v1436_v42  ;;  %v65_v42 = vld [vmem:[%s10338_s0 + $0xc0] sm:$0xff]  ;;  %v8036_v46 = vpack.c.bf16 %v62_v44, %v61_v18 }
  0xf1   :  { %724 = vmatmul.bf16.gmra.mxu0 %v8019_v25  ;;  %931 = vmatmul.bf16.gmra.mxu1 %v7943_v40  ;;  %v8039_v49 = vpack.c.bf16 %v65_v42, %v10471_v28 }
  0xf2   :  { %1325 = vmatmul.bf16.gmra.mxu2 %v8021_v33 }
  0xf3   :  { %1719 = vmatmul.bf16.gmra.mxu3 %v8023_v61  ;;  %10472 = vst [vmem:[#allocation28_spill] sm:$0xff] %v8039_v49 }
  0xf5   :  { %v1286_v10 = vpop.f32.mrf.mxu2 }
  0xf6   :  { %v1680_v37 = vpop.f32.mrf.mxu3  ;;  %v1437_v16 = vadd.f32 %v1286_v10, %v893_v1  ;;  %v687_v32 = vpop.f32.mrf.mxu0 }
  0xf7   :  { %v894_v53 = vpop.f32.mrf.mxu1 }
  0xf8   :  { %v895_v5 = vadd.f32 %v894_v53, %v677_v30  ;;  %v8031_v50 = vadd.f32 %v1680_v37, %v1437_v16 }
  0xfd   :  { %v1288_v29 = vpop.f32.mrf.mxu2 }
  0xfe   :  { %v1682_v57 = vpop.f32.mrf.mxu3  ;;  %v1438_v45 = vadd.f32 %v1288_v29, %v895_v5  ;;  %v690_v33 = vpop.f32.mrf.mxu0 }
  0xff   :  { %v897_v35 = vpop.f32.mrf.mxu1 }
 0x100   :  { %v898_v1 = vadd.f32 %v897_v35, %v680_v26  ;;  %v8041_v10 = vadd.f32 %v1682_v57, %v1438_v45  ;;  %v64_v26 = vld [vmem:[%s10338_s0 + $0xb8] sm:$0xff]  ;;  %v66_v35 = vld [vmem:[%s10338_s0 + $0xc8] sm:$0xff]  ;;  %v67_v45 = vld [vmem:[%s10338_s0 + $0xd0] sm:$0xff] }
 0x101   :  { %729 = vmatmul.bf16.gmra.mxu0 %v8036_v46  ;;  %936 = vmatmul.bf16.gmra.mxu1 %v7966_v54 }
 0x102   :  { %1330 = vmatmul.bf16.gmra.mxu2 %v7985_v55 }
 0x103   :  { %1724 = vmatmul.bf16.gmra.mxu3 %v8039_v49 }
 0x105   :  { %v1291_v30 = vpop.f32.mrf.mxu2 }
 0x106   :  { %v1685_v18 = vpop.f32.mrf.mxu3  ;;  %v1439_v44 = vadd.f32 %v1291_v30, %v898_v1  ;;  %v692_v37 = vpop.f32.mrf.mxu0  ;;  %v8058_v1 = vpack.c.bf16 %v64_v26, %v63_v52 }
 0x107   :  { %v899_v16 = vpop.f32.mrf.mxu1 }
 0x108   :  { %v900_v53 = vadd.f32 %v899_v16, %v682_v9  ;;  %v8047_v5 = vadd.f32 %v1685_v18, %v1439_v44  ;;  %v8060_v44 = vpack.c.bf16 %v67_v45, %v66_v35 }
 0x10a   :  { %10473 = vst [vmem:[#allocation29_spill] sm:$0xff] %v8047_v5 }
 0x10b   :  { %10474 = vst [vmem:[#allocation30_spill] sm:$0xff] %v8060_v44 }
 0x10d   :  { %v1293_v29 = vpop.f32.mrf.mxu2 }
 0x10e   :  { %v1687_v57 = vpop.f32.mrf.mxu3  ;;  %v1440_v30 = vadd.f32 %v1293_v29, %v900_v53  ;;  %v695_v9 = vpop.f32.mrf.mxu0 }
 0x10f   :  { %v902_v18 = vpop.f32.mrf.mxu1 }
 0x110   :  { %v903_v16 = vadd.f32 %v902_v18, %v685_v24  ;;  %v8062_v41 = vadd.f32 %v1687_v57, %v1440_v30  ;;  %v68_v24 = vld [vmem:[%s10338_s0 + $0xd8] sm:$0xff]  ;;  %v69_v57 = vld [vmem:[%s10338_s0 + $0xe0] sm:$0xff] }
 0x111   :  { %734 = vmatmul.bf16.gmra.mxu0 %v8058_v1  ;;  %941 = vmatmul.bf16.gmra.mxu1 %v7985_v55  ;;  %v8076_v55 = vpack.c.bf16 %v66_v35, %v65_v42 }
 0x112   :  { %10475 = vst [vmem:[#allocation31_spill] sm:$0xff] %v8062_v41  ;;  %1335 = vmatmul.bf16.gmra.mxu2 %v8003_v59 }
 0x113   :  { %1729 = vmatmul.bf16.gmra.mxu3 %v8060_v44  ;;  %10477 = vst [vmem:[#allocation33_spill] sm:$0xff] %v8076_v55 }
 0x115   :  { %v1296_v34 = vpop.f32.mrf.mxu2 }
 0x116   :  { %v1690_v27 = vpop.f32.mrf.mxu3  ;;  %v1441_v52 = vadd.f32 %v1296_v34, %v903_v16  ;;  %v697_v54 = vpop.f32.mrf.mxu0  ;;  %v8078_v16 = vpack.c.bf16 %v69_v57, %v68_v24 }
 0x117   :  { %v904_v53 = vpop.f32.mrf.mxu1 }
 0x118   :  { %v905_v29 = vadd.f32 %v904_v53, %v687_v32  ;;  %v8068_v5 = vadd.f32 %v1690_v27, %v1441_v52  ;;  %10478 = vst [vmem:[#allocation34_spill] sm:$0xff] %v8078_v16 }
 0x11a   :  { %10476 = vst [vmem:[#allocation32_spill] sm:$0xff] %v8068_v5 }
 0x11d   :  { %v1298_v30 = vpop.f32.mrf.mxu2 }
 0x11e   :  { %v1692_v18 = vpop.f32.mrf.mxu3  ;;  %v1442_v41 = vadd.f32 %v1298_v30, %v905_v29  ;;  %v700_v47 = vpop.f32.mrf.mxu0 }
 0x11f   :  { %v907_v34 = vpop.f32.mrf.mxu1 }
 0x120   :  { %v908_v32 = vadd.f32 %v907_v34, %v690_v33  ;;  %v8080_v27 = vadd.f32 %v1692_v18, %v1442_v41  ;;  %v70_v41 = vld [vmem:[%s10338_s0 + $0xe8] sm:$0xff]  ;;  %v71_v33 = vld [vmem:[%s10338_s0 + $0xf0] sm:$0xff] }
 0x121   :  { %739 = vmatmul.bf16.gmra.mxu0 %v8076_v55  ;;  %946 = vmatmul.bf16.gmra.mxu1 %v8003_v59  ;;  %v8094_v59 = vpack.c.bf16 %v68_v24, %v67_v45 }
 0x122   :  { %10479 = vst [vmem:[#allocation35_spill] sm:$0xff] %v8080_v27  ;;  %1340 = vmatmul.bf16.gmra.mxu2 %v8023_v61 }
 0x123   :  { %1734 = vmatmul.bf16.gmra.mxu3 %v8078_v16  ;;  %10481 = vst [vmem:[#allocation37_spill] sm:$0xff] %v8094_v59 }
 0x125   :  { %v1301_v52 = vpop.f32.mrf.mxu2 }
 0x126   :  { %v1695_v53 = vpop.f32.mrf.mxu3  ;;  %v1443_v42 = vadd.f32 %v1301_v52, %v908_v32  ;;  %v702_v35 = vpop.f32.mrf.mxu0  ;;  %v8096_v52 = vpack.c.bf16 0.0, %v64_v26 }
 0x127   :  { %v909_v29 = vpop.f32.mrf.mxu1 }
 0x128   :  { %v910_v30 = vadd.f32 %v909_v29, %v692_v37  ;;  %v8086_v5 = vadd.f32 %v1695_v53, %v1443_v42  ;;  %10482 = vst [vmem:[#allocation38_spill] sm:$0xff] %v8096_v52  ;;  %v8098_v37 = vpack.c.bf16 %v71_v33, %v70_v41 }
 0x12a   :  { %10480 = vst [vmem:[#allocation36_spill] sm:$0xff] %v8086_v5 }
 0x12b   :  { %10483 = vst [vmem:[#allocation39_spill] sm:$0xff] %v8098_v37 }
 0x12d   :  { %v1303_v18 = vpop.f32.mrf.mxu2 }
 0x12e   :  { %v1697_v34 = vpop.f32.mrf.mxu3  ;;  %v1444_v27 = vadd.f32 %v1303_v18, %v910_v30  ;;  %v705_v55 = vpop.f32.mrf.mxu0 }
 0x12f   :  { %v912_v32 = vpop.f32.mrf.mxu1 }
 0x130   :  { %v913_v53 = vadd.f32 %v912_v32, %v695_v9  ;;  %v8100_v42 = vadd.f32 %v1697_v34, %v1444_v27  ;;  %v73_v9 = vld [vmem:[%s10338_s0 + $0x100] sm:$0xff]  ;;  %v8111_v32 = vpack.c.bf16 %v70_v41, %v69_v57 }
 0x131   :  { %744 = vmatmul.bf16.gmra.mxu0 %v8094_v59  ;;  %951 = vmatmul.bf16.gmra.mxu1 %v8023_v61  ;;  %v8114_v59 = vpack.c.bf16 %v73_v9, %v10471_v28 }
 0x132   :  { %10484 = vst [vmem:[#allocation40_spill] sm:$0xff] %v8100_v42  ;;  %1345 = vmatmul.bf16.gmra.mxu2 %v8096_v52 }
 0x133   :  { %1739 = vmatmul.bf16.gmra.mxu3 %v8098_v37  ;;  %10486 = vst [vmem:[#allocation42_spill] sm:$0xff] %v8111_v32 }
 0x134   :  { %10487 = vst [vmem:[#allocation43_spill] sm:$0xff] %v8114_v59 }
 0x135   :  { %v1306_v45 = vpop.f32.mrf.mxu2 }
 0x136   :  { %v1700_v24 = vpop.f32.mrf.mxu3  ;;  %v1445_v29 = vadd.f32 %v1306_v45, %v913_v53  ;;  %v707_v30 = vpop.f32.mrf.mxu0 }
 0x137   :  { %v914_v18 = vpop.f32.mrf.mxu1 }
 0x138   :  { %v915_v26 = vadd.f32 %v914_v18, %v697_v54  ;;  %v8106_v5 = vadd.f32 %v1700_v24, %v1445_v29 }
 0x13a   :  { %10485 = vst [vmem:[#allocation41_spill] sm:$0xff] %v8106_v5 }
 0x13d   :  { %v1308_v27 = vpop.f32.mrf.mxu2 }
 0x13e   :  { %v1702_v34 = vpop.f32.mrf.mxu3  ;;  %v1446_v61 = vadd.f32 %v1308_v27, %v915_v26  ;;  %v710_v52 = vpop.f32.mrf.mxu0 }
 0x13f   :  { %v917_v42 = vpop.f32.mrf.mxu1 }
 0x140   :  { %v918_v53 = vadd.f32 %v917_v42, %v700_v47  ;;  %v8116_v45 = vadd.f32 %v1702_v34, %v1446_v61  ;;  %v72_v47 = vld [vmem:[%s10338_s0 + $0xf8] sm:$0xff]  ;;  %v74_v61 = vld [vmem:[%s10338_s0 + $0x108] sm:$0xff]  ;;  %v75_v42 = vld [vmem:[%s10338_s0 + $0x110] sm:$0xff] }
 0x141   :  { %749 = vmatmul.bf16.gmra.mxu0 %v8111_v32  ;;  %956 = vmatmul.bf16.gmra.mxu1 %v8039_v49 }
 0x142   :  { %10488 = vst [vmem:[#allocation44_spill] sm:$0xff] %v8116_v45  ;;  %1350 = vmatmul.bf16.gmra.mxu2 %v8060_v44 }
 0x143   :  { %1744 = vmatmul.bf16.gmra.mxu3 %v8114_v59 }
 0x145   :  { %v1311_v54 = vpop.f32.mrf.mxu2 }
 0x146   :  { %v1705_v57 = vpop.f32.mrf.mxu3  ;;  %v1447_v41 = vadd.f32 %v1311_v54, %v918_v53  ;;  %v712_v24 = vpop.f32.mrf.mxu0  ;;  %v8133_v53 = vpack.c.bf16 %v72_v47, %v71_v33 }
 0x147   :  { %v919_v29 = vpop.f32.mrf.mxu1 }
 0x148   :  { %v920_v18 = vadd.f32 %v919_v29, %v702_v35  ;;  %v8122_v26 = vadd.f32 %v1705_v57, %v1447_v41  ;;  %10490 = vst [vmem:[#allocation46_spill] sm:$0xff] %v8133_v53  ;;  %v8135_v41 = vpack.c.bf16 %v75_v42, %v74_v61 }
 0x14a   :  { %10489 = vst [vmem:[#allocation45_spill] sm:$0xff] %v8122_v26 }
 0x14b   :  { %10491 = vst [vmem:[#allocation47_spill] sm:$0xff] %v8135_v41 }
 0x14d   :  { %v1313_v27 = vpop.f32.mrf.mxu2 }
 0x14e   :  { %v1707_v34 = vpop.f32.mrf.mxu3  ;;  %v1448_v54 = vadd.f32 %v1313_v27, %v920_v18  ;;  %v715_v35 = vpop.f32.mrf.mxu0 }
 0x14f   :  { %v922_v57 = vpop.f32.mrf.mxu1 }
 0x150   :  { %v923_v29 = vadd.f32 %v922_v57, %v705_v55  ;;  %v8137_v49 = vadd.f32 %v1707_v34, %v1448_v54  ;;  %v76_v55 = vld [vmem:[%s10338_s0 + $0x118] sm:$0xff]  ;;  %v77_v34 = vld [vmem:[%s10338_s0 + $0x120] sm:$0xff] }
 0x151   :  { %754 = vmatmul.bf16.gmra.mxu0 %v8133_v53  ;;  %961 = vmatmul.bf16.gmra.mxu1 %v8060_v44  ;;  %v8151_v44 = vpack.c.bf16 %v74_v61, %v73_v9 }
 0x152   :  { %10492 = vst [vmem:[#allocation48_spill] sm:$0xff] %v8137_v49  ;;  %1355 = vmatmul.bf16.gmra.mxu2 %v8078_v16 }
 0x153   :  { %1749 = vmatmul.bf16.gmra.mxu3 %v8135_v41  ;;  %10494 = vst [vmem:[#allocation50_spill] sm:$0xff] %v8151_v44 }
 0x155   :  { %v1316_v26 = vpop.f32.mrf.mxu2 }
 0x156   :  { %v1710_v45 = vpop.f32.mrf.mxu3  ;;  %v1449_v33 = vadd.f32 %v1316_v26, %v923_v29  ;;  %v717_v5 = vpop.f32.mrf.mxu0  ;;  %v8153_v29 = vpack.c.bf16 %v77_v34, %v76_v55 }
 0x157   :  { %v924_v18 = vpop.f32.mrf.mxu1 }
 0x158   :  { %v925_v27 = vadd.f32 %v924_v18, %v707_v30  ;;  %v8143_v32 = vadd.f32 %v1710_v45, %v1449_v33  ;;  %10495 = vst [vmem:[#allocation51_spill] sm:$0xff] %v8153_v29 }
 0x15a   :  { %10493 = vst [vmem:[#allocation49_spill] sm:$0xff] %v8143_v32 }
 0x15d   :  { %v1318_v54 = vpop.f32.mrf.mxu2 }
 0x15e   :  { %v1712_v57 = vpop.f32.mrf.mxu3  ;;  %v1450_v49 = vadd.f32 %v1318_v54, %v925_v27  ;;  %v720_v53 = vpop.f32.mrf.mxu0 }
 0x15f   :  { %v927_v26 = vpop.f32.mrf.mxu1 }
 0x160   :  { %v928_v30 = vadd.f32 %v927_v26, %v710_v52  ;;  %v8155_v45 = vadd.f32 %v1712_v57, %v1450_v49  ;;  %v78_v49 = vld [vmem:[%s10338_s0 + $0x128] sm:$0xff]  ;;  %v79_v52 = vld [vmem:[%s10338_s0 + $0x130] sm:$0xff] }
 0x161   :  { %759 = vmatmul.bf16.gmra.mxu0 %v8151_v44  ;;  %966 = vmatmul.bf16.gmra.mxu1 %v8078_v16  ;;  %v8169_v16 = vpack.c.bf16 %v76_v55, %v75_v42 }
 0x162   :  { %10496 = vst [vmem:[#allocation52_spill] sm:$0xff] %v8155_v45  ;;  %1360 = vmatmul.bf16.gmra.mxu2 %v8098_v37 }
 0x163   :  { %1754 = vmatmul.bf16.gmra.mxu3 %v8153_v29  ;;  %10498 = vst [vmem:[#allocation54_spill] sm:$0xff] %v8169_v16 }
 0x165   :  { %v1321_v33 = vpop.f32.mrf.mxu2 }
 0x166   :  { %v1715_v18 = vpop.f32.mrf.mxu3  ;;  %v1451_v9 = vadd.f32 %v1321_v33, %v928_v30  ;;  %v722_v61 = vpop.f32.mrf.mxu0  ;;  %v8171_v33 = vpack.c.bf16 0.0, %v72_v47 }
 0x167   :  { %v929_v27 = vpop.f32.mrf.mxu1 }
 0x168   :  { %v930_v54 = vadd.f32 %v929_v27, %v712_v24  ;;  %v8161_v32 = vadd.f32 %v1715_v18, %v1451_v9  ;;  %10499 = vst [vmem:[#allocation55_spill] sm:$0xff] %v8171_v33  ;;  %v8173_v24 = vpack.c.bf16 %v79_v52, %v78_v49 }
 0x16a   :  { %10497 = vst [vmem:[#allocation53_spill] sm:$0xff] %v8161_v32 }
 0x16d   :  { %v1323_v57 = vpop.f32.mrf.mxu2 }
 0x16e   :  { %v1717_v26 = vpop.f32.mrf.mxu3  ;;  %v1452_v45 = vadd.f32 %v1323_v57, %v930_v54  ;;  %v725_v44 = vpop.f32.mrf.mxu0 }
 0x16f   :  { %v932_v30 = vpop.f32.mrf.mxu1 }
 0x170   :  { %v933_v18 = vadd.f32 %v932_v30, %v715_v35  ;;  %v8175_v9 = vadd.f32 %v1717_v26, %v1452_v45  ;;  %v81_v35 = vld [vmem:[%s10338_s0 + $0x140] sm:$0xff]  ;;  %v8186_v30 = vpack.c.bf16 %v78_v49, %v77_v34 }
 0x171   :  { %764 = vmatmul.bf16.gmra.mxu0 %v8169_v16  ;;  %971 = vmatmul.bf16.gmra.mxu1 %v8098_v37  ;;  %v8189_v16 = vpack.c.bf16 %v81_v35, %v10471_v28 }
 0x172   :  { %10500 = vst [vmem:[#allocation56_spill] sm:$0xff] %v8175_v9  ;;  %1365 = vmatmul.bf16.gmra.mxu2 %v8171_v33 }
 0x173   :  { %1759 = vmatmul.bf16.gmra.mxu3 %v8173_v24  ;;  %10502 = vst [vmem:[#allocation58_spill] sm:$0xff] %v8186_v30 }
 0x174   :  { %10503 = vst [vmem:[#allocation59_spill] sm:$0xff] %v8189_v16 }
 0x175   :  { %v1326_v42 = vpop.f32.mrf.mxu2 }
 0x176   :  { %v1720_v55 = vpop.f32.mrf.mxu3  ;;  %v1453_v27 = vadd.f32 %v1326_v42, %v933_v18  ;;  %v727_v54 = vpop.f32.mrf.mxu0 }
 0x177   :  { %v934_v57 = vpop.f32.mrf.mxu1 }
 0x178   :  { %v935_v47 = vadd.f32 %v934_v57, %v717_v5  ;;  %v8181_v32 = vadd.f32 %v1720_v55, %v1453_v27  ;;  %v7444_v5 = vld [vmem:[%s10337_s1 + $0x138] sm:$0xff] }
 0x179   :  { %1986 = vmatpush.bf16.msrb.mxu0 %v7444_v5 }
 0x17a   :  { %10501 = vst [vmem:[#allocation57_spill] sm:$0xff] %v8181_v32 }
 0x17d   :  { %v1328_v45 = vpop.f32.mrf.mxu2 }
 0x17e   :  { %v1722_v26 = vpop.f32.mrf.mxu3  ;;  %v1454_v37 = vadd.f32 %v1328_v45, %v935_v47  ;;  %v730_v33 = vpop.f32.mrf.mxu0  ;;  %v7442_v47 = vld [vmem:[%s10337_s1 + $0x128] sm:$0xff]  ;;  %v80_v45 = vld [vmem:[%s10338_s0 + $0x138] sm:$0xff] }
 0x17f   :  { %v937_v9 = vpop.f32.mrf.mxu1 }
 0x180   :  { %v938_v18 = vadd.f32 %v937_v9, %v720_v53  ;;  %v8191_v42 = vadd.f32 %v1722_v26, %v1454_v37  ;;  %v7443_v37 = vld [vmem:[%s10337_s1 + $0x130] sm:$0xff]  ;;  %v82_v26 = vld [vmem:[%s10338_s0 + $0x148] sm:$0xff] }
 0x181   :  { %769 = vmatmul.bf16.gmra.mxu0 %v8186_v30  ;;  %976 = vmatmul.bf16.gmra.mxu1 %v8114_v59  ;;  %v8244_v32 = vpack.c.bf16 %v82_v26, %v81_v35 }
 0x182   :  { %10504 = vst [vmem:[#allocation60_spill] sm:$0xff] %v8191_v42  ;;  %1370 = vmatmul.bf16.gmra.mxu2 %v8135_v41  ;;  %1987 = vmatpush.bf16.msrb.mxu0 %v7443_v37 }
 0x183   :  { %1764 = vmatmul.bf16.gmra.mxu3 %v8189_v16  ;;  %10510 = vst [vmem:[#allocation66_spill] sm:$0xff] %v8244_v32 }
 0x185   :  { %v1331_v34 = vpop.f32.mrf.mxu2 }
 0x186   :  { %v1725_v49 = vpop.f32.mrf.mxu3  ;;  %v1455_v53 = vadd.f32 %v1331_v34, %v938_v18  ;;  %v732_v9 = vpop.f32.mrf.mxu0  ;;  %v83_v18 = vld [vmem:[%s10338_s0 + $0x150] sm:$0xff]  ;;  %1988 = vmatpush.bf16.msrb.mxu0 %v7442_v47  ;;  %v8217_v34 = vpack.c.bf16 %v80_v45, %v79_v52  ;;  %v7440_v52 = vld [vmem:[%s10337_s1 + $0x118] sm:$0xff] }
 0x187   :  { %v939_v55 = vpop.f32.mrf.mxu1  ;;  %v8222_v59 = vpack.c.bf16 %v83_v18, %v82_v26 }
 0x188   :  { %v940_v27 = vadd.f32 %v939_v55, %v722_v61  ;;  %v8203_v57 = vadd.f32 %v1725_v49, %v1455_v53  ;;  %10506 = vst [vmem:[#allocation62_spill] sm:$0xff] %v8217_v34  ;;  %v7441_v49 = vld [vmem:[%s10337_s1 + $0x120] sm:$0xff] }
 0x189   :  { %10507 = vst [vmem:[#allocation63_spill] sm:$0xff] %v8222_v59 }
 0x18a   :  { %10505 = vst [vmem:[#allocation61_spill] sm:$0xff] %v8203_v57  ;;  %1989 = vmatpush.bf16.msrb.mxu0 %v7441_v49 }
 0x18d   :  { %v1333_v61 = vpop.f32.mrf.mxu2 }
 0x18e   :  { %v1727_v5 = vpop.f32.mrf.mxu3  ;;  %v1456_v37 = vadd.f32 %v1333_v61, %v940_v27  ;;  %v735_v53 = vpop.f32.mrf.mxu0  ;;  %1990 = vmatpush.bf16.msrb.mxu0 %v7440_v52  ;;  %v84_v52 = vld [vmem:[%s10338_s0 + $0x158] sm:$0xff] }
 0x18f   :  { %v942_v55 = vpop.f32.mrf.mxu1 }
 0x190   :  { %v943_v57 = vadd.f32 %v942_v55, %v725_v44  ;;  %v8224_v42 = vadd.f32 %v1727_v5, %v1456_v37  ;;  %v7439_v44 = vld [vmem:[%s10337_s1 + $0x110] sm:$0xff] }
 0x191   :  { %774 = vmatmul.bf16.gmra.mxu0 %v8217_v34  ;;  %981 = vmatmul.bf16.gmra.mxu1 %v8135_v41  ;;  %v7438_v41 = vld [vmem:[%s10337_s1 + $0x108] sm:$0xff] }
 0x192   :  { %10508 = vst [vmem:[#allocation64_spill] sm:$0xff] %v8224_v42  ;;  %1375 = vmatmul.bf16.gmra.mxu2 %v8153_v29  ;;  %1991 = vmatpush.bf16.msrb.mxu0 %v7439_v44 }
 0x193   :  { %1769 = vmatmul.bf16.gmra.mxu3 %v8222_v59 }
 0x195   :  { %v1336_v27 = vpop.f32.mrf.mxu2 }
 0x196   :  { %v1730_v47 = vpop.f32.mrf.mxu3  ;;  %v1457_v61 = vadd.f32 %v1336_v27, %v943_v57  ;;  %v737_v5 = vpop.f32.mrf.mxu0  ;;  %1992 = vmatpush.bf16.msrb.mxu0 %v7438_v41  ;;  %v8250_v57 = vpack.c.bf16 %v7721_v20, %v84_v52 }
 0x197   :  { %v944_v49 = vpop.f32.mrf.mxu1 }
 0x198   :  { %v945_v37 = vadd.f32 %v944_v49, %v727_v54  ;;  %v8236_v55 = vadd.f32 %v1730_v47, %v1457_v61  ;;  %v7437_v54 = vld [vmem:[%s10337_s1 + $0x100] sm:$0xff]  ;;  %10511 = vst [vmem:[#allocation67_spill] sm:$0xff] %v8250_v57 }
 0x19a   :  { %10509 = vst [vmem:[#allocation65_spill] sm:$0xff] %v8236_v55  ;;  %1993 = vmatpush.bf16.msrb.mxu0 %v7437_v54 }
 0x19d   :  { %v1338_v42 = vpop.f32.mrf.mxu2 }
 0x19e   :  { %v1732_v34 = vpop.f32.mrf.mxu3  ;;  %v1458_v27 = vadd.f32 %v1338_v42, %v945_v37  ;;  %v740_v47 = vpop.f32.mrf.mxu0 }
 0x19f   :  { %v947_v44 = vpop.f32.mrf.mxu1 }
 0x1a0   :  { %v948_v61 = vadd.f32 %v947_v44, %v730_v33  ;;  %v8252_v49 = vadd.f32 %v1732_v34, %v1458_v27  ;;  %v8260_v34 = vpack.c.bf16 %v84_v52, %v83_v18 }
 0x1a1   :  { %779 = vmatmul.bf16.gmra.mxu0 %v8244_v32  ;;  %986 = vmatmul.bf16.gmra.mxu1 %v8153_v29  ;;  %v8262_v29 = vpack.c.bf16 0.0, %v80_v45 }
 0x1a2   :  { %10512 = vst [vmem:[#allocation68_spill] sm:$0xff] %v8252_v49  ;;  %1380 = vmatmul.bf16.gmra.mxu2 %v8173_v24 }
 0x1a3   :  { %1774 = vmatmul.bf16.gmra.mxu3 %v8250_v57  ;;  %10513 = vst [vmem:[#allocation69_spill] sm:$0xff] %v8262_v29 }
 0x1a5   :  { %v1341_v41 = vpop.f32.mrf.mxu2 }
 0x1a6   :  { %v1735_v35 = vpop.f32.mrf.mxu3  ;;  %v1459_v26 = vadd.f32 %v1341_v41, %v948_v61  ;;  %v742_v20 = vpop.f32.mrf.mxu0 }
 0x1a7   :  { %v949_v55 = vpop.f32.mrf.mxu1 }
 0x1a8   :  { %v950_v42 = vadd.f32 %v949_v55, %v732_v9  ;;  %v8258_v37 = vadd.f32 %v1735_v35, %v1459_v26 }
 0x1ad   :  { %v1343_v33 = vpop.f32.mrf.mxu2 }
 0x1ae   :  { %v1737_v54 = vpop.f32.mrf.mxu3  ;;  %v1460_v27 = vadd.f32 %v1343_v33, %v950_v42  ;;  %v745_v44 = vpop.f32.mrf.mxu0  ;;  %v7583_v33 = vld [vmem:[%s10338_s0 + $0x180] sm:$0xff] }
 0x1af   :  { %v952_v49 = vpop.f32.mrf.mxu1 }
 0x1b0   :  { %v953_v32 = vadd.f32 %v952_v49, %v735_v53  ;;  %v8264_v30 = vadd.f32 %v1737_v54, %v1460_v27  ;;  %v8276_v54 = vpack.c.bf16 %v7583_v33, %v10471_v28 }
 0x1b1   :  { %784 = vmatmul.bf16.gmra.mxu0 %v8260_v34  ;;  %991 = vmatmul.bf16.gmra.mxu1 %v8173_v24 }
 0x1b2   :  { %1385 = vmatmul.bf16.gmra.mxu2 %v8262_v29  ;;  %10514 = vst [vmem:[#allocation70_spill] sm:$0xff] %v8276_v54 }
 0x1b3   :  { %1779 = vmatmul.bf16.gmra.mxu3 %v7696_v12 }
 0x1b5   :  { %v1346_v9 = vpop.f32.mrf.mxu2 }
 0x1b6   :  { %v1740_v55 = vpop.f32.mrf.mxu3  ;;  %v1461_v18 = vadd.f32 %v1346_v9, %v953_v32  ;;  %v747_v52 = vpop.f32.mrf.mxu0 }
 0x1b7   :  { %v954_v61 = vpop.f32.mrf.mxu1 }
 0x1b8   :  { %v955_v41 = vadd.f32 %v954_v61, %v737_v5  ;;  %v8270_v35 = vadd.f32 %v1740_v55, %v1461_v18 }
 0x1bd   :  { %v1348_v45 = vpop.f32.mrf.mxu2 }
 0x1be   :  { %v1742_v53 = vpop.f32.mrf.mxu3  ;;  %v1462_v49 = vadd.f32 %v1348_v45, %v955_v41  ;;  %v750_v26 = vpop.f32.mrf.mxu0 }
 0x1bf   :  { %v957_v42 = vpop.f32.mrf.mxu1 }
 0x1c0   :  { %v958_v27 = vadd.f32 %v957_v42, %v740_v47  ;;  %v8278_v29 = vadd.f32 %v1742_v53, %v1462_v49 }
 0x1c1   :  { %996 = vmatmul.bf16.gmra.mxu1 %v8189_v16  ;;  %1994 = vmatmul.bf16.vlgmr.msrb.gmra.mxu0 %v7853_v63 }
 0x1c2   :  { %1390 = vmatmul.bf16.gmra.mxu2 %v8222_v59 }
 0x1c3   :  { %1784 = vmatmul.bf16.gmra.mxu3 %v8276_v54 }
 0x1c5   :  { %v1351_v32 = vpop.f32.mrf.mxu2 }
 0x1c6   :  { %v1745_v5 = vpop.f32.mrf.mxu3  ;;  %v1463_v9 = vadd.f32 %v1351_v32, %v958_v27  ;;  %v752_v55 = vpop.f32.mrf.mxu0 }
 0x1c7   :  { %v959_v18 = vpop.f32.mrf.mxu1 }
 0x1c8   :  { %v960_v61 = vadd.f32 %v959_v18, %v742_v20  ;;  %v8284_v41 = vadd.f32 %v1745_v5, %v1463_v9 }
 0x1cd   :  { %v1353_v45 = vpop.f32.mrf.mxu2 }
 0x1ce   :  { %v1747_v47 = vpop.f32.mrf.mxu3  ;;  %v1464_v53 = vadd.f32 %v1353_v45, %v960_v61  ;;  %v755_v49 = vpop.f32.mrf.mxu0 }
 0x1cf   :  { %v962_v42 = vpop.f32.mrf.mxu1 }
 0x1d0   :  { %v963_v33 = vadd.f32 %v962_v42, %v745_v44  ;;  %v8286_v16 = vadd.f32 %v1747_v47, %v1464_v53 }
 0x1d1   :  { %1001 = vmatmul.bf16.gmra.mxu1 %v8222_v59  ;;  %1999 = vmatmul.bf16.gmra.mxu0 %v7867_v3 }
 0x1d2   :  { %1395 = vmatmul.bf16.gmra.mxu2 %v8250_v57 }
 0x1d3   :  { %1789 = vmatmul.bf16.gmra.mxu3 %v7699_v13 }
 0x1d5   :  { %v1356_v63 = vpop.f32.mrf.mxu2 }
 0x1d6   :  { %v1750_v20 = vpop.f32.mrf.mxu3  ;;  %v1465_v27 = vadd.f32 %v1356_v63, %v963_v33  ;;  %v757_v32 = vpop.f32.mrf.mxu0 }
 0x1d7   :  { %v964_v5 = vpop.f32.mrf.mxu1 }
 0x1d8   :  { %v965_v9 = vadd.f32 %v964_v5, %v747_v52  ;;  %v8292_v18 = vadd.f32 %v1750_v20, %v1465_v27 }
 0x1dd   :  { %v1358_v61 = vpop.f32.mrf.mxu2 }
 0x1de   :  { %v1752_v44 = vpop.f32.mrf.mxu3  ;;  %v1466_v45 = vadd.f32 %v1358_v61, %v965_v9  ;;  %v760_v47 = vpop.f32.mrf.mxu0 }
 0x1df   :  { %v967_v53 = vpop.f32.mrf.mxu1 }
 0x1e0   :  { %v968_v42 = vadd.f32 %v967_v53, %v750_v26  ;;  %v8294_v59 = vadd.f32 %v1752_v44, %v1466_v45 }
 0x1e1   :  { %1006 = vmatmul.bf16.gmra.mxu1 %v8250_v57  ;;  %2004 = vmatmul.bf16.gmra.mxu0 %v7878_v6  ;;  %v7584_v6 = vld [vmem:[%s10338_s0 + $0x178] sm:$0xff] }
 0x1e2   :  { %10515 = vst [vmem:[#allocation71_spill] sm:$0xff] %v8294_v59  ;;  %1400 = vmatmul.bf16.gmra.mxu2 %v7696_v12  ;;  %v8307_v53 = vpack.c.bf16 0.0, %v7584_v6 }
 0x1e3   :  { %1794 = vmatmul.bf16.gmra.mxu3 %v7702_v14 }
 0x1e4   :  { %10516 = vst [vmem:[#allocation72_spill] sm:$0xff] %v8307_v53 }
 0x1e5   :  { %v1361_v3 = vpop.f32.mrf.mxu2 }
 0x1e6   :  { %v1755_v52 = vpop.f32.mrf.mxu3  ;;  %v1467_v33 = vadd.f32 %v1361_v3, %v968_v42  ;;  %v762_v63 = vpop.f32.mrf.mxu0 }
 0x1e7   :  { %v969_v20 = vpop.f32.mrf.mxu1 }
 0x1e8   :  { %v970_v27 = vadd.f32 %v969_v20, %v752_v55  ;;  %v8300_v5 = vadd.f32 %v1755_v52, %v1467_v33 }
 0x1ed   :  { %v1363_v9 = vpop.f32.mrf.mxu2 }
 0x1ee   :  { %v1757_v26 = vpop.f32.mrf.mxu3  ;;  %v1468_v61 = vadd.f32 %v1363_v9, %v970_v27  ;;  %v8302_v44 = vpop.f32.mrf.mxu0 }
 0x1ef   :  { %v972_v45 = vpop.f32.mrf.mxu1 }
 0x1f0   :  { %v973_v57 = vadd.f32 %v972_v45, %v755_v49  ;;  %v8309_v59 = vadd.f32 %v1757_v26, %v1468_v61  ;;  %v97_v49 = vld [vmem:[%s10338_s0 + $0x1c0] sm:$0xff] }
 0x1f1   :  { %1011 = vmatmul.bf16.gmra.mxu1 %v7696_v12  ;;  %2009 = vmatmul.bf16.gmra.mxu0 %v7898_v11  ;;  %v8325_v6 = vpack.c.bf16 %v97_v49, %v10471_v28  ;;  %v7459_v49 = vld [vmem:[%s10337_s1 + $0x1b0] sm:$0xff] }
 0x1f2   :  { %1405 = vmatmul.bf16.gmra.mxu2 %v8307_v53 }
 0x1f3   :  { %1799 = vmatmul.bf16.gmra.mxu3 %v7710_v17  ;;  %10517 = vst [vmem:[#allocation73_spill] sm:$0xff] %v8325_v6 }
 0x1f5   :  { %v1366_v55 = vpop.f32.mrf.mxu2 }
 0x1f6   :  { %v1760_v42 = vpop.f32.mrf.mxu3  ;;  %v1469_v3 = vadd.f32 %v1366_v55, %v973_v57  ;;  %v8315_v52 = vpop.f32.mrf.mxu0 }
 0x1f7   :  { %v974_v33 = vpop.f32.mrf.mxu1 }
 0x1f8   :  { %v975_v20 = vadd.f32 %v974_v33, %v757_v32  ;;  %v8317_v27 = vadd.f32 %v1760_v42, %v1469_v3  ;;  %v7452_v32 = vld [vmem:[%s10337_s1 + $0x178] sm:$0xff] }
 0x1f9   :  { %v7460_v42 = vld [vmem:[%s10337_s1 + $0x1b8] sm:$0xff]  ;;  %2380 = vmatpush.bf16.msra.mxu1 %v7452_v32  ;;  %v7467_v32 = vld [vmem:[%s10337_s1 + $0x1f0] sm:$0xff] }
 0x1fa   :  { %2838 = vmatpush.bf16.msra.mxu2 %v7460_v42 }
 0x1fd   :  { %v1368_v9 = vpop.f32.mrf.mxu2 }
 0x1fe   :  { %v1762_v26 = vpop.f32.mrf.mxu3  ;;  %v1470_v11 = vadd.f32 %v1368_v9, %v975_v20  ;;  %v8322_v61 = vpop.f32.mrf.mxu0  ;;  %v7451_v20 = vld [vmem:[%s10337_s1 + $0x170] sm:$0xff]  ;;  %2839 = vmatpush.bf16.msra.mxu2 %v7459_v49 }
 0x1ff   :  { %v977_v45 = vpop.f32.mrf.mxu1  ;;  %2381 = vmatpush.bf16.msra.mxu1 %v7451_v20 }
 0x200   :  { %v978_v57 = vadd.f32 %v977_v45, %v760_v47  ;;  %v8327_v55 = vadd.f32 %v1762_v26, %v1470_v11  ;;  %v7468_v47 = vld [vmem:[%s10337_s1 + $0x1f8] sm:$0xff] }
 0x201   :  { %1016 = vmatmul.bf16.gmra.mxu1 %v8276_v54  ;;  %2014 = vmatmul.bf16.gmra.mxu0 %v7912_v19 }
 0x202   :  { %1410 = vmatmul.bf16.gmra.mxu2 %v7699_v13  ;;  %3232 = vmatpush.bf16.msra.mxu3 %v7468_v47  ;;  %v7450_v47 = vld [vmem:[%s10337_s1 + $0x168] sm:$0xff] }
 0x203   :  { %1804 = vmatmul.bf16.gmra.mxu3 %v8325_v6  ;;  %2382 = vmatpush.bf16.msra.mxu1 %v7450_v47 }
 0x205   :  { %v1371_v3 = vpop.f32.mrf.mxu2 }
 0x206   :  { %v1765_v33 = vpop.f32.mrf.mxu3  ;;  %v1471_v9 = vadd.f32 %v1371_v3, %v978_v57  ;;  %v8348_v26 = vpop.f32.mrf.mxu0  ;;  %v7458_v57 = vld [vmem:[%s10337_s1 + $0x1a8] sm:$0xff]  ;;  %3233 = vmatpush.bf16.msra.mxu3 %v7467_v32  ;;  %v99_v3 = vld [vmem:[%s10338_s0 + $0x1d0] sm:$0xff] }
 0x207   :  { %v979_v11 = vpop.f32.mrf.mxu1  ;;  %2840 = vmatpush.bf16.msra.mxu2 %v7458_v57 }
 0x208   :  { %v980_v45 = vadd.f32 %v979_v11, %v762_v63  ;;  %v8353_v42 = vadd.f32 %v1765_v33, %v1471_v9  ;;  %v8364_v63 = vld [vmem:[%s10338_s0 + $0x1c8] sm:$0xff]  ;;  %v7449_v9 = vld [vmem:[%s10337_s1 + $0x160] sm:$0xff] }
 0x209   :  { %v7466_v33 = vld [vmem:[%s10337_s1 + $0x1e8] sm:$0xff]  ;;  %v7457_v11 = vld [vmem:[%s10337_s1 + $0x1a0] sm:$0xff]  ;;  %v8381_v57 = vpack.c.bf16 %v99_v3, %v8364_v63  ;;  %2383 = vmatpush.bf16.msra.mxu1 %v7449_v9  ;;  %v7464_v3 = vld [vmem:[%s10337_s1 + $0x1d8] sm:$0xff] }
 0x20a   :  { %3234 = vmatpush.bf16.msra.mxu3 %v7466_v33  ;;  %v7465_v33 = vld [vmem:[%s10337_s1 + $0x1e0] sm:$0xff]  ;;  %v7447_v9 = vld [vmem:[%s10337_s1 + $0x150] sm:$0xff] }
 0x20b   :  { %10518 = vst [vmem:[#allocation74_spill] sm:$0xff] %v8381_v57  ;;  %2841 = vmatpush.bf16.msra.mxu2 %v7457_v11  ;;  %v7455_v11 = vld [vmem:[%s10337_s1 + $0x190] sm:$0xff] }
 0x20d   :  { %v1373_v20 = vpop.f32.mrf.mxu2 }
 0x20e   :  { %v1767_v49 = vpop.f32.mrf.mxu3  ;;  %v1472_v32 = vadd.f32 %v1373_v20, %v980_v45  ;;  %v8378_v28 = vpop.f32.mrf.mxu0  ;;  %v7448_v45 = vld [vmem:[%s10337_s1 + $0x158] sm:$0xff]  ;;  %3235 = vmatpush.bf16.msra.mxu3 %v7465_v33 }
 0x20f   :  { %v982_v47 = vpop.f32.mrf.mxu1  ;;  %2384 = vmatpush.bf16.msra.mxu1 %v7448_v45 }
 0x210   :  { %v983_v6 = vadd.f32 %v982_v47, %v8302_v44  ;;  %v8387_v53 = vadd.f32 %v1767_v49, %v1472_v32  ;;  %v7456_v44 = vld [vmem:[%s10337_s1 + $0x198] sm:$0xff] }
 0x211   :  { %1021 = vmatmul.bf16.gmra.mxu1 %v7699_v13  ;;  %2019 = vmatmul.bf16.gmra.mxu0 %v7938_v36  ;;  %v7446_v13 = vld [vmem:[%s10337_s1 + $0x148] sm:$0xff] }
 0x212   :  { %10519 = vst [vmem:[#allocation75_spill] sm:$0xff] %v8387_v53  ;;  %1415 = vmatmul.bf16.gmra.mxu2 %v7702_v14  ;;  %3236 = vmatpush.bf16.msra.mxu3 %v7464_v3  ;;  %v8430_v3 = vld [vmem:[%s10338_s0 + $0x1e0] sm:$0xff] }
 0x213   :  { %1809 = vmatmul.bf16.gmra.mxu3 %v8381_v57  ;;  %2842 = vmatpush.bf16.msra.mxu2 %v7456_v44  ;;  %v7463_v44 = vld [vmem:[%s10337_s1 + $0x1d0] sm:$0xff]  ;;  %10522 = vst [vmem:[#allocation78_spill] sm:$0xff] %v8430_v3 }
 0x214   :  { %2385 = vmatpush.bf16.msra.mxu1 %v7447_v9 }
 0x215   :  { %v1376_v20 = vpop.f32.mrf.mxu2 }
 0x216   :  { %v1770_v49 = vpop.f32.mrf.mxu3  ;;  %v1473_v32 = vadd.f32 %v1376_v20, %v983_v6  ;;  %v8408_v47 = vpop.f32.mrf.mxu0  ;;  %v7454_v6 = vld [vmem:[%s10337_s1 + $0x188] sm:$0xff]  ;;  %3237 = vmatpush.bf16.msra.mxu3 %v7463_v44 }
 0x217   :  { %v984_v33 = vpop.f32.mrf.mxu1  ;;  %2843 = vmatpush.bf16.msra.mxu2 %v7455_v11  ;;  %v7462_v20 = vld [vmem:[%s10337_s1 + $0x1c8] sm:$0xff]  ;;  %v7445_v11 = vld [vmem:[%s10337_s1 + $0x140] sm:$0xff] }
 0x218   :  { %v985_v45 = vadd.f32 %v984_v33, %v8315_v52  ;;  %v8414_v57 = vadd.f32 %v1770_v49, %v1473_v32  ;;  %v8425_v52 = vld [vmem:[%s10338_s0 + $0x1d8] sm:$0xff]  ;;  %2386 = vmatpush.bf16.msra.mxu1 %v7446_v13  ;;  %v7453_v32 = vld [vmem:[%s10337_s1 + $0x180] sm:$0xff] }
 0x219   :  { %10521 = vst [vmem:[#allocation77_spill] sm:$0xff] %v8425_v52  ;;  %v8443_v13 = vpack.c.bf16 %v8430_v3, %v8425_v52 }
 0x21a   :  { %10520 = vst [vmem:[#allocation76_spill] sm:$0xff] %v8414_v57  ;;  %3238 = vmatpush.bf16.msra.mxu3 %v7462_v20 }
 0x21b   :  { %2844 = vmatpush.bf16.msra.mxu2 %v7454_v6  ;;  %10523 = vst [vmem:[#allocation79_spill] sm:$0xff] %v8443_v13  ;;  %v7461_v6 = vld [vmem:[%s10337_s1 + $0x1c0] sm:$0xff] }
 0x21c   :  { %2387 = vmatpush.bf16.msra.mxu1 %v7445_v11 }
 0x21d   :  { %v1378_v49 = vpop.f32.mrf.mxu2 }
 0x21e   :  { %v1772_v9 = vpop.f32.mrf.mxu3  ;;  %v1474_v33 = vadd.f32 %v1378_v49, %v985_v45  ;;  %v780_v57 = vpop.f32.mrf.mxu0  ;;  %3239 = vmatpush.bf16.msra.mxu3 %v7461_v6 }
 0x21f   :  { %v987_v53 = vpop.f32.mrf.mxu1  ;;  %2845 = vmatpush.bf16.msra.mxu2 %v7453_v32  ;;  %v8466_v32 = vld [vmem:[%s10338_s0 + $0x1f0] sm:$0xff] }
 0x220   :  { %v988_v44 = vadd.f32 %v987_v53, %v8322_v61  ;;  %v8449_v54 = vadd.f32 %v1772_v9, %v1474_v33  ;;  %v8461_v9 = vld [vmem:[%s10338_s0 + $0x1e8] sm:$0xff]  ;;  %10527 = vst [vmem:[#allocation83_spill] sm:$0xff] %v8466_v32 }
 0x221   :  { %1026 = vmatmul.bf16.gmra.mxu1 %v7702_v14  ;;  %2024 = vmatmul.bf16.gmra.mxu0 %v7963_v51  ;;  %10526 = vst [vmem:[#allocation82_spill] sm:$0xff] %v8461_v9 }
 0x222   :  { %10524 = vst [vmem:[#allocation80_spill] sm:$0xff] %v8449_v54  ;;  %1420 = vmatmul.bf16.gmra.mxu2 %v7710_v17 }
 0x223   :  { %1814 = vmatmul.bf16.gmra.mxu3 %v8443_v13 }
 0x225   :  { %v1381_v45 = vpop.f32.mrf.mxu2 }
 0x226   :  { %v1775_v53 = vpop.f32.mrf.mxu3  ;;  %v1475_v61 = vadd.f32 %v1381_v45, %v988_v44  ;;  %v782_v20 = vpop.f32.mrf.mxu0 }
 0x227   :  { %v989_v49 = vpop.f32.mrf.mxu1 }
 0x228   :  { %v990_v11 = vadd.f32 %v989_v49, %v8348_v26  ;;  %v8456_v3 = vadd.f32 %v1775_v53, %v1475_v61  ;;  %v7585_v26 = vld [vmem:[%s10338_s0 + $0x1b8] sm:$0xff]  ;;  %v8475_v61 = vpack.c.bf16 %v8466_v32, %v8461_v9 }
 0x229   :  { %v8471_v53 = vpack.c.bf16 0.0, %v7585_v26 }
 0x22a   :  { %10525 = vst [vmem:[#allocation81_spill] sm:$0xff] %v8456_v3 }
 0x22b   :  { %10528 = vst [vmem:[#allocation84_spill] sm:$0xff] %v8471_v53 }
 0x22c   :  { %10529 = vst [vmem:[#allocation85_spill] sm:$0xff] %v8475_v61 }
 0x22d   :  { %v1383_v33 = vpop.f32.mrf.mxu2 }
 0x22e   :  { %v1777_v6 = vpop.f32.mrf.mxu3  ;;  %v1476_v13 = vadd.f32 %v1383_v33, %v990_v11  ;;  %v785_v44 = vpop.f32.mrf.mxu0 }
 0x22f   :  { %v992_v45 = vpop.f32.mrf.mxu1 }
 0x230   :  { %v993_v49 = vadd.f32 %v992_v45, %v8378_v28  ;;  %v8478_v14 = vadd.f32 %v1777_v6, %v1476_v13 }
 0x231   :  { %1031 = vmatmul.bf16.gmra.mxu1 %v7710_v17  ;;  %2029 = vmatmul.bf16.gmra.mxu0 %v7983_v21 }
 0x232   :  { %10530 = vst [vmem:[#allocation86_spill] sm:$0xff] %v8478_v14  ;;  %1425 = vmatmul.bf16.gmra.mxu2 %v8471_v53 }
 0x233   :  { %1819 = vmatmul.bf16.gmra.mxu3 %v8475_v61 }
 0x235   :  { %v1386_v11 = vpop.f32.mrf.mxu2 }
 0x236   :  { %v1780_v33 = vpop.f32.mrf.mxu3  ;;  %v1477_v26 = vadd.f32 %v1386_v11, %v993_v49  ;;  %v787_v3 = vpop.f32.mrf.mxu0 }
 0x237   :  { %v994_v54 = vpop.f32.mrf.mxu1 }
 0x238   :  { %v995_v32 = vadd.f32 %v994_v54, %v8408_v47  ;;  %v8485_v9 = vadd.f32 %v1780_v33, %v1477_v26 }
 0x23d   :  { %v1388_v28 = vpop.f32.mrf.mxu2 }
 0x23e   :  { %v1782_v13 = vpop.f32.mrf.mxu3  ;;  %v1478_v6 = vadd.f32 %v1388_v28, %v995_v32  ;;  %v1995_v17 = vpop.f32.mrf.mxu0 }
 0x23f   :  { %v997_v45 = vpop.f32.mrf.mxu1  ;;  %v8488_v52 = vadd.f32 %v1995_v17, %v7972_v2 }
 0x240   :  { %v998_v14 = vadd.f32 %v997_v45, %v780_v57  ;;  %v8490_v53 = vadd.f32 %v1782_v13, %v1478_v6 }
 0x241   :  { %2034 = vmatmul.bf16.gmra.mxu0 %v8001_v56  ;;  %2388 = vmatmul.bf16.vlgmr.msra.gmra.mxu1 %v7841_v60 }
 0x242   :  { %2846 = vmatmul.bf16.vlgmr.msra.gmra.mxu2 %v7881_v7 }
 0x243   :  { %3240 = vmatmul.bf16.vlgmr.msra.gmra.mxu3 %v7912_v19 }
 0x245   :  { %v1391_v54 = vpop.f32.mrf.mxu2 }
 0x246   :  { %v1785_v47 = vpop.f32.mrf.mxu3  ;;  %v1479_v49 = vadd.f32 %v1391_v54, %v998_v14  ;;  %v1997_v11 = vpop.f32.mrf.mxu0 }
 0x247   :  { %v999_v32 = vpop.f32.mrf.mxu1  ;;  %v8497_v57 = vadd.f32 %v1997_v11, %v7987_v58 }
 0x248   :  { %v1000_v33 = vadd.f32 %v999_v32, %v782_v20  ;;  %v8499_v17 = vadd.f32 %v1785_v47, %v1479_v49 }
 0x24d   :  { %v1393_v2 = vpop.f32.mrf.mxu2 }
 0x24e   :  { %v1787_v26 = vpop.f32.mrf.mxu3  ;;  %v1480_v28 = vadd.f32 %v1393_v2, %v1000_v33  ;;  %v2000_v60 = vpop.f32.mrf.mxu0 }
 0x24f   :  { %v1002_v13 = vpop.f32.mrf.mxu1  ;;  %v8502_v7 = vadd.f32 %v2000_v60, %v7993_v39 }
 0x250   :  { %v1003_v6 = vadd.f32 %v1002_v13, %v785_v44  ;;  %v8504_v19 = vadd.f32 %v1787_v26, %v1480_v28 }
 0x251   :  { %2039 = vmatmul.bf16.gmra.mxu0 %v8019_v25  ;;  %2393 = vmatmul.bf16.gmra.mxu1 %v7855_v0 }
 0x252   :  { %2851 = vmatmul.bf16.gmra.mxu2 %v7900_v15 }
 0x253   :  { %3245 = vmatmul.bf16.gmra.mxu3 %v7938_v36 }
 0x255   :  { %v1396_v14 = vpop.f32.mrf.mxu2 }
 0x256   :  { %v1790_v58 = vpop.f32.mrf.mxu3  ;;  %v1481_v20 = vadd.f32 %v1396_v14, %v1003_v6  ;;  %v2002_v54 = vpop.f32.mrf.mxu0 }
 0x257   :  { %v1004_v45 = vpop.f32.mrf.mxu1  ;;  %v8511_v44 = vadd.f32 %v2002_v54, %v8005_v62 }
 0x258   :  { %v1005_v47 = vadd.f32 %v1004_v45, %v787_v3  ;;  %v8513_v39 = vadd.f32 %v1790_v58, %v1481_v20 }
 0x25d   :  { %v1398_v49 = vpop.f32.mrf.mxu2 }
 0x25e   :  { %v1792_v32 = vpop.f32.mrf.mxu3  ;;  %v1482_v11 = vadd.f32 %v1398_v49, %v1005_v47  ;;  %v2005_v0 = vpop.f32.mrf.mxu0  ;;  %v10534_v47 = vpack.c.bf16 0.0, %v7889_v8 }
 0x25f   :  { %v1007_v33 = vpop.f32.mrf.mxu1  ;;  %v8516_v2 = vadd.f32 %v2005_v0, %v8011_v43 }
 0x260   :  { %v8518_v36 = vadd.f32 %v1792_v32, %v1482_v11  ;;  %v1008_v62 = vadd.f32 %v1007_v33, %v7914_v22 }
 0x261   :  { %2044 = vmatmul.bf16.gmra.mxu0 %v8036_v46  ;;  %2398 = vmatmul.bf16.gmra.mxu1 %v7869_v4 }
 0x262   :  { %10531 = vst [vmem:[#allocation87_spill] sm:$0xff] %v8518_v36  ;;  %2856 = vmatmul.bf16.gmra.mxu2 %v7916_v23 }
 0x263   :  { %3250 = vmatmul.bf16.gmra.mxu3 %v7963_v51 }
 0x265   :  { %v1401_v3 = vpop.f32.mrf.mxu2 }
 0x266   :  { %v1795_v26 = vpop.f32.mrf.mxu3  ;;  %v1483_v28 = vadd.f32 %v1401_v3, %v1008_v62  ;;  %v2007_v60 = vpop.f32.mrf.mxu0  ;;  %v10536_v62 = vld [vmem:[#allocation20_spill] sm:$0xff] }
 0x267   :  { %v1009_v13 = vpop.f32.mrf.mxu1  ;;  %v8526_v43 = vadd.f32 %v2007_v60, %v8025_v48 }
 0x268   :  { %v8528_v6 = vadd.f32 %v1795_v26, %v1483_v28  ;;  %v1010_v14 = vadd.f32 %v1009_v13, %v7926_v31 }
 0x26a   :  { %10532 = vst [vmem:[#allocation88_spill] sm:$0xff] %v8528_v6 }
 0x26d   :  { %v1403_v58 = vpop.f32.mrf.mxu2 }
 0x26e   :  { %v1797_v4 = vpop.f32.mrf.mxu3  ;;  %v1484_v20 = vadd.f32 %v1403_v58, %v1010_v14  ;;  %v2010_v54 = vpop.f32.mrf.mxu0  ;;  %v10539_v58 = vld [vmem:[#allocation33_spill] sm:$0xff] }
 0x26f   :  { %v1012_v45 = vpop.f32.mrf.mxu1  ;;  %v8532_v51 = vadd.f32 %v2010_v54, %v8031_v50 }
 0x270   :  { %v8534_v22 = vadd.f32 %v1797_v4, %v1484_v20  ;;  %v1013_v31 = vadd.f32 %v1012_v45, %v7940_v38  ;;  %v10541_v4 = vld [vmem:[#allocation13_spill] sm:$0xff] }
 0x271   :  { %2049 = vmatmul.bf16.gmra.mxu0 %v8058_v1  ;;  %2403 = vmatmul.bf16.gmra.mxu1 %v10534_v47 }
 0x272   :  { %10533 = vst [vmem:[#allocation89_spill] sm:$0xff] %v8534_v22  ;;  %2861 = vmatmul.bf16.gmra.mxu2 %v7943_v40 }
 0x273   :  { %3255 = vmatmul.bf16.gmra.mxu3 %v7983_v21  ;;  %v10537_v21 = vld [vmem:[#allocation29_spill] sm:$0xff] }
 0x275   :  { %v1406_v48 = vpop.f32.mrf.mxu2 }
 0x276   :  { %v1800_v49 = vpop.f32.mrf.mxu3  ;;  %v1485_v32 = vadd.f32 %v1406_v48, %v1013_v31  ;;  %v2012_v33 = vpop.f32.mrf.mxu0 }
 0x277   :  { %v1014_v11 = vpop.f32.mrf.mxu1  ;;  %v8543_v50 = vadd.f32 %v2012_v33, %v8041_v10  ;;  %v10540_v10 = vld [vmem:[#allocation23_spill] sm:$0xff] }
 0x278   :  { %v8545_v0 = vadd.f32 %v1800_v49, %v1485_v32  ;;  %v1015_v3 = vadd.f32 %v1014_v11, %v10536_v62  ;;  %v10542_v49 = vld [vmem:[#allocation31_spill] sm:$0xff] }
 0x279   :  { %v10544_v33 = vld [vmem:[#allocation15_spill] sm:$0xff] }
 0x27a   :  { %10535 = vst [vmem:[#allocation90_spill] sm:$0xff] %v8545_v0 }
 0x27d   :  { %v1408_v8 = vpop.f32.mrf.mxu2 }
 0x27e   :  { %v1802_v26 = vpop.f32.mrf.mxu3  ;;  %v1486_v28 = vadd.f32 %v1408_v8, %v1015_v3  ;;  %v2015_v60 = vpop.f32.mrf.mxu0 }
 0x27f   :  { %v1017_v13 = vpop.f32.mrf.mxu1  ;;  %v8549_v14 = vadd.f32 %v2015_v60, %v10537_v21 }
 0x280   :  { %v8551_v38 = vadd.f32 %v1802_v26, %v1486_v28  ;;  %v1018_v20 = vadd.f32 %v1017_v13, %v10541_v4  ;;  %v10548_v4 = vld [vmem:[#allocation24_spill] sm:$0xff] }
 0x281   :  { %2054 = vmatmul.bf16.gmra.mxu0 %v10539_v58  ;;  %2408 = vmatmul.bf16.gmra.mxu1 %v7900_v15 }
 0x282   :  { %10538 = vst [vmem:[#allocation20_spill] sm:$0xff] %v8551_v38  ;;  %2866 = vmatmul.bf16.gmra.mxu2 %v10540_v10  ;;  %v10547_v10 = vld [vmem:[#allocation37_spill] sm:$0xff] }
 0x283   :  { %3260 = vmatmul.bf16.gmra.mxu3 %v8001_v56  ;;  %v10545_v56 = vld [vmem:[#allocation32_spill] sm:$0xff] }
 0x285   :  { %v1411_v45 = vpop.f32.mrf.mxu2 }
 0x286   :  { %v1805_v54 = vpop.f32.mrf.mxu3  ;;  %v1487_v47 = vadd.f32 %v1411_v45, %v1018_v20  ;;  %v2017_v48 = vpop.f32.mrf.mxu0  ;;  %v10549_v20 = vld [vmem:[#allocation18_spill] sm:$0xff] }
 0x287   :  { %v1019_v31 = vpop.f32.mrf.mxu1  ;;  %v8559_v32 = vadd.f32 %v2017_v48, %v10542_v49 }
 0x288   :  { %v8561_v11 = vadd.f32 %v1805_v54, %v1487_v47  ;;  %v1020_v62 = vadd.f32 %v1019_v31, %v10544_v33  ;;  %v10550_v33 = vld [vmem:[#allocation35_spill] sm:$0xff] }
 0x28a   :  { %10543 = vst [vmem:[#allocation29_spill] sm:$0xff] %v8561_v11 }
 0x28d   :  { %v1413_v3 = vpop.f32.mrf.mxu2 }
 0x28e   :  { %v1807_v8 = vpop.f32.mrf.mxu3  ;;  %v1488_v26 = vadd.f32 %v1413_v3, %v1020_v62  ;;  %v2020_v60 = vpop.f32.mrf.mxu0 }
 0x28f   :  { %v1022_v28 = vpop.f32.mrf.mxu1  ;;  %v8565_v21 = vadd.f32 %v2020_v60, %v10545_v56 }
 0x290   :  { %v8567_v13 = vadd.f32 %v1807_v8, %v1488_v26  ;;  %v1023_v45 = vadd.f32 %v1022_v28, %v10549_v20  ;;  %v10552_v8 = vld [vmem:[#allocation21_spill] sm:$0xff]  ;;  %v10555_v20 = vld [vmem:[#allocation42_spill] sm:$0xff] }
 0x291   :  { %2059 = vmatmul.bf16.gmra.mxu0 %v10547_v10  ;;  %2413 = vmatmul.bf16.gmra.mxu1 %v7916_v23 }
 0x292   :  { %10546 = vst [vmem:[#allocation33_spill] sm:$0xff] %v8567_v13  ;;  %2871 = vmatmul.bf16.gmra.mxu2 %v10548_v4 }
 0x293   :  { %3265 = vmatmul.bf16.gmra.mxu3 %v8019_v25  ;;  %v10553_v25 = vld [vmem:[#allocation36_spill] sm:$0xff] }
 0x295   :  { %v1416_v54 = vpop.f32.mrf.mxu2 }
 0x296   :  { %v1810_v47 = vpop.f32.mrf.mxu3  ;;  %v1489_v31 = vadd.f32 %v1416_v54, %v1023_v45  ;;  %v2022_v49 = vpop.f32.mrf.mxu0  ;;  %v10556_v45 = vld [vmem:[#allocation25_spill] sm:$0xff]  ;;  %v10557_v54 = vld [vmem:[#allocation14_spill] sm:$0xff] }
 0x297   :  { %v1024_v48 = vpop.f32.mrf.mxu1  ;;  %v8575_v62 = vadd.f32 %v2022_v49, %v10550_v33 }
 0x298   :  { %v8577_v3 = vadd.f32 %v1810_v47, %v1489_v31  ;;  %v1025_v26 = vadd.f32 %v1024_v48, %v10552_v8 }
 0x29a   :  { %10551 = vst [vmem:[#allocation23_spill] sm:$0xff] %v8577_v3 }
 0x29d   :  { %v1418_v60 = vpop.f32.mrf.mxu2 }
 0x29e   :  { %v1812_v56 = vpop.f32.mrf.mxu3  ;;  %v1490_v13 = vadd.f32 %v1418_v60, %v1025_v26  ;;  %v2025_v38 = vpop.f32.mrf.mxu0  ;;  %v10558_v26 = vld [vmem:[#allocation40_spill] sm:$0xff] }
 0x29f   :  { %v1027_v11 = vpop.f32.mrf.mxu1  ;;  %v8581_v61 = vadd.f32 %v2025_v38, %v10553_v25  ;;  %v10560_v60 = vld [vmem:[#allocation16_spill] sm:$0xff] }
 0x2a0   :  { %v8583_v28 = vadd.f32 %v1812_v56, %v1490_v13  ;;  %v1028_v47 = vadd.f32 %v1027_v11, %v10557_v54  ;;  %v10563_v54 = vld [vmem:[#allocation46_spill] sm:$0xff] }
 0x2a1   :  { %2064 = vmatmul.bf16.gmra.mxu0 %v10555_v20  ;;  %2418 = vmatmul.bf16.gmra.mxu1 %v7943_v40 }
 0x2a2   :  { %10554 = vst [vmem:[#allocation13_spill] sm:$0xff] %v8583_v28  ;;  %2876 = vmatmul.bf16.gmra.mxu2 %v10556_v45 }
 0x2a3   :  { %3270 = vmatmul.bf16.gmra.mxu3 %v8036_v46  ;;  %v10561_v46 = vld [vmem:[#allocation41_spill] sm:$0xff] }
 0x2a5   :  { %v1421_v31 = vpop.f32.mrf.mxu2 }
 0x2a6   :  { %v1815_v48 = vpop.f32.mrf.mxu3  ;;  %v1491_v49 = vadd.f32 %v1421_v31, %v1028_v47  ;;  %v2027_v8 = vpop.f32.mrf.mxu0  ;;  %v10564_v47 = vld [vmem:[#allocation26_spill] sm:$0xff]  ;;  %v10565_v31 = vld [vmem:[#allocation27_spill] sm:$0xff] }
 0x2a7   :  { %v1029_v33 = vpop.f32.mrf.mxu1  ;;  %v8591_v38 = vadd.f32 %v2027_v8, %v10558_v26 }
 0x2a8   :  { %v8593_v13 = vadd.f32 %v1815_v48, %v1491_v49  ;;  %v1030_v56 = vadd.f32 %v1029_v33, %v10560_v60  ;;  %v10566_v48 = vld [vmem:[#allocation19_spill] sm:$0xff] }
 0x2aa   :  { %10559 = vst [vmem:[#allocation31_spill] sm:$0xff] %v8593_v13 }
 0x2ad   :  { %v1423_v25 = vpop.f32.mrf.mxu2 }
 0x2ae   :  { %v1817_v28 = vpop.f32.mrf.mxu3  ;;  %v1492_v3 = vadd.f32 %v1423_v25, %v1030_v56  ;;  %v2030_v22 = vpop.f32.mrf.mxu0  ;;  %v10567_v25 = vld [vmem:[#allocation44_spill] sm:$0xff] }
 0x2af   :  { %v1032_v0 = vpop.f32.mrf.mxu1  ;;  %v8597_v40 = vadd.f32 %v2030_v22, %v10561_v46 }
 0x2b0   :  { %v8599_v11 = vadd.f32 %v1817_v28, %v1492_v3  ;;  %v1033_v49 = vadd.f32 %v1032_v0, %v10566_v48  ;;  %v10569_v28 = vld [vmem:[#allocation22_spill] sm:$0xff] }
 0x2b1   :  { %2069 = vmatmul.bf16.gmra.mxu0 %v10563_v54  ;;  %2423 = vmatmul.bf16.gmra.mxu1 %v10564_v47 }
 0x2b2   :  { %10562 = vst [vmem:[#allocation15_spill] sm:$0xff] %v8599_v11  ;;  %2881 = vmatmul.bf16.gmra.mxu2 %v10565_v31 }
 0x2b3   :  { %3275 = vmatmul.bf16.gmra.mxu3 %v8058_v1  ;;  %v10570_v1 = vld [vmem:[#allocation45_spill] sm:$0xff] }
 0x2b5   :  { %v1426_v33 = vpop.f32.mrf.mxu2 }
 0x2b6   :  { %v1820_v8 = vpop.f32.mrf.mxu3  ;;  %v1493_v26 = vadd.f32 %v1426_v33, %v1033_v49  ;;  %v2032_v56 = vpop.f32.mrf.mxu0  ;;  %v10572_v49 = vld [vmem:[#allocation50_spill] sm:$0xff]  ;;  %v10573_v33 = vld [vmem:[#allocation28_spill] sm:$0xff] }
 0x2b7   :  { %v1034_v60 = vpop.f32.mrf.mxu1  ;;  %v8607_v22 = vadd.f32 %v2032_v56, %v10567_v25  ;;  %v10574_v25 = vld [vmem:[#allocation48_spill] sm:$0xff] }
 0x2b8   :  { %v8609_v3 = vadd.f32 %v1820_v8, %v1493_v26  ;;  %v1035_v46 = vadd.f32 %v1034_v60, %v10569_v28 }
 0x2ba   :  { %10568 = vst [vmem:[#allocation32_spill] sm:$0xff] %v8609_v3 }
 0x2bd   :  { %v1428_v11 = vpop.f32.mrf.mxu2 }
 0x2be   :  { %v1822_v13 = vpop.f32.mrf.mxu3  ;;  %v1494_v47 = vadd.f32 %v1428_v11, %v1035_v46  ;;  %v2035_v6 = vpop.f32.mrf.mxu0 }
 0x2bf   :  { %v2389_v36 = vpop.f32.mrf.mxu1  ;;  %v8613_v23 = vadd.f32 %v2035_v6, %v10570_v1 }
 0x2c0   :  { %v2549_v0 = vadd.f32 %v2389_v36, %v8488_v52  ;;  %v8616_v48 = vadd.f32 %v1822_v13, %v1494_v47 }
 0x2c1   :  { %2074 = vmatmul.bf16.gmra.mxu0 %v10572_v49  ;;  %2428 = vmatmul.bf16.gmra.mxu1 %v10548_v4 }
 0x2c2   :  { %10571 = vst [vmem:[#allocation37_spill] sm:$0xff] %v8616_v48  ;;  %2886 = vmatmul.bf16.gmra.mxu2 %v10573_v33  ;;  %v10576_v33 = vld [vmem:[#allocation49_spill] sm:$0xff] }
 0x2c3   :  { %3280 = vmatmul.bf16.gmra.mxu3 %v10539_v58 }
 0x2c5   :  { %v2847_v8 = vpop.f32.mrf.mxu2 }
 0x2c6   :  { %v3241_v26 = vpop.f32.mrf.mxu3  ;;  %v3007_v11 = vadd.f32 %v2847_v8, %v2549_v0  ;;  %v2037_v60 = vpop.f32.mrf.mxu0  ;;  %v10578_v8 = vld [vmem:[#allocation54_spill] sm:$0xff] }
 0x2c7   :  { %v2391_v56 = vpop.f32.mrf.mxu1  ;;  %v8623_v6 = vadd.f32 %v2037_v60, %v10574_v25  ;;  %v10579_v60 = vld [vmem:[#allocation30_spill] sm:$0xff] }
 0x2c8   :  { %v2550_v52 = vadd.f32 %v2391_v56, %v8497_v57  ;;  %v8626_v36 = vadd.f32 %v3241_v26, %v3007_v11 }
 0x2ca   :  { %10575 = vst [vmem:[#allocation24_spill] sm:$0xff] %v8626_v36  ;;  %v10582_v36 = vld [vmem:[#allocation53_spill] sm:$0xff] }
 0x2cd   :  { %v2849_v13 = vpop.f32.mrf.mxu2 }
 0x2ce   :  { %v3243_v47 = vpop.f32.mrf.mxu3  ;;  %v3008_v28 = vadd.f32 %v2849_v13, %v2550_v52  ;;  %v2040_v46 = vpop.f32.mrf.mxu0  ;;  %v10580_v52 = vld [vmem:[#allocation52_spill] sm:$0xff] }
 0x2cf   :  { %v2394_v1 = vpop.f32.mrf.mxu1  ;;  %v8629_v48 = vadd.f32 %v2040_v46, %v10576_v33 }
 0x2d0   :  { %v2551_v58 = vadd.f32 %v2394_v1, %v8502_v7  ;;  %v8632_v0 = vadd.f32 %v3243_v47, %v3008_v28 }
 0x2d1   :  { %2079 = vmatmul.bf16.gmra.mxu0 %v10578_v8  ;;  %2433 = vmatmul.bf16.gmra.mxu1 %v10556_v45 }
 0x2d2   :  { %10577 = vst [vmem:[#allocation18_spill] sm:$0xff] %v8632_v0  ;;  %2891 = vmatmul.bf16.gmra.mxu2 %v10579_v60 }
 0x2d3   :  { %3285 = vmatmul.bf16.gmra.mxu3 %v10547_v10 }
 0x2d5   :  { %v2852_v57 = vpop.f32.mrf.mxu2 }
 0x2d6   :  { %v3246_v26 = vpop.f32.mrf.mxu3  ;;  %v3009_v11 = vadd.f32 %v2852_v57, %v2551_v58  ;;  %v2042_v56 = vpop.f32.mrf.mxu0  ;;  %v10584_v57 = vld [vmem:[#allocation58_spill] sm:$0xff] }
 0x2d7   :  { %v2396_v25 = vpop.f32.mrf.mxu1  ;;  %v8639_v13 = vadd.f32 %v2042_v56, %v10580_v52  ;;  %v10585_v56 = vld [vmem:[#allocation34_spill] sm:$0xff] }
 0x2d8   :  { %v2552_v7 = vadd.f32 %v2396_v25, %v8511_v44  ;;  %v8642_v47 = vadd.f32 %v3246_v26, %v3009_v11 }
 0x2da   :  { %10581 = vst [vmem:[#allocation35_spill] sm:$0xff] %v8642_v47  ;;  %v10588_v47 = vld [vmem:[#allocation57_spill] sm:$0xff] }
 0x2dd   :  { %v2854_v28 = vpop.f32.mrf.mxu2 }
 0x2de   :  { %v3248_v46 = vpop.f32.mrf.mxu3  ;;  %v3010_v1 = vadd.f32 %v2854_v28, %v2552_v7  ;;  %v2045_v33 = vpop.f32.mrf.mxu0  ;;  %v10586_v7 = vld [vmem:[#allocation56_spill] sm:$0xff] }
 0x2df   :  { %v2399_v0 = vpop.f32.mrf.mxu1  ;;  %v8645_v3 = vadd.f32 %v2045_v33, %v10582_v36 }
 0x2e0   :  { %v2553_v10 = vadd.f32 %v2399_v0, %v8516_v2  ;;  %v8648_v58 = vadd.f32 %v3248_v46, %v3010_v1 }
 0x2e1   :  { %2084 = vmatmul.bf16.gmra.mxu0 %v10584_v57  ;;  %2438 = vmatmul.bf16.gmra.mxu1 %v10565_v31 }
 0x2e2   :  { %10583 = vst [vmem:[#allocation21_spill] sm:$0xff] %v8648_v58  ;;  %2896 = vmatmul.bf16.gmra.mxu2 %v10585_v56 }
 0x2e3   :  { %3290 = vmatmul.bf16.gmra.mxu3 %v10555_v20 }
 0x2e5   :  { %v2857_v44 = vpop.f32.mrf.mxu2 }
 0x2e6   :  { %v3251_v26 = vpop.f32.mrf.mxu3  ;;  %v3011_v11 = vadd.f32 %v2857_v44, %v2553_v10  ;;  %v2047_v25 = vpop.f32.mrf.mxu0  ;;  %v10590_v44 = vld [vmem:[#allocation62_spill] sm:$0xff] }
 0x2e7   :  { %v2401_v52 = vpop.f32.mrf.mxu1  ;;  %v8655_v36 = vadd.f32 %v2047_v25, %v10586_v7  ;;  %v10591_v25 = vld [vmem:[#allocation38_spill] sm:$0xff]  ;;  %v10592_v7 = vld [vmem:[#allocation39_spill] sm:$0xff] }
 0x2e8   :  { %v2554_v2 = vadd.f32 %v2401_v52, %v8526_v43  ;;  %v8658_v0 = vadd.f32 %v3251_v26, %v3011_v11 }
 0x2ea   :  { %10587 = vst [vmem:[#allocation36_spill] sm:$0xff] %v8658_v0 }
 0x2ed   :  { %v2859_v28 = vpop.f32.mrf.mxu2 }
 0x2ee   :  { %v3253_v46 = vpop.f32.mrf.mxu3  ;;  %v3012_v1 = vadd.f32 %v2859_v28, %v2554_v2  ;;  %v2050_v33 = vpop.f32.mrf.mxu0  ;;  %v10593_v28 = vld [vmem:[#allocation60_spill] sm:$0xff] }
 0x2ef   :  { %v2404_v58 = vpop.f32.mrf.mxu1  ;;  %v8661_v31 = vadd.f32 %v2050_v33, %v10588_v47 }
 0x2f0   :  { %v2555_v20 = vadd.f32 %v2404_v58, %v8532_v51  ;;  %v8664_v10 = vadd.f32 %v3253_v46, %v3012_v1 }
 0x2f1   :  { %2089 = vmatmul.bf16.gmra.mxu0 %v10590_v44  ;;  %2443 = vmatmul.bf16.gmra.mxu1 %v10591_v25  ;;  %v10595_v25 = vld [vmem:[#allocation61_spill] sm:$0xff] }
 0x2f2   :  { %10589 = vst [vmem:[#allocation42_spill] sm:$0xff] %v8664_v10  ;;  %2901 = vmatmul.bf16.gmra.mxu2 %v10592_v7 }
 0x2f3   :  { %3295 = vmatmul.bf16.gmra.mxu3 %v10563_v54 }
 0x2f5   :  { %v2862_v43 = vpop.f32.mrf.mxu2 }
 0x2f6   :  { %v3256_v26 = vpop.f32.mrf.mxu3  ;;  %v3013_v11 = vadd.f32 %v2862_v43, %v2555_v20  ;;  %v2052_v52 = vpop.f32.mrf.mxu0  ;;  %v10597_v43 = vld [vmem:[#allocation66_spill] sm:$0xff] }
 0x2f7   :  { %v2406_v2 = vpop.f32.mrf.mxu1  ;;  %v8671_v47 = vadd.f32 %v2052_v52, %v10593_v28  ;;  %v10598_v52 = vld [vmem:[#allocation43_spill] sm:$0xff] }
 0x2f8   :  { %v2556_v51 = vadd.f32 %v2406_v2, %v8543_v50  ;;  %v8674_v58 = vadd.f32 %v3256_v26, %v3013_v11 }
 0x2fa   :  { %10594 = vst [vmem:[#allocation14_spill] sm:$0xff] %v8674_v58 }
 0x2fd   :  { %v2864_v46 = vpop.f32.mrf.mxu2 }
 0x2fe   :  { %v3258_v1 = vpop.f32.mrf.mxu3  ;;  %v3014_v33 = vadd.f32 %v2864_v46, %v2556_v51  ;;  %v2055_v10 = vpop.f32.mrf.mxu0  ;;  %v10599_v51 = vld [vmem:[#allocation64_spill] sm:$0xff] }
 0x2ff   :  { %v2409_v0 = vpop.f32.mrf.mxu1  ;;  %v8677_v45 = vadd.f32 %v2055_v10, %v10595_v25 }
 0x300   :  { %v2557_v54 = vadd.f32 %v2409_v0, %v8549_v14  ;;  %v8680_v20 = vadd.f32 %v3258_v1, %v3014_v33 }
 0x301   :  { %2094 = vmatmul.bf16.gmra.mxu0 %v10597_v43  ;;  %2448 = vmatmul.bf16.gmra.mxu1 %v10579_v60 }
 0x302   :  { %10596 = vst [vmem:[#allocation40_spill] sm:$0xff] %v8680_v20  ;;  %2906 = vmatmul.bf16.gmra.mxu2 %v10598_v52  ;;  %v10600_v52 = vld [vmem:[#allocation65_spill] sm:$0xff] }
 0x303   :  { %3300 = vmatmul.bf16.gmra.mxu3 %v10572_v49 }
 0x305   :  { %v2867_v50 = vpop.f32.mrf.mxu2 }
 0x306   :  { %v3261_v26 = vpop.f32.mrf.mxu3  ;;  %v3015_v11 = vadd.f32 %v2867_v50, %v2557_v54  ;;  %v2057_v2 = vpop.f32.mrf.mxu0  ;;  %v10602_v50 = vld [vmem:[#allocation47_spill] sm:$0xff] }
 0x307   :  { %v2411_v28 = vpop.f32.mrf.mxu1  ;;  %v8687_v10 = vadd.f32 %v2057_v2, %v10599_v51  ;;  %v10603_v51 = vld [vmem:[#allocation68_spill] sm:$0xff] }
 0x308   :  { %v2558_v14 = vadd.f32 %v2411_v28, %v8559_v32  ;;  %v8690_v0 = vadd.f32 %v3261_v26, %v3015_v11 }
 0x30d   :  { %v2869_v25 = vpop.f32.mrf.mxu2 }
 0x30e   :  { %v3263_v46 = vpop.f32.mrf.mxu3  ;;  %v3016_v1 = vadd.f32 %v2869_v25, %v2558_v14  ;;  %v2060_v33 = vpop.f32.mrf.mxu0 }
 0x30f   :  { %v2414_v20 = vpop.f32.mrf.mxu1  ;;  %v8693_v58 = vadd.f32 %v2060_v33, %v10600_v52 }
 0x310   :  { %v2559_v49 = vadd.f32 %v2414_v20, %v8565_v21  ;;  %v8696_v54 = vadd.f32 %v3263_v46, %v3016_v1 }
 0x311   :  { %2099 = vmatmul.bf16.gmra.mxu0 %v8260_v34  ;;  %2453 = vmatmul.bf16.gmra.mxu1 %v10585_v56 }
 0x312   :  { %10601 = vst [vmem:[#allocation16_spill] sm:$0xff] %v8696_v54  ;;  %2911 = vmatmul.bf16.gmra.mxu2 %v10602_v50 }
 0x313   :  { %3305 = vmatmul.bf16.gmra.mxu3 %v10578_v8 }
 0x315   :  { %v2872_v32 = vpop.f32.mrf.mxu2 }
 0x316   :  { %v3266_v26 = vpop.f32.mrf.mxu3  ;;  %v3017_v11 = vadd.f32 %v2872_v32, %v2559_v49  ;;  %v2062_v2 = vpop.f32.mrf.mxu0  ;;  %v10605_v32 = vld [vmem:[#allocation6_spill] sm:$0xff] }
 0x317   :  { %v2416_v28 = vpop.f32.mrf.mxu1  ;;  %v8703_v14 = vadd.f32 %v2062_v2, %v10603_v51  ;;  %v10606_v2 = vld [vmem:[#allocation51_spill] sm:$0xff] }
 0x318   :  { %v2560_v21 = vadd.f32 %v2416_v28, %v8575_v62  ;;  %v8706_v20 = vadd.f32 %v3266_v26, %v3017_v11 }
 0x31d   :  { %v2874_v25 = vpop.f32.mrf.mxu2 }
 0x31e   :  { %v3268_v46 = vpop.f32.mrf.mxu3  ;;  %v3018_v1 = vadd.f32 %v2874_v25, %v2560_v21  ;;  %v2065_v33 = vpop.f32.mrf.mxu0 }
 0x31f   :  { %v2419_v52 = vpop.f32.mrf.mxu1  ;;  %v8709_v54 = vadd.f32 %v2065_v33, %v8258_v37 }
 0x320   :  { %v2561_v8 = vadd.f32 %v2419_v52, %v8581_v61  ;;  %v8712_v49 = vadd.f32 %v3268_v46, %v3018_v1 }
 0x321   :  { %2104 = vmatmul.bf16.gmra.mxu0 %v10605_v32  ;;  %2458 = vmatmul.bf16.gmra.mxu1 %v10592_v7 }
 0x322   :  { %10604 = vst [vmem:[#allocation41_spill] sm:$0xff] %v8712_v49  ;;  %2916 = vmatmul.bf16.gmra.mxu2 %v10606_v2 }
 0x323   :  { %3310 = vmatmul.bf16.gmra.mxu3 %v10584_v57 }
 0x325   :  { %v2877_v62 = vpop.f32.mrf.mxu2 }
 0x326   :  { %v3271_v26 = vpop.f32.mrf.mxu3  ;;  %v3019_v11 = vadd.f32 %v2877_v62, %v2561_v8  ;;  %v2067_v28 = vpop.f32.mrf.mxu0  ;;  %v10608_v62 = vld [vmem:[#allocation9_spill] sm:$0xff] }
 0x327   :  { %v2421_v51 = vpop.f32.mrf.mxu1  ;;  %v8719_v37 = vadd.f32 %v2067_v28, %v8264_v30  ;;  %v10609_v30 = vld [vmem:[#allocation55_spill] sm:$0xff] }
 0x328   :  { %v2562_v61 = vadd.f32 %v2421_v51, %v8591_v38  ;;  %v8722_v21 = vadd.f32 %v3271_v26, %v3019_v11 }
 0x32d   :  { %v2879_v25 = vpop.f32.mrf.mxu2 }
 0x32e   :  { %v3273_v46 = vpop.f32.mrf.mxu3  ;;  %v3020_v1 = vadd.f32 %v2879_v25, %v2562_v61  ;;  %v2070_v33 = vpop.f32.mrf.mxu0 }
 0x32f   :  { %v2424_v52 = vpop.f32.mrf.mxu1  ;;  %v8725_v49 = vadd.f32 %v2070_v33, %v8270_v35 }
 0x330   :  { %v2563_v57 = vadd.f32 %v2424_v52, %v8597_v40  ;;  %v8728_v8 = vadd.f32 %v3273_v46, %v3020_v1 }
 0x331   :  { %2109 = vmatmul.bf16.gmra.mxu0 %v10608_v62  ;;  %2463 = vmatmul.bf16.gmra.mxu1 %v10609_v30 }
 0x332   :  { %10607 = vst [vmem:[#allocation46_spill] sm:$0xff] %v8728_v8  ;;  %2921 = vmatmul.bf16.gmra.mxu2 %v8173_v24 }
 0x333   :  { %3315 = vmatmul.bf16.gmra.mxu3 %v10590_v44 }
 0x335   :  { %v2882_v38 = vpop.f32.mrf.mxu2 }
 0x336   :  { %v3276_v26 = vpop.f32.mrf.mxu3  ;;  %v3021_v11 = vadd.f32 %v2882_v38, %v2563_v57  ;;  %v2072_v28 = vpop.f32.mrf.mxu0  ;;  %v10610_v38 = vld [vmem:[#allocation7_spill] sm:$0xff] }
 0x337   :  { %v2426_v51 = vpop.f32.mrf.mxu1  ;;  %v8735_v35 = vadd.f32 %v2072_v28, %v8278_v29  ;;  %v10611_v29 = vld [vmem:[#allocation59_spill] sm:$0xff] }
 0x338   :  { %v2564_v40 = vadd.f32 %v2426_v51, %v8607_v22  ;;  %v8738_v61 = vadd.f32 %v3276_v26, %v3021_v11 }
 0x33d   :  { %v2884_v25 = vpop.f32.mrf.mxu2 }
 0x33e   :  { %v3278_v46 = vpop.f32.mrf.mxu3  ;;  %v3022_v1 = vadd.f32 %v2884_v25, %v2564_v40  ;;  %v2075_v33 = vpop.f32.mrf.mxu0 }
 0x33f   :  { %v2429_v52 = vpop.f32.mrf.mxu1  ;;  %v8741_v8 = vadd.f32 %v2075_v33, %v8284_v41 }
 0x340   :  { %v2565_v44 = vadd.f32 %v2429_v52, %v8613_v23  ;;  %v8744_v57 = vadd.f32 %v3278_v46, %v3022_v1 }
 0x341   :  { %2114 = vmatmul.bf16.gmra.mxu0 %v10610_v38  ;;  %2468 = vmatmul.bf16.gmra.mxu1 %v10602_v50 }
 0x342   :  { %2926 = vmatmul.bf16.gmra.mxu2 %v10611_v29 }
 0x343   :  { %3320 = vmatmul.bf16.gmra.mxu3 %v10597_v43 }
 0x345   :  { %v2887_v22 = vpop.f32.mrf.mxu2 }
 0x346   :  { %v3281_v26 = vpop.f32.mrf.mxu3  ;;  %v3023_v11 = vadd.f32 %v2887_v22, %v2565_v44  ;;  %v2077_v28 = vpop.f32.mrf.mxu0  ;;  %v10614_v22 = vld [vmem:[#allocation10_spill] sm:$0xff] }
 0x347   :  { %v2431_v51 = vpop.f32.mrf.mxu1  ;;  %v8751_v41 = vadd.f32 %v2077_v28, %v8286_v16  ;;  %v10615_v16 = vld [vmem:[#allocation63_spill] sm:$0xff] }
 0x348   :  { %v2566_v23 = vadd.f32 %v2431_v51, %v8623_v6  ;;  %v8754_v40 = vadd.f32 %v3281_v26, %v3023_v11 }
 0x34a   :  { %10612 = vst [vmem:[#allocation19_spill] sm:$0xff] %v8754_v40 }
 0x34d   :  { %v2889_v25 = vpop.f32.mrf.mxu2 }
 0x34e   :  { %v3283_v46 = vpop.f32.mrf.mxu3  ;;  %v3024_v1 = vadd.f32 %v2889_v25, %v2566_v23  ;;  %v2080_v33 = vpop.f32.mrf.mxu0  ;;  %v10616_v23 = vld [vmem:[#allocation71_spill] sm:$0xff] }
 0x34f   :  { %v2434_v52 = vpop.f32.mrf.mxu1  ;;  %v8757_v29 = vadd.f32 %v2080_v33, %v8292_v18 }
 0x350   :  { %v2567_v43 = vadd.f32 %v2434_v52, %v8629_v48  ;;  %v8760_v44 = vadd.f32 %v3283_v46, %v3024_v1 }
 0x351   :  { %2119 = vmatmul.bf16.gmra.mxu0 %v10614_v22  ;;  %2473 = vmatmul.bf16.gmra.mxu1 %v10606_v2 }
 0x352   :  { %10613 = vst [vmem:[#allocation44_spill] sm:$0xff] %v8760_v44  ;;  %2931 = vmatmul.bf16.gmra.mxu2 %v10615_v16 }
 0x353   :  { %3325 = vmatmul.bf16.gmra.mxu3 %v8260_v34 }
 0x355   :  { %v2892_v6 = vpop.f32.mrf.mxu2 }
 0x356   :  { %v3286_v26 = vpop.f32.mrf.mxu3  ;;  %v3025_v11 = vadd.f32 %v2892_v6, %v2567_v43  ;;  %v2082_v28 = vpop.f32.mrf.mxu0  ;;  %v10618_v6 = vld [vmem:[#allocation8_spill] sm:$0xff] }
 0x357   :  { %v2436_v51 = vpop.f32.mrf.mxu1  ;;  %v8767_v18 = vadd.f32 %v2082_v28, %v10616_v23  ;;  %v10619_v28 = vld [vmem:[#allocation67_spill] sm:$0xff] }
 0x358   :  { %v2568_v48 = vadd.f32 %v2436_v51, %v8639_v13  ;;  %v8770_v25 = vadd.f32 %v3286_v26, %v3025_v11 }
 0x35d   :  { %v2894_v46 = vpop.f32.mrf.mxu2 }
 0x35e   :  { %v3288_v1 = vpop.f32.mrf.mxu3  ;;  %v3026_v33 = vadd.f32 %v2894_v46, %v2568_v48  ;;  %v2085_v52 = vpop.f32.mrf.mxu0 }
 0x35f   :  { %v2439_v44 = vpop.f32.mrf.mxu1  ;;  %v8773_v40 = vadd.f32 %v2085_v52, %v8300_v5 }
 0x360   :  { %v2569_v34 = vadd.f32 %v2439_v44, %v8645_v3  ;;  %v8776_v43 = vadd.f32 %v3288_v1, %v3026_v33 }
 0x361   :  { %2124 = vmatmul.bf16.gmra.mxu0 %v10618_v6  ;;  %2478 = vmatmul.bf16.gmra.mxu1 %v8173_v24 }
 0x362   :  { %10617 = vst [vmem:[#allocation22_spill] sm:$0xff] %v8776_v43  ;;  %2936 = vmatmul.bf16.gmra.mxu2 %v10619_v28 }
 0x363   :  { %3330 = vmatmul.bf16.gmra.mxu3 %v10605_v32 }
 0x365   :  { %v2897_v13 = vpop.f32.mrf.mxu2 }
 0x366   :  { %v3291_v26 = vpop.f32.mrf.mxu3  ;;  %v3027_v11 = vadd.f32 %v2897_v13, %v2569_v34  ;;  %v2087_v51 = vpop.f32.mrf.mxu0  ;;  %v10620_v13 = vld [vmem:[#allocation11_spill] sm:$0xff] }
 0x367   :  { %v2441_v23 = vpop.f32.mrf.mxu1  ;;  %v8783_v5 = vadd.f32 %v2087_v51, %v8309_v59  ;;  %v10621_v59 = vld [vmem:[#allocation69_spill] sm:$0xff] }
 0x368   :  { %v2570_v3 = vadd.f32 %v2441_v23, %v8655_v36  ;;  %v8786_v44 = vadd.f32 %v3291_v26, %v3027_v11 }
 0x36d   :  { %v2899_v48 = vpop.f32.mrf.mxu2 }
 0x36e   :  { %v3293_v46 = vpop.f32.mrf.mxu3  ;;  %v3028_v1 = vadd.f32 %v2899_v48, %v2570_v3  ;;  %v2090_v33 = vpop.f32.mrf.mxu0 }
 0x36f   :  { %v2444_v52 = vpop.f32.mrf.mxu1  ;;  %v8789_v43 = vadd.f32 %v2090_v33, %v8317_v27 }
 0x370   :  { %v2571_v32 = vadd.f32 %v2444_v52, %v8661_v31  ;;  %v8792_v34 = vadd.f32 %v3293_v46, %v3028_v1  ;;  %v7586_v1 = vld [vmem:[%s10338_s0 + $0x1c0] sm:$0xff] }
 0x371   :  { %2129 = vmatmul.bf16.gmra.mxu0 %v10620_v13  ;;  %2483 = vmatmul.bf16.gmra.mxu1 %v10621_v59 }
 0x372   :  { %2941 = vmatmul.bf16.gmra.mxu2 %v7696_v12 }
 0x373   :  { %3335 = vmatmul.bf16.gmra.mxu3 %v10608_v62  ;;  %v8808_v62 = vpack.c.bf16 %v8364_v63, %v7586_v1  ;;  %v10623_v63 = vld [vmem:[#allocation70_spill] sm:$0xff] }
 0x375   :  { %v2902_v36 = vpop.f32.mrf.mxu2 }
 0x376   :  { %v3296_v26 = vpop.f32.mrf.mxu3  ;;  %v3029_v11 = vadd.f32 %v2902_v36, %v2571_v32  ;;  %v2092_v51 = vpop.f32.mrf.mxu0 }
 0x377   :  { %v2446_v23 = vpop.f32.mrf.mxu1  ;;  %v8799_v27 = vadd.f32 %v2092_v51, %v8327_v55 }
 0x378   :  { %v2572_v31 = vadd.f32 %v2446_v23, %v8671_v47  ;;  %v8802_v3 = vadd.f32 %v3296_v26, %v3029_v11  ;;  %v7476_v26 = vld [vmem:[%s10337_s1 + $0x238] sm:$0xff] }
 0x379   :  { %3690 = vmatpush.bf16.msra.mxu0 %v7476_v26  ;;  %v10627_v26 = vld [vmem:[#allocation77_spill] sm:$0xff] }
 0x37d   :  { %v2904_v48 = vpop.f32.mrf.mxu2 }
 0x37e   :  { %v3298_v46 = vpop.f32.mrf.mxu3  ;;  %v3030_v33 = vadd.f32 %v2904_v48, %v2572_v31  ;;  %v2095_v52 = vpop.f32.mrf.mxu0  ;;  %v10624_v48 = vld [vmem:[#allocation75_spill] sm:$0xff] }
 0x37f   :  { %v2449_v32 = vpop.f32.mrf.mxu1  ;;  %v8811_v36 = vadd.f32 %v2095_v52, %v8353_v42 }
 0x380   :  { %v2573_v55 = vadd.f32 %v2449_v32, %v8677_v45  ;;  %v8814_v47 = vadd.f32 %v3298_v46, %v3030_v33  ;;  %v7475_v45 = vld [vmem:[%s10337_s1 + $0x230] sm:$0xff] }
 0x381   :  { %2134 = vmatmul.bf16.gmra.mxu0 %v8808_v62  ;;  %2488 = vmatmul.bf16.gmra.mxu1 %v10615_v16 }
 0x382   :  { %10622 = vst [vmem:[#allocation45_spill] sm:$0xff] %v8814_v47  ;;  %2946 = vmatmul.bf16.gmra.mxu2 %v10623_v63  ;;  %3691 = vmatpush.bf16.msra.mxu0 %v7475_v45 }
 0x383   :  { %3340 = vmatmul.bf16.gmra.mxu3 %v10610_v38  ;;  %v7474_v38 = vld [vmem:[%s10337_s1 + $0x228] sm:$0xff] }
 0x385   :  { %v2907_v11 = vpop.f32.mrf.mxu2 }
 0x386   :  { %v3301_v42 = vpop.f32.mrf.mxu3  ;;  %v3031_v51 = vadd.f32 %v2907_v11, %v2573_v55  ;;  %v2097_v23 = vpop.f32.mrf.mxu0  ;;  %3692 = vmatpush.bf16.msra.mxu0 %v7474_v38  ;;  %v7587_v55 = vld [vmem:[%s10338_s0 + $0x1d0] sm:$0xff]  ;;  %v7472_v38 = vld [vmem:[%s10337_s1 + $0x218] sm:$0xff] }
 0x387   :  { %v2451_v31 = vpop.f32.mrf.mxu1  ;;  %v8827_v46 = vadd.f32 %v2097_v23, %v10624_v48  ;;  %v8839_v63 = vpack.c.bf16 %v10627_v26, %v7587_v55  ;;  %v10630_v55 = vld [vmem:[#allocation3_spill] sm:$0xff] }
 0x388   :  { %v2574_v1 = vadd.f32 %v2451_v31, %v8687_v10  ;;  %v8830_v33 = vadd.f32 %v3301_v42, %v3031_v51  ;;  %v7473_v10 = vld [vmem:[%s10337_s1 + $0x220] sm:$0xff]  ;;  %v10628_v51 = vld [vmem:[#allocation76_spill] sm:$0xff] }
 0x389   :  { %10625 = vst [vmem:[#allocation50_spill] sm:$0xff] %v8827_v46 }
 0x38a   :  { %10626 = vst [vmem:[#allocation28_spill] sm:$0xff] %v8830_v33  ;;  %3693 = vmatpush.bf16.msra.mxu0 %v7473_v10  ;;  %v10635_v33 = vld [vmem:[#allocation82_spill] sm:$0xff] }
 0x38d   :  { %v2909_v52 = vpop.f32.mrf.mxu2 }
 0x38e   :  { %v3303_v32 = vpop.f32.mrf.mxu3  ;;  %v3032_v11 = vadd.f32 %v2909_v52, %v2574_v1  ;;  %v2100_v42 = vpop.f32.mrf.mxu0  ;;  %3694 = vmatpush.bf16.msra.mxu0 %v7472_v38 }
 0x38f   :  { %v2454_v45 = vpop.f32.mrf.mxu1  ;;  %v8845_v23 = vadd.f32 %v2100_v42, %v10628_v51 }
 0x390   :  { %v2575_v31 = vadd.f32 %v2454_v45, %v8693_v58  ;;  %v8848_v48 = vadd.f32 %v3303_v32, %v3032_v11  ;;  %v7471_v58 = vld [vmem:[%s10337_s1 + $0x210] sm:$0xff] }
 0x391   :  { %2139 = vmatmul.bf16.gmra.mxu0 %v8839_v63  ;;  %2493 = vmatmul.bf16.gmra.mxu1 %v10619_v28  ;;  %v10631_v11 = vld [vmem:[#allocation80_spill] sm:$0xff] }
 0x392   :  { %10629 = vst [vmem:[#allocation48_spill] sm:$0xff] %v8848_v48  ;;  %2951 = vmatmul.bf16.gmra.mxu2 %v10630_v55  ;;  %3695 = vmatpush.bf16.msra.mxu0 %v7471_v58  ;;  %v10634_v48 = vld [vmem:[#allocation78_spill] sm:$0xff] }
 0x393   :  { %3345 = vmatmul.bf16.gmra.mxu3 %v10614_v22  ;;  %v7470_v22 = vld [vmem:[%s10337_s1 + $0x208] sm:$0xff] }
 0x395   :  { %v2912_v1 = vpop.f32.mrf.mxu2 }
 0x396   :  { %v3306_v52 = vpop.f32.mrf.mxu3  ;;  %v3033_v32 = vadd.f32 %v2912_v1, %v2575_v31  ;;  %v2102_v26 = vpop.f32.mrf.mxu0  ;;  %3696 = vmatpush.bf16.msra.mxu0 %v7470_v22  ;;  %v8871_v31 = vpack.c.bf16 %v10635_v33, %v10634_v48  ;;  %v7469_v1 = vld [vmem:[%s10337_s1 + $0x200] sm:$0xff]  ;;  %v10638_v33 = vld [vmem:[#allocation4_spill] sm:$0xff] }
 0x397   :  { %v2456_v10 = vpop.f32.mrf.mxu1  ;;  %v8861_v42 = vadd.f32 %v2102_v26, %v10631_v11 }
 0x398   :  { %v2576_v45 = vadd.f32 %v2456_v10, %v8703_v14  ;;  %v8864_v51 = vadd.f32 %v3306_v52, %v3033_v32  ;;  %v10636_v52 = vld [vmem:[#allocation81_spill] sm:$0xff] }
 0x399   :  { %10632 = vst [vmem:[#allocation49_spill] sm:$0xff] %v8861_v42 }
 0x39a   :  { %10633 = vst [vmem:[#allocation54_spill] sm:$0xff] %v8864_v51  ;;  %3697 = vmatpush.bf16.msra.mxu0 %v7469_v1  ;;  %v8895_v1 = vld [vmem:[%s10338_s0 + $0x1f8] sm:$0xff] }
 0x39d   :  { %v2914_v38 = vpop.f32.mrf.mxu2 }
 0x39e   :  { %v3308_v46 = vpop.f32.mrf.mxu3  ;;  %v3034_v26 = vadd.f32 %v2914_v38, %v2576_v45  ;;  %v2105_v14 = vpop.f32.mrf.mxu0 }
 0x39f   :  { %v2459_v58 = vpop.f32.mrf.mxu1  ;;  %v8877_v32 = vadd.f32 %v2105_v14, %v10636_v52  ;;  %v10639_v14 = vld [vmem:[#allocation86_spill] sm:$0xff] }
 0x3a0   :  { %v2577_v10 = vadd.f32 %v2459_v58, %v8709_v54  ;;  %v8880_v11 = vadd.f32 %v3308_v46, %v3034_v26 }
 0x3a1   :  { %2144 = vmatmul.bf16.gmra.mxu0 %v8871_v31  ;;  %2498 = vmatmul.bf16.gmra.mxu1 %v7696_v12 }
 0x3a2   :  { %10637 = vst [vmem:[#allocation30_spill] sm:$0xff] %v8880_v11  ;;  %2956 = vmatmul.bf16.gmra.mxu2 %v10638_v33 }
 0x3a3   :  { %3350 = vmatmul.bf16.gmra.mxu3 %v10618_v6  ;;  %v10642_v6 = vld [vmem:[#allocation83_spill] sm:$0xff] }
 0x3a4   :  { %v8899_v11 = vpack.c.bf16 %v8895_v1, %v10642_v6 }
 0x3a5   :  { %v2917_v48 = vpop.f32.mrf.mxu2 }
 0x3a6   :  { %v3311_v45 = vpop.f32.mrf.mxu3  ;;  %v3035_v22 = vadd.f32 %v2917_v48, %v2577_v10  ;;  %v2107_v38 = vpop.f32.mrf.mxu0 }
 0x3a7   :  { %v2461_v42 = vpop.f32.mrf.mxu1  ;;  %v8887_v52 = vadd.f32 %v2107_v38, %v10639_v14 }
 0x3a8   :  { %v2578_v54 = vadd.f32 %v2461_v42, %v8719_v37  ;;  %v8890_v46 = vadd.f32 %v3311_v45, %v3035_v22  ;;  %v10644_v45 = vld [vmem:[#allocation72_spill] sm:$0xff]  ;;  %v10645_v22 = vld [vmem:[#allocation5_spill] sm:$0xff] }
 0x3a9   :  { %10640 = vst [vmem:[#allocation52_spill] sm:$0xff] %v8887_v52 }
 0x3aa   :  { %10641 = vst [vmem:[#allocation53_spill] sm:$0xff] %v8890_v46 }
 0x3ad   :  { %v2919_v26 = vpop.f32.mrf.mxu2 }
 0x3ae   :  { %v3313_v58 = vpop.f32.mrf.mxu3  ;;  %v3036_v10 = vadd.f32 %v2919_v26, %v2578_v54  ;;  %v2110_v48 = vpop.f32.mrf.mxu0 }
 0x3af   :  { %v2464_v51 = vpop.f32.mrf.mxu1  ;;  %v8902_v38 = vadd.f32 %v2110_v48, %v8485_v9 }
 0x3b0   :  { %v2579_v37 = vadd.f32 %v2464_v51, %v8725_v49  ;;  %v8905_v42 = vadd.f32 %v3313_v58, %v3036_v10 }
 0x3b1   :  { %2149 = vmatmul.bf16.gmra.mxu0 %v8899_v11  ;;  %2503 = vmatmul.bf16.gmra.mxu1 %v10644_v45 }
 0x3b2   :  { %10643 = vst [vmem:[#allocation58_spill] sm:$0xff] %v8905_v42  ;;  %2961 = vmatmul.bf16.gmra.mxu2 %v10645_v22 }
 0x3b3   :  { %3355 = vmatmul.bf16.gmra.mxu3 %v10620_v13 }
 0x3b5   :  { %v2922_v14 = vpop.f32.mrf.mxu2 }
 0x3b6   :  { %v3316_v6 = vpop.f32.mrf.mxu3  ;;  %v3037_v54 = vadd.f32 %v2922_v14, %v2579_v37  ;;  %v2112_v26 = vpop.f32.mrf.mxu0 }
 0x3b7   :  { %v2466_v52 = vpop.f32.mrf.mxu1  ;;  %v8912_v9 = vadd.f32 %v2112_v26, %v8490_v53  ;;  %v10647_v53 = vld [vmem:[#allocation73_spill] sm:$0xff] }
 0x3b8   :  { %v2580_v49 = vadd.f32 %v2466_v52, %v8735_v35  ;;  %v8915_v51 = vadd.f32 %v3316_v6, %v3037_v54 }
 0x3b9   :  { %10646 = vst [vmem:[#allocation34_spill] sm:$0xff] %v8912_v9  ;;  %v10665_v9 = vld [vmem:[#allocation29_spill] sm:$0xff] }
 0x3bd   :  { %v2924_v58 = vpop.f32.mrf.mxu2 }
 0x3be   :  { %v3318_v10 = vpop.f32.mrf.mxu3  ;;  %v3038_v48 = vadd.f32 %v2924_v58, %v2580_v49  ;;  %v2115_v42 = vpop.f32.mrf.mxu0 }
 0x3bf   :  { %v2469_v46 = vpop.f32.mrf.mxu1  ;;  %v8918_v47 = vadd.f32 %v2115_v42, %v8499_v17 }
 0x3c0   :  { %v2581_v13 = vadd.f32 %v2469_v46, %v8741_v8  ;;  %v8921_v37 = vadd.f32 %v3318_v10, %v3038_v48 }
 0x3c1   :  { %2508 = vmatmul.bf16.gmra.mxu1 %v10630_v55  ;;  %3698 = vmatmul.bf16.vlgmr.msra.gmra.mxu0 %v7900_v15 }
 0x3c2   :  { %2966 = vmatmul.bf16.gmra.mxu2 %v10647_v53 }
 0x3c3   :  { %3360 = vmatmul.bf16.gmra.mxu3 %v8808_v62 }
 0x3c5   :  { %v2927_v35 = vpop.f32.mrf.mxu2 }
 0x3c6   :  { %v3321_v52 = vpop.f32.mrf.mxu3  ;;  %v3039_v14 = vadd.f32 %v2927_v35, %v2581_v13  ;;  %v2117_v6 = vpop.f32.mrf.mxu0  ;;  %v10650_v13 = vld [vmem:[#allocation74_spill] sm:$0xff] }
 0x3c7   :  { %v2471_v54 = vpop.f32.mrf.mxu1  ;;  %v8928_v17 = vadd.f32 %v2117_v6, %v8504_v19  ;;  %v10649_v19 = vld [vmem:[#allocation12_spill] sm:$0xff]  ;;  %v10651_v6 = vld [vmem:[#allocation87_spill] sm:$0xff] }
 0x3c8   :  { %v2582_v8 = vadd.f32 %v2471_v54, %v8751_v41  ;;  %v8931_v46 = vadd.f32 %v3321_v52, %v3039_v14 }
 0x3c9   :  { %10648 = vst [vmem:[#allocation56_spill] sm:$0xff] %v8928_v17 }
 0x3cd   :  { %v2929_v42 = vpop.f32.mrf.mxu2 }
 0x3ce   :  { %v3323_v26 = vpop.f32.mrf.mxu3  ;;  %v3040_v49 = vadd.f32 %v2929_v42, %v2582_v8  ;;  %v2120_v15 = vpop.f32.mrf.mxu0 }
 0x3cf   :  { %v2474_v58 = vpop.f32.mrf.mxu1  ;;  %v8934_v10 = vadd.f32 %v2120_v15, %v8513_v39 }
 0x3d0   :  { %v2583_v62 = vadd.f32 %v2474_v58, %v8757_v29  ;;  %v8937_v48 = vadd.f32 %v3323_v26, %v3040_v49  ;;  %v10653_v58 = vld [vmem:[#allocation88_spill] sm:$0xff] }
 0x3d1   :  { %2513 = vmatmul.bf16.gmra.mxu1 %v10638_v33  ;;  %3703 = vmatmul.bf16.gmra.mxu0 %v10649_v19 }
 0x3d2   :  { %2971 = vmatmul.bf16.gmra.mxu2 %v10650_v13 }
 0x3d3   :  { %3365 = vmatmul.bf16.gmra.mxu3 %v8839_v63 }
 0x3d5   :  { %v2932_v41 = vpop.f32.mrf.mxu2 }
 0x3d6   :  { %v3326_v53 = vpop.f32.mrf.mxu3  ;;  %v3041_v35 = vadd.f32 %v2932_v41, %v2583_v62  ;;  %v2122_v52 = vpop.f32.mrf.mxu0  ;;  %v10654_v41 = vld [vmem:[#allocation17_spill] sm:$0xff] }
 0x3d7   :  { %v2476_v14 = vpop.f32.mrf.mxu1  ;;  %v8944_v39 = vadd.f32 %v2122_v52, %v10651_v6  ;;  %v10655_v52 = vld [vmem:[#allocation79_spill] sm:$0xff] }
 0x3d8   :  { %v2584_v29 = vadd.f32 %v2476_v14, %v8767_v18  ;;  %v8947_v54 = vadd.f32 %v3326_v53, %v3041_v35 }
 0x3d9   :  { %10652 = vst [vmem:[#allocation57_spill] sm:$0xff] %v8944_v39  ;;  %v10658_v39 = vld [vmem:[#allocation90_spill] sm:$0xff] }
 0x3dd   :  { %v2934_v8 = vpop.f32.mrf.mxu2 }
 0x3de   :  { %v3328_v42 = vpop.f32.mrf.mxu3  ;;  %v3042_v26 = vadd.f32 %v2934_v8, %v2584_v29  ;;  %v2125_v49 = vpop.f32.mrf.mxu0  ;;  %v10656_v29 = vld [vmem:[#allocation89_spill] sm:$0xff] }
 0x3df   :  { %v2479_v15 = vpop.f32.mrf.mxu1  ;;  %v8950_v19 = vadd.f32 %v2125_v49, %v10653_v58 }
 0x3e0   :  { %v2585_v63 = vadd.f32 %v2479_v15, %v8773_v40  ;;  %v8953_v62 = vadd.f32 %v3328_v42, %v3042_v26 }
 0x3e1   :  { %2518 = vmatmul.bf16.gmra.mxu1 %v10645_v22  ;;  %3708 = vmatmul.bf16.gmra.mxu0 %v10654_v41 }
 0x3e2   :  { %2976 = vmatmul.bf16.gmra.mxu2 %v10655_v52 }
 0x3e3   :  { %3370 = vmatmul.bf16.gmra.mxu3 %v8871_v31 }
 0x3e5   :  { %v2937_v18 = vpop.f32.mrf.mxu2 }
 0x3e6   :  { %v3331_v53 = vpop.f32.mrf.mxu3  ;;  %v3043_v35 = vadd.f32 %v2937_v18, %v2585_v63  ;;  %v2127_v14 = vpop.f32.mrf.mxu0  ;;  %v10660_v18 = vld [vmem:[#allocation84_spill] sm:$0xff] }
 0x3e7   :  { %v2481_v6 = vpop.f32.mrf.mxu1  ;;  %v8960_v8 = vadd.f32 %v2127_v14, %v10656_v29  ;;  %v10661_v14 = vld [vmem:[#allocation26_spill] sm:$0xff]  ;;  %v10662_v29 = vld [vmem:[#allocation85_spill] sm:$0xff] }
 0x3e8   :  { %v2586_v40 = vadd.f32 %v2481_v6, %v8783_v5  ;;  %v8963_v42 = vadd.f32 %v3331_v53, %v3043_v35 }
 0x3e9   :  { %10657 = vst [vmem:[#allocation62_spill] sm:$0xff] %v8960_v8 }
 0x3ed   :  { %v2939_v26 = vpop.f32.mrf.mxu2 }
 0x3ee   :  { %v3333_v49 = vpop.f32.mrf.mxu3  ;;  %v3044_v15 = vadd.f32 %v2939_v26, %v2586_v40  ;;  %v2130_v58 = vpop.f32.mrf.mxu0  ;;  %v10663_v26 = vld [vmem:[#allocation20_spill] sm:$0xff] }
 0x3ef   :  { %v2484_v41 = vpop.f32.mrf.mxu1  ;;  %v8966_v17 = vadd.f32 %v2130_v58, %v10658_v39 }
 0x3f0   :  { %v2587_v31 = vadd.f32 %v2484_v41, %v8789_v43  ;;  %v8969_v63 = vadd.f32 %v3333_v49, %v3044_v15 }
 0x3f1   :  { %2523 = vmatmul.bf16.gmra.mxu1 %v10660_v18  ;;  %3713 = vmatmul.bf16.gmra.mxu0 %v10661_v14 }
 0x3f2   :  { %10659 = vst [vmem:[#allocation39_spill] sm:$0xff] %v8969_v63  ;;  %2981 = vmatmul.bf16.gmra.mxu2 %v10662_v29 }
 0x3f3   :  { %3375 = vmatmul.bf16.gmra.mxu3 %v8899_v11 }
 0x3f5   :  { %v2942_v5 = vpop.f32.mrf.mxu2 }
 0x3f6   :  { %v3336_v53 = vpop.f32.mrf.mxu3  ;;  %v3045_v35 = vadd.f32 %v2942_v5, %v2587_v31  ;;  %v2132_v6 = vpop.f32.mrf.mxu0  ;;  %v10666_v5 = vmov 0.0|0.0  }
 0x3f7   :  { %v2486_v40 = vpop.f32.mrf.mxu1  ;;  %v8976_v39 = vadd.f32 %v2132_v6, %v10663_v26 }
 0x3f8   :  { %v2588_v43 = vadd.f32 %v2486_v40, %v8799_v27  ;;  %v8979_v49 = vadd.f32 %v3336_v53, %v3045_v35 }
 0x3f9   :  { %10664 = vst [vmem:[#allocation60_spill] sm:$0xff] %v8976_v39 }
 0x3fd   :  { %v2944_v15 = vpop.f32.mrf.mxu2 }
 0x3fe   :  { %v3338_v58 = vpop.f32.mrf.mxu3  ;;  %v3046_v41 = vadd.f32 %v2944_v15, %v2588_v43  ;;  %v2135_v14 = vpop.f32.mrf.mxu0 }
 0x3ff   :  { %v2489_v8 = vpop.f32.mrf.mxu1  ;;  %v8982_v63 = vadd.f32 %v2135_v14, %v10665_v9  ;;  %v10667_v9 = vld [vmem:[#allocation33_spill] sm:$0xff] }
 0x400   :  { %v2589_v11 = vadd.f32 %v2489_v8, %v8811_v36  ;;  %v8985_v31 = vadd.f32 %v3338_v58, %v3046_v41  ;;  %v10672_v58 = vld [vmem:[#allocation23_spill] sm:$0xff] }
 0x401   :  { %2528 = vmatmul.bf16.gmra.mxu1 %v10650_v13  ;;  %3718 = vmatmul.bf16.gmra.mxu0 %v10548_v4 }
 0x402   :  { %2986 = vmatmul.bf16.gmra.mxu2 %v10666_v5 }
 0x403   :  { %3380 = vmatmul.bf16.gmra.mxu3 %v10666_v5 }
 0x405   :  { %v2947_v27 = vpop.f32.mrf.mxu2 }
 0x406   :  { %v3341_v53 = vpop.f32.mrf.mxu3  ;;  %v3047_v35 = vadd.f32 %v2947_v27, %v2589_v11  ;;  %v2137_v6 = vpop.f32.mrf.mxu0  ;;  %v10673_v11 = vld [vmem:[#allocation25_spill] sm:$0xff] }
 0x407   :  { %v8991_v40 = vpop.f32.mrf.mxu1  ;;  %v8994_v26 = vadd.f32 %v2137_v6, %v10667_v9 }
 0x408   :  { %v8996_v36 = vadd.f32 %v3341_v53, %v3047_v35 }
 0x409   :  { %10668 = vst [vmem:[#allocation61_spill] sm:$0xff] %v8994_v26  ;;  %v10675_v26 = vld [vmem:[#allocation13_spill] sm:$0xff] }
 0x40a   :  { %10669 = vst [vmem:[#allocation66_spill] sm:$0xff] %v8996_v36 }
 0x40d   :  { %v8998_v8 = vpop.f32.mrf.mxu2 }
 0x40e   :  { %10670 = vst [vmem:[#allocation43_spill] sm:$0xff] %v8998_v8  ;;  %v9000_v43 = vpop.f32.mrf.mxu3  ;;  %v2140_v4 = vpop.f32.mrf.mxu0 }
 0x40f   :  { %10671 = vst [vmem:[#allocation64_spill] sm:$0xff] %v9000_v43  ;;  %v2494_v15 = vpop.f32.mrf.mxu1  ;;  %v9003_v41 = vadd.f32 %v2140_v4, %v10672_v58  ;;  %v10680_v43 = vld [vmem:[#allocation31_spill] sm:$0xff] }
 0x410   :  { %v2591_v14 = vadd.f32 %v2494_v15, %v8845_v23 }
 0x411   :  { %2533 = vmatmul.bf16.gmra.mxu1 %v10655_v52  ;;  %3723 = vmatmul.bf16.gmra.mxu0 %v10673_v11 }
 0x412   :  { %2991 = vmatmul.bf16.gmra.mxu2 %v10666_v5 }
 0x413   :  { %3385 = vmatmul.bf16.gmra.mxu3 %v10666_v5 }
 0x415   :  { %v2952_v27 = vpop.f32.mrf.mxu2 }
 0x416   :  { %v3346_v53 = vpop.f32.mrf.mxu3  ;;  %v3049_v35 = vadd.f32 %v2952_v27, %v2591_v14  ;;  %v2142_v6 = vpop.f32.mrf.mxu0  ;;  %v10681_v14 = vld [vmem:[#allocation27_spill] sm:$0xff] }
 0x417   :  { %v9010_v9 = vpop.f32.mrf.mxu1  ;;  %v9013_v39 = vadd.f32 %v2142_v6, %v10675_v26 }
 0x418   :  { %10674 = vst [vmem:[#allocation65_spill] sm:$0xff] %v9010_v9  ;;  %v9015_v4 = vadd.f32 %v3346_v53, %v3049_v35 }
 0x419   :  { %10676 = vst [vmem:[#allocation47_spill] sm:$0xff] %v9013_v39  ;;  %v10683_v39 = vld [vmem:[#allocation15_spill] sm:$0xff] }
 0x41a   :  { %10677 = vst [vmem:[#allocation68_spill] sm:$0xff] %v9015_v4 }
 0x41d   :  { %v9017_v23 = vpop.f32.mrf.mxu2 }
 0x41e   :  { %10678 = vst [vmem:[#allocation6_spill] sm:$0xff] %v9017_v23  ;;  %v9019_v15 = vpop.f32.mrf.mxu3  ;;  %v2145_v58 = vpop.f32.mrf.mxu0  ;;  %v10688_v23 = vld [vmem:[#allocation32_spill] sm:$0xff] }
 0x41f   :  { %10679 = vst [vmem:[#allocation51_spill] sm:$0xff] %v9019_v15  ;;  %v2499_v11 = vpop.f32.mrf.mxu1  ;;  %v9022_v36 = vadd.f32 %v2145_v58, %v10680_v43 }
 0x420   :  { %v2593_v8 = vadd.f32 %v2499_v11, %v8877_v32  ;;  %v10443_v11 = vpack.c.bf16 0.0, %v8895_v1 }
 0x421   :  { %2538 = vmatmul.bf16.gmra.mxu1 %v10662_v29  ;;  %3728 = vmatmul.bf16.gmra.mxu0 %v10681_v14 }
 0x422   :  { %2996 = vmatmul.bf16.gmra.mxu2 %v10666_v5 }
 0x423   :  { %3390 = vmatmul.bf16.gmra.mxu3 %v10666_v5 }
 0x425   :  { %v2957_v26 = vpop.f32.mrf.mxu2 }
 0x426   :  { %v3351_v27 = vpop.f32.mrf.mxu3  ;;  %v3051_v53 = vadd.f32 %v2957_v26, %v2593_v8  ;;  %v2147_v35 = vpop.f32.mrf.mxu0 }
 0x427   :  { %v9029_v6 = vpop.f32.mrf.mxu1  ;;  %v9032_v15 = vadd.f32 %v2147_v35, %v10683_v39  ;;  %v10689_v39 = vld [vmem:[#allocation38_spill] sm:$0xff] }
 0x428   :  { %10682 = vst [vmem:[#allocation9_spill] sm:$0xff] %v9029_v6  ;;  %v9034_v43 = vadd.f32 %v3351_v27, %v3051_v53 }
 0x429   :  { %10684 = vst [vmem:[#allocation55_spill] sm:$0xff] %v9032_v15 }
 0x42a   :  { %10685 = vst [vmem:[#allocation7_spill] sm:$0xff] %v9034_v43 }
 0x42d   :  { %v9036_v32 = vpop.f32.mrf.mxu2 }
 0x42e   :  { %10686 = vst [vmem:[#allocation59_spill] sm:$0xff] %v9036_v32  ;;  %v9038_v58 = vpop.f32.mrf.mxu3  ;;  %v2150_v14 = vpop.f32.mrf.mxu0  ;;  %v10696_v32 = vld [vmem:[#allocation24_spill] sm:$0xff] }
 0x42f   :  { %10687 = vst [vmem:[#allocation10_spill] sm:$0xff] %v9038_v58  ;;  %v2504_v4 = vpop.f32.mrf.mxu1  ;;  %v9042_v9 = vadd.f32 %v2150_v14, %v10688_v23  ;;  %v10691_v58 = vld [vmem:[#allocation37_spill] sm:$0xff] }
 0x430   :  { %v2595_v8 = vadd.f32 %v2504_v4, %v8902_v38 }
 0x431   :  { %2543 = vmatmul.bf16.gmra.mxu1 %v10443_v11  ;;  %3733 = vmatmul.bf16.gmra.mxu0 %v10689_v39 }
 0x432   :  { %3001 = vmatmul.bf16.gmra.mxu2 %v10666_v5 }
 0x433   :  { %3395 = vmatmul.bf16.gmra.mxu3 %v10666_v5 }
 0x435   :  { %v2962_v26 = vpop.f32.mrf.mxu2 }
 0x436   :  { %v3356_v27 = vpop.f32.mrf.mxu3  ;;  %v3053_v53 = vadd.f32 %v2962_v26, %v2595_v8  ;;  %v2152_v35 = vpop.f32.mrf.mxu0  ;;  %v9066_v8 = vld [vmem:[%s10339_s2] ss:$0 sm:$0xff] }
 0x437   :  { %v9050_v15 = vpop.f32.mrf.mxu1  ;;  %v9053_v23 = vadd.f32 %v2152_v35, %v10691_v58  ;;  %v9073_v26 = vld [vmem:[%s10340_s3] ss:$0 sm:$0xff] }
 0x438   :  { %10690 = vst [vmem:[#allocation63_spill] sm:$0xff] %v9050_v15  ;;  %v9055_v14 = vadd.f32 %v3356_v27, %v3053_v53 }
 0x439   :  { %10692 = vst [vmem:[#allocation71_spill] sm:$0xff] %v9053_v23 }
 0x43a   :  { %10693 = vst [vmem:[#allocation8_spill] sm:$0xff] %v9055_v14  ;;  %v7479_v14 = vld [vmem:[%s10341_s4 + $0x10] sm:$0xff] }
 0x43d   :  { %v9057_v38 = vpop.f32.mrf.mxu2 }
 0x43e   :  { %10694 = vst [vmem:[#allocation67_spill] sm:$0xff] %v9057_v38  ;;  %v9059_v4 = vpop.f32.mrf.mxu3  ;;  %v3699_v11 = vpop.f32.mrf.mxu0 }
 0x43f   :  { %10695 = vst [vmem:[#allocation11_spill] sm:$0xff] %v9059_v4  ;;  %v2509_v39 = vpop.f32.mrf.mxu1  ;;  %v3859_v6 = vadd.f32 %v3699_v11, %v10696_v32 }
 0x440   :  { %v2597_v43 = vadd.f32 %v2509_v39, %v8918_v47  ;;  %v7480_v47 = vld [vmem:[%s10341_s4 + $0x18] sm:$0xff] }
 0x441   :  { %3738 = vmatmul.bf16.gmra.mxu0 %v10579_v60  ;;  %v3927_v58 = vmul.f32 %v9066_v8, %v3859_v6  ;;  %v10698_v39 = vld [vmem:[#allocation18_spill] sm:$0xff]  ;;  %4438 = vmatpush.bf16.msrb.mxu2 %v7480_v47 }
 0x443   :  { %v3995_v6 = vadd.f32 %v9073_v26, %v3927_v58 }
 0x445   :  { %v2967_v27 = vpop.f32.mrf.mxu2  ;;  %4439 = vmatpush.bf16.msrb.mxu2 %v7479_v14  ;;  %v7477_v14 = vld [vmem:[%s10341_s4] sm:$0xff] }
 0x446   :  { %v3361_v53 = vpop.f32.mrf.mxu3  ;;  %v3055_v32 = vadd.f32 %v2967_v27, %v2597_v43  ;;  %v3701_v35 = vpop.f32.mrf.mxu0  ;;  %v4059_v43 = vmax.f32 %v3995_v6, 0.0 }
 0x447   :  { %v9078_v11 = vpop.f32.mrf.mxu1  ;;  %v3860_v23 = vadd.f32 %v3701_v35, %v10698_v39  ;;  %v10701_v35 = vld [vmem:[#allocation35_spill] sm:$0xff] }
 0x448   :  { %10697 = vst [vmem:[#allocation69_spill] sm:$0xff] %v9078_v11  ;;  %v9081_v60 = vadd.f32 %v3361_v53, %v3055_v32  ;;  %v7478_v53 = vld [vmem:[%s10341_s4 + $0x8] sm:$0xff] }
 0x449   :  { %v3928_v4 = vmul.f32 %v9066_v8, %v3860_v23  ;;  %4440 = vmatpush.bf16.msrb.mxu2 %v7478_v53 }
 0x44b   :  { %v3996_v38 = vadd.f32 %v9073_v26, %v3928_v4 }
 0x44d   :  { %v4060_v27 = vmax.f32 %v3996_v38, 0.0  ;;  %v9089_v11 = vpop.f32.mrf.mxu2  ;;  %4441 = vmatpush.bf16.msrb.mxu2 %v7477_v14  ;;  %v7483_v14 = vld [vmem:[%s10341_s4 + $0x30] sm:$0xff] }
 0x44e   :  { %10699 = vst [vmem:[#allocation70_spill] sm:$0xff] %v9089_v11  ;;  %v9091_v15 = vpop.f32.mrf.mxu3  ;;  %v3704_v47 = vpop.f32.mrf.mxu0 }
 0x44f   :  { %10700 = vst [vmem:[#allocation75_spill] sm:$0xff] %v9091_v15  ;;  %v2514_v58 = vpop.f32.mrf.mxu1  ;;  %v9096_v23 = vmax.f32 %v4059_v43, %v4060_v27  ;;  %v3861_v39 = vadd.f32 %v3704_v47, %v10701_v35  ;;  %v7484_v43 = vld [vmem:[%s10341_s4 + $0x38] sm:$0xff] }
 0x450   :  { %v2599_v32 = vadd.f32 %v2514_v58, %v8934_v10  ;;  %4442 = vmatmul.bf16.vlgmr.msrb.gmra.mxu2 %v10666_v5  ;;  %4341 = vmatpush.bf16.msrb.mxu1 %v7484_v43 }
 0x451   :  { %3743 = vmatmul.bf16.gmra.mxu0 %v10585_v56  ;;  %v3929_v38 = vmul.f32 %v9066_v8, %v3861_v39  ;;  %v10703_v56 = vld [vmem:[#allocation21_spill] sm:$0xff] }
 0x453   :  { %v3997_v35 = vadd.f32 %v9073_v26, %v3929_v38 }
 0x454   :  { %4342 = vmatpush.bf16.msrb.mxu1 %v7483_v14 }
 0x455   :  { %v2972_v4 = vpop.f32.mrf.mxu2 }
 0x456   :  { %v3366_v6 = vpop.f32.mrf.mxu3  ;;  %v3057_v27 = vadd.f32 %v2972_v4, %v2599_v32  ;;  %v3706_v58 = vpop.f32.mrf.mxu0  ;;  %v4061_v4 = vmax.f32 %v3997_v35, 0.0  ;;  %v7481_v35 = vld [vmem:[%s10341_s4 + $0x20] sm:$0xff] }
 0x457   :  { %v9108_v10 = vpop.f32.mrf.mxu1  ;;  %v3862_v53 = vadd.f32 %v3706_v58, %v10703_v56  ;;  %v10706_v56 = vld [vmem:[#allocation36_spill] sm:$0xff] }
 0x458   :  { %10702 = vst [vmem:[#allocation77_spill] sm:$0xff] %v9108_v10  ;;  %v9112_v47 = vadd.f32 %v3366_v6, %v3057_v27  ;;  %v7482_v6 = vld [vmem:[%s10341_s4 + $0x28] sm:$0xff] }
 0x459   :  { %v3930_v39 = vmul.f32 %v9066_v8, %v3862_v53  ;;  %4343 = vmatpush.bf16.msrb.mxu1 %v7482_v6 }
 0x45b   :  { %v3998_v32 = vadd.f32 %v9073_v26, %v3930_v39 }
 0x45d   :  { %v4062_v10 = vmax.f32 %v3998_v32, 0.0  ;;  %v9120_v15 = vpop.f32.mrf.mxu2  ;;  %4344 = vmatpush.bf16.msrb.mxu1 %v7481_v35 }
 0x45e   :  { %10704 = vst [vmem:[#allocation76_spill] sm:$0xff] %v9120_v15  ;;  %v9122_v11 = vpop.f32.mrf.mxu3  ;;  %v3709_v43 = vpop.f32.mrf.mxu0 }
 0x45f   :  { %10705 = vst [vmem:[#allocation3_spill] sm:$0xff] %v9122_v11  ;;  %v2519_v38 = vpop.f32.mrf.mxu1  ;;  %v9127_v27 = vmax.f32 %v4061_v4, %v4062_v10  ;;  %v3863_v53 = vadd.f32 %v3709_v43, %v10706_v56  ;;  %v7488_v10 = vld [vmem:[%s10341_s4 + $0x58] sm:$0xff] }
 0x460   :  { %v2601_v58 = vadd.f32 %v2519_v38, %v8950_v19  ;;  %4345 = vmatmul.bf16.vlgmr.msrb.gmra.mxu1 %v10666_v5  ;;  %4447 = vmatmul.bf16.gmra.mxu2 %v10666_v5 }
 0x461   :  { %3748 = vmatmul.bf16.gmra.mxu0 %v10592_v7  ;;  %v3931_v39 = vmul.f32 %v9066_v8, %v3863_v53  ;;  %v10708_v7 = vld [vmem:[#allocation42_spill] sm:$0xff]  ;;  %4584 = vmatpush.bf16.msrb.mxu3 %v7488_v10 }
 0x463   :  { %v3999_v56 = vadd.f32 %v9073_v26, %v3931_v39 }
 0x465   :  { %v2977_v14 = vpop.f32.mrf.mxu2 }
 0x466   :  { %v3371_v32 = vpop.f32.mrf.mxu3  ;;  %v3059_v4 = vadd.f32 %v2977_v14, %v2601_v58  ;;  %v3711_v38 = vpop.f32.mrf.mxu0  ;;  %v7487_v58 = vld [vmem:[%s10341_s4 + $0x50] sm:$0xff]  ;;  %v4063_v14 = vmax.f32 %v3999_v56, 0.0  ;;  %v7485_v56 = vld [vmem:[%s10341_s4 + $0x40] sm:$0xff] }
 0x467   :  { %v9139_v19 = vpop.f32.mrf.mxu1  ;;  %v3864_v6 = vadd.f32 %v3711_v38, %v10708_v7  ;;  %4585 = vmatpush.bf16.msrb.mxu3 %v7487_v58  ;;  %v10712_v7 = vld [vmem:[#allocation14_spill] sm:$0xff] }
 0x468   :  { %10707 = vst [vmem:[#allocation80_spill] sm:$0xff] %v9139_v19  ;;  %v9144_v43 = vadd.f32 %v3371_v32, %v3059_v4  ;;  %v7486_v32 = vld [vmem:[%s10341_s4 + $0x48] sm:$0xff] }
 0x469   :  { %v3932_v53 = vmul.f32 %v9066_v8, %v3864_v6 }
 0x46a   :  { %10709 = vst [vmem:[#allocation78_spill] sm:$0xff] %v9144_v43 }
 0x46b   :  { %v4000_v35 = vadd.f32 %v9073_v26, %v3932_v53  ;;  %4586 = vmatpush.bf16.msrb.mxu3 %v7486_v32 }
 0x46d   :  { %v4064_v19 = vmax.f32 %v4000_v35, 0.0  ;;  %v9152_v11 = vpop.f32.mrf.mxu2 }
 0x46e   :  { %10710 = vst [vmem:[#allocation82_spill] sm:$0xff] %v9152_v11  ;;  %v9154_v15 = vpop.f32.mrf.mxu3  ;;  %v3714_v10 = vpop.f32.mrf.mxu0 }
 0x46f   :  { %10711 = vst [vmem:[#allocation81_spill] sm:$0xff] %v9154_v15  ;;  %v2524_v39 = vpop.f32.mrf.mxu1  ;;  %v9159_v4 = vmax.f32 %v4063_v14, %v4064_v19  ;;  %v3865_v6 = vadd.f32 %v3714_v10, %v10712_v7  ;;  %4587 = vmatpush.bf16.msrb.mxu3 %v7485_v56 }
 0x470   :  { %v2603_v38 = vadd.f32 %v2524_v39, %v8966_v17  ;;  %4350 = vmatmul.bf16.gmra.mxu1 %v10666_v5  ;;  %v10714_v17 = vld [vmem:[#allocation40_spill] sm:$0xff] }
 0x471   :  { %3753 = vmatmul.bf16.gmra.mxu0 %v10609_v30  ;;  %v3933_v53 = vmul.f32 %v9066_v8, %v3865_v6 }
 0x472   :  { %4588 = vmatmul.bf16.vlgmr.msrb.gmra.mxu3 %v10666_v5 }
 0x473   :  { %v4001_v32 = vadd.f32 %v9073_v26, %v3933_v53 }
 0x475   :  { %v2982_v58 = vpop.f32.mrf.mxu2  ;;  %v4065_v7 = vmax.f32 %v4001_v32, 0.0 }
 0x476   :  { %v3376_v35 = vpop.f32.mrf.mxu3  ;;  %v3061_v15 = vadd.f32 %v2982_v58, %v2603_v38  ;;  %v3716_v19 = vpop.f32.mrf.mxu0 }
 0x477   :  { %v9168_v11 = vpop.f32.mrf.mxu1  ;;  %v3866_v14 = vadd.f32 %v3716_v19, %v10714_v17 }
 0x478   :  { %10713 = vst [vmem:[#allocation4_spill] sm:$0xff] %v9168_v11  ;;  %v9173_v30 = vadd.f32 %v3376_v35, %v3061_v15 }
 0x479   :  { %v3934_v39 = vmul.f32 %v9066_v8, %v3866_v14 }
 0x47b   :  { %v4002_v10 = vadd.f32 %v9073_v26, %v3934_v39 }
 0x47d   :  { %v4066_v6 = vmax.f32 %v4002_v10, 0.0  ;;  %v9178_v38 = vpop.f32.mrf.mxu2  ;;  %v10718_v10 = vld [vmem:[#allocation16_spill] sm:$0xff] }
 0x47e   :  { %10715 = vst [vmem:[#allocation86_spill] sm:$0xff] %v9178_v38  ;;  %v9180_v56 = vpop.f32.mrf.mxu3  ;;  %v3719_v11 = vpop.f32.mrf.mxu0 }
 0x47f   :  { %10716 = vst [vmem:[#allocation83_spill] sm:$0xff] %v9180_v56  ;;  %v2529_v58 = vpop.f32.mrf.mxu1  ;;  %v9182_v43 = vmax.f32 %v4065_v7, %v4066_v6  ;;  %v3867_v15 = vadd.f32 %v3719_v11, %v8690_v0 }
 0x480   :  { %v2605_v19 = vadd.f32 %v2529_v58, %v8982_v63 }
 0x481   :  { %3758 = vmatmul.bf16.gmra.mxu0 %v10602_v50  ;;  %v3935_v53 = vmul.f32 %v9066_v8, %v3867_v15 }
 0x482   :  { %4593 = vmatmul.bf16.gmra.mxu3 %v10666_v5 }
 0x483   :  { %v4003_v63 = vadd.f32 %v9073_v26, %v3935_v53 }
 0x485   :  { %v2987_v35 = vpop.f32.mrf.mxu2  ;;  %v4067_v11 = vmax.f32 %v4003_v63, 0.0 }
 0x486   :  { %v3381_v17 = vpop.f32.mrf.mxu3  ;;  %v3063_v14 = vadd.f32 %v2987_v35, %v2605_v19  ;;  %v3721_v39 = vpop.f32.mrf.mxu0 }
 0x487   :  { %v9188_v32 = vpop.f32.mrf.mxu1  ;;  %v3868_v56 = vadd.f32 %v3721_v39, %v10718_v10 }
 0x488   :  { %10717 = vst [vmem:[#allocation72_spill] sm:$0xff] %v9188_v32  ;;  %v9192_v7 = vadd.f32 %v3381_v17, %v3063_v14 }
 0x489   :  { %v3936_v0 = vmul.f32 %v9066_v8, %v3868_v56  ;;  %v10721_v56 = vmov 0.0  }
 0x48a   :  { %10719 = vst [vmem:[#allocation5_spill] sm:$0xff] %v9192_v7 }
 0x48b   :  { %v4004_v50 = vadd.f32 %v9073_v26, %v3936_v0 }
 0x48d   :  { %v4068_v6 = vmax.f32 %v4004_v50, 0.0  ;;  %v9197_v58 = vpop.f32.mrf.mxu2 }
 0x48e   :  { %v9199_v19 = vpop.f32.mrf.mxu3  ;;  %v3724_v35 = vpop.f32.mrf.mxu0 }
 0x48f   :  { %10720 = vst [vmem:[#allocation73_spill] sm:$0xff] %v9199_v19  ;;  %v2534_v15 = vpop.f32.mrf.mxu1  ;;  %v4139_v32 = vmax.f32 %v4067_v11, %v4068_v6  ;;  %v3869_v17 = vadd.f32 %v3724_v35, %v8706_v20  ;;  %v10723_v20 = vld [vmem:[#allocation41_spill] sm:$0xff] }
 0x490   :  { %v2607_v38 = vadd.f32 %v2534_v15, %v9003_v41 }
 0x491   :  { %3763 = vmatmul.bf16.gmra.mxu0 %v10606_v2  ;;  %v4155_v53 = vmax.f32 %v9096_v23, %v4139_v32  ;;  %v3937_v39 = vmul.f32 %v9066_v8, %v3869_v17 }
 0x493   :  { %v9206_v14 = vpack.c.bf16 %v4155_v53, %v10721_v56  ;;  %v4005_v23 = vadd.f32 %v9073_v26, %v3937_v39 }
 0x495   :  { %v2992_v10 = vpop.f32.mrf.mxu2  ;;  %7022 = vmatmul.msk.bf16.gmra.mxu2 %vm4312_vm0, %v9206_v14  ;;  %v4069_v15 = vmax.f32 %v4005_v23, 0.0 }
 0x496   :  { %v3386_v63 = vpop.f32.mrf.mxu3  ;;  %v3065_v0 = vadd.f32 %v2992_v10, %v2607_v38  ;;  %v3726_v41 = vpop.f32.mrf.mxu0 }
 0x497   :  { %v9211_v50 = vpop.f32.mrf.mxu1  ;;  %v3870_v11 = vadd.f32 %v3726_v41, %v10723_v20 }
 0x498   :  { %10722 = vst [vmem:[#allocation12_spill] sm:$0xff] %v9211_v50  ;;  %v9214_v2 = vadd.f32 %v3386_v63, %v3065_v0 }
 0x499   :  { %v3938_v32 = vmul.f32 %v9066_v8, %v3870_v11 }
 0x49b   :  { %v4006_v6 = vadd.f32 %v9073_v26, %v3938_v32 }
 0x49d   :  { %v4070_v35 = vmax.f32 %v4006_v6, 0.0  ;;  %v9219_v17 = vpop.f32.mrf.mxu2 }
 0x49e   :  { %v9221_v19 = vpop.f32.mrf.mxu3  ;;  %v3729_v10 = vpop.f32.mrf.mxu0 }
 0x49f   :  { %v2539_v38 = vpop.f32.mrf.mxu1  ;;  %v4140_v50 = vmax.f32 %v4069_v15, %v4070_v35  ;;  %v3871_v63 = vadd.f32 %v3729_v10, %v8722_v21 }
 0x4a0   :  { %v2609_v7 = vadd.f32 %v2539_v38, %v9022_v36  ;;  %v10725_v36 = vld [vmem:[#allocation46_spill] sm:$0xff] }
 0x4a1   :  { %3768 = vmatmul.bf16.gmra.mxu0 %v8173_v24  ;;  %v4156_v39 = vmax.f32 %v9127_v27, %v4140_v50  ;;  %v3939_v41 = vmul.f32 %v9066_v8, %v3871_v63 }
 0x4a3   :  { %v9227_v0 = vpack.c.bf16 %v4156_v39, %v4155_v53  ;;  %v4007_v24 = vadd.f32 %v9073_v26, %v3939_v41 }
 0x4a5   :  { %v2997_v20 = vpop.f32.mrf.mxu2  ;;  %7000 = vmatmul.msk.bf16.gmra.mxu1 %vm4312_vm0, %v9227_v0  ;;  %v4071_v50 = vmax.f32 %v4007_v24, 0.0 }
 0x4a6   :  { %v3391_v11 = vpop.f32.mrf.mxu3  ;;  %v3067_v23 = vadd.f32 %v2997_v20, %v2609_v7  ;;  %v3731_v6 = vpop.f32.mrf.mxu0 }
 0x4a7   :  { %v9232_v32 = vpop.f32.mrf.mxu1  ;;  %v3872_v15 = vadd.f32 %v3731_v6, %v10725_v36 }
 0x4a8   :  { %10724 = vst [vmem:[#allocation74_spill] sm:$0xff] %v9232_v32  ;;  %v9235_v21 = vadd.f32 %v3391_v11, %v3067_v23 }
 0x4a9   :  { %v3940_v27 = vmul.f32 %v9066_v8, %v3872_v15 }
 0x4ab   :  { %v4008_v53 = vadd.f32 %v9073_v26, %v3940_v27 }
 0x4ad   :  { %v4072_v35 = vmax.f32 %v4008_v53, 0.0  ;;  %v9240_v38 = vpop.f32.mrf.mxu2 }
 0x4ae   :  { %v9242_v10 = vpop.f32.mrf.mxu3  ;;  %v3734_v63 = vpop.f32.mrf.mxu0 }
 0x4af   :  { %v2544_v7 = vpop.f32.mrf.mxu1  ;;  %v4141_v20 = vmax.f32 %v4071_v50, %v4072_v35  ;;  %v3873_v11 = vadd.f32 %v3734_v63, %v8738_v61  ;;  %v10726_v63 = vld [vmem:[#allocation19_spill] sm:$0xff] }
 0x4b0   :  { %v2611_v32 = vadd.f32 %v2544_v7, %v9042_v9 }
 0x4b1   :  { %3773 = vmatmul.bf16.gmra.mxu0 %v10621_v59  ;;  %v4157_v41 = vmax.f32 %v9159_v4, %v4141_v20  ;;  %v3941_v6 = vmul.f32 %v9066_v8, %v3873_v11 }
 0x4b3   :  { %v9248_v23 = vpack.c.bf16 %v4157_v41, %v4156_v39  ;;  %v4009_v59 = vadd.f32 %v9073_v26, %v3941_v6 }
 0x4b5   :  { %v3002_v36 = vpop.f32.mrf.mxu2  ;;  %7023 = vmatmul.msk.bf16.gmra.mxu2 %vm4312_vm0, %v9248_v23  ;;  %7052 = vmatmul.msk.bf16.gmra.mxu3 %vm4312_vm0, %v9248_v23  ;;  %v4073_v53 = vmax.f32 %v4009_v59, 0.0 }
 0x4b6   :  { %v3396_v15 = vpop.f32.mrf.mxu3  ;;  %v3069_v24 = vadd.f32 %v3002_v36, %v2611_v32  ;;  %v3736_v9 = vpop.f32.mrf.mxu0 }
 0x4b7   :  { %v3874_v61 = vadd.f32 %v3736_v9, %v8744_v57 }
 0x4b8   :  { %v9256_v27 = vadd.f32 %v3396_v15, %v3069_v24  ;;  %v10727_v15 = vld [vmem:[#allocation44_spill] sm:$0xff] }
 0x4b9   :  { %v3942_v4 = vmul.f32 %v9066_v8, %v3874_v61 }
 0x4bb   :  { %v4010_v39 = vadd.f32 %v9073_v26, %v3942_v4 }
 0x4bd   :  { %v4074_v50 = vmax.f32 %v4010_v39, 0.0 }
 0x4be   :  { %v3739_v35 = vpop.f32.mrf.mxu0 }
 0x4bf   :  { %v4142_v7 = vmax.f32 %v4073_v53, %v4074_v50  ;;  %v3875_v20 = vadd.f32 %v3739_v35, %v10726_v63  ;;  %v10728_v35 = vld [vmem:[#allocation22_spill] sm:$0xff]  ;;  %v9286_v63 = vpop.f32.mrf.mxu2 }
 0x4c1   :  { %3778 = vmatmul.bf16.gmra.mxu0 %v10615_v16  ;;  %v9264_v32 = vmax.f32 %v9182_v43, %v4142_v7  ;;  %v3943_v6 = vmul.f32 %v9066_v8, %v3875_v20 }
 0x4c3   :  { %v9267_v57 = vpack.c.bf16 %v9264_v32, %v4157_v41  ;;  %v10444_v11 = vpack.c.bf16 0.0, %v9264_v32  ;;  %v4011_v43 = vadd.f32 %v9073_v26, %v3943_v6 }
 0x4c5   :  { %7001 = vmatmul.msk.bf16.gmra.mxu1 %vm4312_vm0, %v9267_v57  ;;  %7053 = vmatmul.msk.bf16.gmra.mxu3 %vm4312_vm0, %v10444_v11  ;;  %v4075_v9 = vmax.f32 %v4011_v43, 0.0 }
 0x4c6   :  { %v3741_v36 = vpop.f32.mrf.mxu0 }
 0x4c7   :  { %v3876_v16 = vadd.f32 %v3741_v36, %v10727_v15  ;;  %v9290_v36 = vpop.f32.mrf.mxu1 }
 0x4c9   :  { %v3944_v24 = vmul.f32 %v9066_v8, %v3876_v16 }
 0x4cb   :  { %v4012_v41 = vadd.f32 %v9073_v26, %v3944_v24 }
 0x4cd   :  { %v4076_v61 = vmax.f32 %v4012_v41, 0.0 }
 0x4ce   :  { %v3744_v59 = vpop.f32.mrf.mxu0 }
 0x4cf   :  { %v9280_v4 = vmax.f32 %v4075_v9, %v4076_v61  ;;  %v3877_v39 = vadd.f32 %v3744_v59, %v8770_v25 }
 0x4d1   :  { %3783 = vmatmul.bf16.gmra.mxu0 %v10619_v28  ;;  %v3945_v53 = vmul.f32 %v9066_v8, %v3877_v39 }
 0x4d3   :  { %v4013_v20 = vadd.f32 %v9073_v26, %v3945_v53  ;;  %v4443_v41 = vpop.f32.mrf.mxu2 }
 0x4d5   :  { %v4077_v16 = vmax.f32 %v4013_v20, 0.0 }
 0x4d6   :  { %v3746_v50 = vpop.f32.mrf.mxu0 }
 0x4d7   :  { %v3878_v7 = vadd.f32 %v3746_v50, %v10728_v35 }
 0x4d9   :  { %v3946_v6 = vmul.f32 %v9066_v8, %v3878_v7 }
 0x4db   :  { %v4014_v15 = vadd.f32 %v9073_v26, %v3946_v6  ;;  %v9301_v7 = vpop.f32.mrf.mxu2 }
 0x4dd   :  { %v4078_v43 = vmax.f32 %v4014_v15, 0.0  ;;  %v4346_v9 = vpop.f32.mrf.mxu1 }
 0x4de   :  { %v3749_v25 = vpop.f32.mrf.mxu0  ;;  %v4444_v59 = vadd.f32 %v4443_v41, %v4346_v9  ;;  %v9311_v9 = vpop.f32.mrf.mxu3 }
 0x4df   :  { %v9293_v24 = vmax.f32 %v4077_v16, %v4078_v43  ;;  %v3879_v28 = vadd.f32 %v3749_v25, %v8786_v44 }
 0x4e1   :  { %3788 = vmatmul.bf16.gmra.mxu0 %v7696_v12  ;;  %v3947_v61 = vmul.f32 %v9066_v8, %v3879_v28 }
 0x4e3   :  { %v4015_v50 = vadd.f32 %v9073_v26, %v3947_v61 }
 0x4e5   :  { %v9304_v6 = vpop.f32.mrf.mxu1  ;;  %v4079_v44 = vmax.f32 %v4015_v50, 0.0 }
 0x4e6   :  { %v3751_v39 = vpop.f32.mrf.mxu0 }
 0x4e7   :  { %v3880_v53 = vadd.f32 %v3751_v39, %v8792_v34  ;;  %v4448_v34 = vpop.f32.mrf.mxu2  ;;  %v10729_v39 = vld [vmem:[#allocation45_spill] sm:$0xff] }
 0x4e9   :  { %v3948_v35 = vmul.f32 %v9066_v8, %v3880_v53 }
 0x4eb   :  { %v4016_v20 = vadd.f32 %v9073_v26, %v3948_v35 }
 0x4ed   :  { %v4080_v15 = vmax.f32 %v4016_v20, 0.0  ;;  %v4351_v25 = vpop.f32.mrf.mxu1 }
 0x4ee   :  { %v3754_v12 = vpop.f32.mrf.mxu0  ;;  %v4449_v41 = vadd.f32 %v4448_v34, %v4351_v25 }
 0x4ef   :  { %v9306_v16 = vmax.f32 %v4079_v44, %v4080_v15  ;;  %v3881_v43 = vadd.f32 %v3754_v12, %v8802_v3 }
 0x4f1   :  { %3793 = vmatmul.bf16.gmra.mxu0 %v10644_v45  ;;  %v3949_v28 = vmul.f32 %v9066_v8, %v3881_v43  ;;  %v10730_v43 = vld [vmem:[#allocation28_spill] sm:$0xff] }
 0x4f3   :  { %v4017_v50 = vadd.f32 %v9073_v26, %v3949_v28  ;;  %v10731_v28 = vld [vmem:[#allocation48_spill] sm:$0xff] }
 0x4f5   :  { %v4081_v44 = vmax.f32 %v4017_v50, 0.0  ;;  %v4589_v45 = vpop.f32.mrf.mxu3 }
 0x4f6   :  { %v3756_v61 = vpop.f32.mrf.mxu0  ;;  %v9319_v11 = vadd.f32 %v4589_v45, %v4444_v59 }
 0x4f7   :  { %v3882_v53 = vadd.f32 %v3756_v61, %v10729_v39 }
 0x4f9   :  { %v3950_v35 = vmul.f32 %v9066_v8, %v3882_v53 }
 0x4fb   :  { %v4018_v20 = vadd.f32 %v9073_v26, %v3950_v35 }
 0x4fd   :  { %v4082_v3 = vmax.f32 %v4018_v20, 0.0  ;;  %v9325_v53 = vpop.f32.mrf.mxu3 }
 0x4fe   :  { %v3759_v15 = vpop.f32.mrf.mxu0 }
 0x4ff   :  { %v9317_v12 = vmax.f32 %v4081_v44, %v4082_v3  ;;  %v3883_v34 = vadd.f32 %v3759_v15, %v10730_v43  ;;  %v10732_v15 = vld [vmem:[#allocation54_spill] sm:$0xff] }
 0x501   :  { %3798 = vmatmul.bf16.gmra.mxu0 %v10630_v55  ;;  %v3951_v25 = vmul.f32 %v9066_v8, %v3883_v34 }
 0x503   :  { %v4019_v50 = vadd.f32 %v9073_v26, %v3951_v25 }
 0x505   :  { %v4083_v44 = vmax.f32 %v4019_v50, 0.0  ;;  %v4594_v34 = vpop.f32.mrf.mxu3  ;;  %v10734_v50 = vld [vmem:[#allocation30_spill] sm:$0xff] }
 0x506   :  { %v3761_v61 = vpop.f32.mrf.mxu0 }
 0x507   :  { %v3884_v39 = vadd.f32 %v3761_v61, %v10731_v28  ;;  %v9336_v28 = vadd.f32 %v4594_v34, %v4449_v41 }
 0x509   :  { %v3952_v35 = vmul.f32 %v9066_v8, %v3884_v39  ;;  %10733 = vst [vmem:[#allocation87_spill] sm:$0xff] %v9336_v28 }
 0x50b   :  { %v4020_v20 = vadd.f32 %v9073_v26, %v3952_v35 }
 0x50d   :  { %v4084_v59 = vmax.f32 %v4020_v20, 0.0  ;;  %v9342_v20 = vpop.f32.mrf.mxu2 }
 0x50e   :  { %v3764_v3 = vpop.f32.mrf.mxu0  ;;  %10735 = vst [vmem:[#allocation88_spill] sm:$0xff] %v9342_v20 }
 0x50f   :  { %v4143_v45 = vmax.f32 %v4083_v44, %v4084_v59  ;;  %v3885_v43 = vadd.f32 %v3764_v3, %v10732_v15  ;;  %v9344_v44 = vpop.f32.mrf.mxu1 }
 0x510   :  { %10736 = vst [vmem:[#allocation17_spill] sm:$0xff] %v9344_v44 }
 0x511   :  { %3803 = vmatmul.bf16.gmra.mxu0 %v10638_v33  ;;  %v4159_v55 = vmax.f32 %v9280_v4, %v4143_v45  ;;  %v3953_v25 = vmul.f32 %v9066_v8, %v3885_v43  ;;  %v10737_v43 = vld [vmem:[#allocation53_spill] sm:$0xff] }
 0x513   :  { %v9334_v61 = vpack.c.bf16 %v4159_v55, %v10721_v56  ;;  %v4021_v33 = vadd.f32 %v9073_v26, %v3953_v25 }
 0x515   :  { %7024 = vmatmul.msk.bf16.gmra.mxu2 %vm4312_vm0, %v9334_v61  ;;  %v4085_v41 = vmax.f32 %v4021_v33, 0.0  ;;  %v10738_v33 = vld [vmem:[#allocation58_spill] sm:$0xff] }
 0x516   :  { %v3766_v39 = vpop.f32.mrf.mxu0 }
 0x517   :  { %v3886_v35 = vadd.f32 %v3766_v39, %v10734_v50 }
 0x518   :  { %v4453_v50 = vpop.f32.mrf.mxu2 }
 0x519   :  { %v3954_v4 = vmul.f32 %v9066_v8, %v3886_v35 }
 0x51b   :  { %v4022_v59 = vadd.f32 %v9073_v26, %v3954_v4 }
 0x51d   :  { %v4086_v3 = vmax.f32 %v4022_v59, 0.0 }
 0x51e   :  { %v3769_v45 = vpop.f32.mrf.mxu0 }
 0x51f   :  { %v4144_v15 = vmax.f32 %v4085_v41, %v4086_v3  ;;  %v3887_v34 = vadd.f32 %v3769_v45, %v10737_v43 }
 0x521   :  { %3808 = vmatmul.bf16.gmra.mxu0 %v10645_v22  ;;  %v4160_v39 = vmax.f32 %v9293_v24, %v4144_v15  ;;  %v3955_v25 = vmul.f32 %v9066_v8, %v3887_v34 }
 0x522   :  { %v4356_v20 = vpop.f32.mrf.mxu1 }
 0x523   :  { %v4454_v28 = vadd.f32 %v4453_v50, %v4356_v20  ;;  %v9352_v44 = vpack.c.bf16 %v4160_v39, %v4159_v55  ;;  %v4023_v59 = vadd.f32 %v9073_v26, %v3955_v25  ;;  %v9361_v20 = vpop.f32.mrf.mxu3 }
 0x525   :  { %7002 = vmatmul.msk.bf16.gmra.mxu1 %vm4312_vm0, %v9352_v44  ;;  %v4087_v24 = vmax.f32 %v4023_v59, 0.0 }
 0x526   :  { %v3771_v35 = vpop.f32.mrf.mxu0 }
 0x527   :  { %v3888_v4 = vadd.f32 %v3771_v35, %v10738_v33 }
 0x529   :  { %v3956_v41 = vmul.f32 %v9066_v8, %v3888_v4 }
 0x52b   :  { %v4024_v22 = vadd.f32 %v9073_v26, %v3956_v41 }
 0x52d   :  { %v4088_v3 = vmax.f32 %v4024_v22, 0.0 }
 0x52e   :  { %v3774_v45 = vpop.f32.mrf.mxu0 }
 0x52f   :  { %v4145_v55 = vmax.f32 %v4087_v24, %v4088_v3  ;;  %v3889_v43 = vadd.f32 %v3774_v45, %v8915_v51 }
 0x531   :  { %v4161_v15 = vmax.f32 %v9306_v16, %v4145_v55  ;;  %3813 = vmatmul.bf16.gmra.mxu0 %v10660_v18  ;;  %v3957_v50 = vmul.f32 %v9066_v8, %v3889_v43  ;;  %v9378_v18 = vpop.f32.mrf.mxu2 }
 0x533   :  { %v9366_v34 = vpack.c.bf16 %v4161_v15, %v4160_v39  ;;  %v4025_v16 = vadd.f32 %v9073_v26, %v3957_v50  ;;  %v9380_v39 = vpop.f32.mrf.mxu1 }
 0x535   :  { %7025 = vmatmul.msk.bf16.gmra.mxu2 %vm4312_vm0, %v9366_v34  ;;  %7054 = vmatmul.msk.bf16.gmra.mxu3 %vm4312_vm0, %v9366_v34  ;;  %v4089_v41 = vmax.f32 %v4025_v16, 0.0 }
 0x536   :  { %v3776_v25 = vpop.f32.mrf.mxu0 }
 0x537   :  { %v3890_v35 = vadd.f32 %v3776_v25, %v8921_v37 }
 0x538   :  { %v4599_v33 = vpop.f32.mrf.mxu3 }
 0x539   :  { %v3958_v51 = vmul.f32 %v9066_v8, %v3890_v35  ;;  %v9376_v4 = vadd.f32 %v4599_v33, %v4454_v28  ;;  %v4458_v28 = vpop.f32.mrf.mxu2 }
 0x53b   :  { %v4026_v59 = vadd.f32 %v9073_v26, %v3958_v51 }
 0x53d   :  { %v4090_v22 = vmax.f32 %v4026_v59, 0.0 }
 0x53e   :  { %v3779_v24 = vpop.f32.mrf.mxu0 }
 0x53f   :  { %v4146_v3 = vmax.f32 %v4089_v41, %v4090_v22  ;;  %v3891_v45 = vadd.f32 %v3779_v24, %v8931_v46 }
 0x540   :  { %v9384_v37 = vpop.f32.mrf.mxu3 }
 0x541   :  { %3818 = vmatmul.bf16.gmra.mxu0 %v10650_v13  ;;  %v4162_v55 = vmax.f32 %v9317_v12, %v4146_v3  ;;  %v3959_v33 = vmul.f32 %v9066_v8, %v3891_v45 }
 0x542   :  { %v4361_v43 = vpop.f32.mrf.mxu1 }
 0x543   :  { %v4459_v50 = vadd.f32 %v4458_v28, %v4361_v43  ;;  %v9388_v25 = vpack.c.bf16 %v4162_v55, %v4161_v15  ;;  %v9390_v35 = vpack.c.bf16 0.0, %v4162_v55  ;;  %v4027_v12 = vadd.f32 %v9073_v26, %v3959_v33 }
 0x545   :  { %7003 = vmatmul.msk.bf16.gmra.mxu1 %vm4312_vm0, %v9388_v25  ;;  %7055 = vmatmul.msk.bf16.gmra.mxu3 %vm4312_vm0, %v9390_v35  ;;  %v4091_v41 = vmax.f32 %v4027_v12, 0.0 }
 0x546   :  { %v3781_v46 = vpop.f32.mrf.mxu0 }
 0x547   :  { %v3892_v13 = vadd.f32 %v3781_v46, %v8937_v48 }
 0x548   :  { %v4604_v16 = vpop.f32.mrf.mxu3 }
 0x549   :  { %v3960_v51 = vmul.f32 %v9066_v8, %v3892_v13  ;;  %v9400_v15 = vadd.f32 %v4604_v16, %v4459_v50 }
 0x54b   :  { %v4028_v59 = vadd.f32 %v9073_v26, %v3960_v51 }
 0x54d   :  { %v4092_v22 = vmax.f32 %v4028_v59, 0.0  ;;  %v10739_v59 = vld [vmem:[#allocation39_spill] sm:$0xff] }
 0x54e   :  { %v3784_v24 = vpop.f32.mrf.mxu0 }
 0x54f   :  { %v4131_v3 = vmax.f32 %v4091_v41, %v4092_v22  ;;  %v3893_v45 = vadd.f32 %v3784_v24, %v8947_v54 }
 0x551   :  { %3823 = vmatmul.bf16.gmra.mxu0 %v10655_v52  ;;  %v3961_v55 = vmul.f32 %v9066_v8, %v3893_v45 }
 0x553   :  { %v4029_v43 = vadd.f32 %v9073_v26, %v3961_v55 }
 0x555   :  { %v4093_v46 = vmax.f32 %v4029_v43, 0.0 }
 0x556   :  { %v3786_v48 = vpop.f32.mrf.mxu0 }
 0x557   :  { %v3894_v28 = vadd.f32 %v3786_v48, %v8953_v62 }
 0x559   :  { %v3962_v50 = vmul.f32 %v9066_v8, %v3894_v28 }
 0x55b   :  { %v4030_v33 = vadd.f32 %v9073_v26, %v3962_v50 }
 0x55d   :  { %v4094_v13 = vmax.f32 %v4030_v33, 0.0 }
 0x55e   :  { %v3789_v16 = vpop.f32.mrf.mxu0 }
 0x55f   :  { %v9410_v12 = vmax.f32 %v4093_v46, %v4094_v13  ;;  %v3895_v54 = vadd.f32 %v3789_v16, %v8963_v42 }
 0x561   :  { %3828 = vmatmul.bf16.gmra.mxu0 %v10662_v29  ;;  %v3963_v52 = vmul.f32 %v9066_v8, %v3895_v54  ;;  %v10740_v29 = vpack.c.bf16 0.0, %v8895_v1  ;;  %v10742_v1 = vld [vmem:[#allocation43_spill] sm:$0xff] }
 0x563   :  { %v4031_v41 = vadd.f32 %v9073_v26, %v3963_v52 }
 0x565   :  { %v4095_v45 = vmax.f32 %v4031_v41, 0.0 }
 0x566   :  { %v3791_v51 = vpop.f32.mrf.mxu0 }
 0x567   :  { %v3896_v62 = vadd.f32 %v3791_v51, %v10739_v59  ;;  %v10741_v59 = vld [vmem:[#allocation50_spill] sm:$0xff] }
 0x569   :  { %v3964_v22 = vmul.f32 %v9066_v8, %v3896_v62 }
 0x56b   :  { %v4032_v24 = vadd.f32 %v9073_v26, %v3964_v22  ;;  %v10743_v22 = vld [vmem:[#allocation66_spill] sm:$0xff] }
 0x56d   :  { %v4096_v55 = vmax.f32 %v4032_v24, 0.0 }
 0x56e   :  { %v3794_v48 = vpop.f32.mrf.mxu0 }
 0x56f   :  { %v9419_v28 = vmax.f32 %v4095_v45, %v4096_v55  ;;  %v3897_v42 = vadd.f32 %v3794_v48, %v8979_v49  ;;  %v2590_v49 = vadd.f32 %v8991_v40, %v10741_v59 }
 0x571   :  { %3833 = vmatmul.bf16.gmra.mxu0 %v10740_v29  ;;  %v3965_v43 = vmul.f32 %v9066_v8, %v3897_v42  ;;  %v3048_v41 = vadd.f32 %v10742_v1, %v2590_v49  ;;  %v10748_v49 = vld [vmem:[#allocation68_spill] sm:$0xff] }
 0x573   :  { %v4033_v46 = vadd.f32 %v9073_v26, %v3965_v43 }
 0x575   :  { %v4097_v54 = vmax.f32 %v4033_v46, 0.0 }
 0x576   :  { %v3796_v50 = vpop.f32.mrf.mxu0 }
 0x577   :  { %v3898_v33 = vadd.f32 %v3796_v50, %v8985_v31  ;;  %v10744_v31 = vld [vmem:[#allocation64_spill] sm:$0xff] }
 0x578   :  { %v3442_v45 = vadd.f32 %v10744_v31, %v3048_v41 }
 0x579   :  { %v3966_v13 = vmul.f32 %v9066_v8, %v3898_v33 }
 0x57b   :  { %v4034_v16 = vadd.f32 %v9073_v26, %v3966_v13  ;;  %v10745_v13 = vld [vmem:[#allocation49_spill] sm:$0xff] }
 0x57d   :  { %v4098_v52 = vmax.f32 %v4034_v16, 0.0  ;;  %v10746_v16 = vld [vmem:[#allocation65_spill] sm:$0xff] }
 0x57e   :  { %v3799_v51 = vpop.f32.mrf.mxu0 }
 0x57f   :  { %v9431_v62 = vmax.f32 %v4097_v54, %v4098_v52  ;;  %v3899_v24 = vadd.f32 %v3799_v51, %v10743_v22  ;;  %v2592_v54 = vadd.f32 %v10746_v16, %v10745_v13  ;;  %v10747_v51 = vld [vmem:[#allocation6_spill] sm:$0xff]  ;;  %v7494_v16 = vld [vmem:[%s10341_s4 + $0x88] sm:$0xff] }
 0x581   :  { %3838 = vmatmul.bf16.gmra.mxu0 %v10666_v5  ;;  %v3967_v55 = vmul.f32 %v9066_v8, %v3899_v24  ;;  %v3050_v59 = vadd.f32 %v10747_v51, %v2592_v54  ;;  %v10749_v24 = vld [vmem:[#allocation51_spill] sm:$0xff]  ;;  %v10751_v51 = vld [vmem:[#allocation9_spill] sm:$0xff] }
 0x583   :  { %v4035_v29 = vadd.f32 %v9073_v26, %v3967_v55  ;;  %v3444_v31 = vadd.f32 %v10749_v24, %v3050_v59  ;;  %v7496_v55 = vld [vmem:[%s10341_s4 + $0x98] sm:$0xff] }
 0x584   :  { %4860 = vmatpush.bf16.msra.mxu2 %v7496_v55 }
 0x585   :  { %v4099_v50 = vmax.f32 %v4035_v29, 0.0 }
 0x586   :  { %v3801_v48 = vpop.f32.mrf.mxu0 }
 0x587   :  { %v3900_v42 = vadd.f32 %v3801_v48, %v3442_v45 }
 0x589   :  { %v3968_v43 = vmul.f32 %v9066_v8, %v3900_v42 }
 0x58b   :  { %v4036_v40 = vadd.f32 %v9073_v26, %v3968_v43  ;;  %v7495_v43 = vld [vmem:[%s10341_s4 + $0x90] sm:$0xff] }
 0x58c   :  { %4861 = vmatpush.bf16.msra.mxu2 %v7495_v43 }
 0x58d   :  { %v4100_v33 = vmax.f32 %v4036_v40, 0.0  ;;  %v9461_v40 = vpop.f32.mrf.mxu2 }
 0x58e   :  { %v3804_v46 = vpop.f32.mrf.mxu0 }
 0x58f   :  { %v4147_v52 = vmax.f32 %v4099_v50, %v4100_v33  ;;  %v3901_v1 = vadd.f32 %v3804_v46, %v10748_v49  ;;  %v9463_v50 = vpop.f32.mrf.mxu1 }
 0x590   :  { %4862 = vmatpush.bf16.msra.mxu2 %v7494_v16  ;;  %v7500_v16 = vld [vmem:[%s10341_s4 + $0xb8] sm:$0xff] }
 0x591   :  { %3843 = vmatmul.bf16.gmra.mxu0 %v10666_v5  ;;  %v4163_v41 = vmax.f32 %v4131_v3, %v4147_v52  ;;  %v3969_v45 = vmul.f32 %v9066_v8, %v3901_v1  ;;  %v10750_v52 = vld [vmem:[#allocation52_spill] sm:$0xff]  ;;  %v10752_v1 = vld [vmem:[#allocation59_spill] sm:$0xff]  ;;  %5006 = vmatpush.bf16.msra.mxu3 %v7500_v16 }
 0x592   :  { %v2594_v59 = vadd.f32 %v10751_v51, %v10750_v52  ;;  %v10757_v16 = vld [vmem:[#allocation67_spill] sm:$0xff] }
 0x593   :  { %v9447_v22 = vpack.c.bf16 %v4163_v41, %v10721_v56  ;;  %v4037_v29 = vadd.f32 %v9073_v26, %v3969_v45 }
 0x594   :  { %v3052_v24 = vadd.f32 %v10752_v1, %v2594_v59  ;;  %v7491_v59 = vld [vmem:[%s10341_s4 + $0x70] sm:$0xff] }
 0x595   :  { %7026 = vmatmul.msk.bf16.gmra.mxu2 %vm4312_vm0, %v9447_v22  ;;  %v4101_v46 = vmax.f32 %v4037_v29, 0.0 }
 0x596   :  { %v3806_v48 = vpop.f32.mrf.mxu0 }
 0x597   :  { %v3902_v42 = vadd.f32 %v3806_v48, %v3444_v31  ;;  %v10753_v31 = vld [vmem:[#allocation7_spill] sm:$0xff] }
 0x598   :  { %v7493_v48 = vld [vmem:[%s10341_s4 + $0x80] sm:$0xff] }
 0x599   :  { %v3970_v3 = vmul.f32 %v9066_v8, %v3902_v42  ;;  %v4463_v42 = vpop.f32.mrf.mxu2  ;;  %4863 = vmatpush.bf16.msra.mxu2 %v7493_v48  ;;  %v7498_v48 = vld [vmem:[%s10341_s4 + $0xa8] sm:$0xff] }
 0x59b   :  { %v4038_v33 = vadd.f32 %v9073_v26, %v3970_v3 }
 0x59d   :  { %v4102_v13 = vmax.f32 %v4038_v33, 0.0  ;;  %v10754_v33 = vld [vmem:[#allocation10_spill] sm:$0xff] }
 0x59e   :  { %v3809_v54 = vpop.f32.mrf.mxu0 }
 0x59f   :  { %v4148_v49 = vmax.f32 %v4101_v46, %v4102_v13  ;;  %v3903_v45 = vadd.f32 %v3809_v54, %v10753_v31  ;;  %v3446_v46 = vadd.f32 %v10754_v33, %v3052_v24  ;;  %v10756_v33 = vld [vmem:[#allocation63_spill] sm:$0xff] }
 0x5a1   :  { %3848 = vmatmul.bf16.gmra.mxu0 %v10666_v5  ;;  %v4164_v55 = vmax.f32 %v9410_v12, %v4148_v49  ;;  %v3971_v13 = vmul.f32 %v9066_v8, %v3903_v45  ;;  %v7492_v12 = vld [vmem:[%s10341_s4 + $0x78] sm:$0xff]  ;;  %v7499_v49 = vld [vmem:[%s10341_s4 + $0xb0] sm:$0xff]  ;;  %v7490_v45 = vld [vmem:[%s10341_s4 + $0x68] sm:$0xff] }
 0x5a2   :  { %v4366_v29 = vpop.f32.mrf.mxu1  ;;  %4730 = vmatpush.bf16.msra.mxu1 %v7492_v12  ;;  %5007 = vmatpush.bf16.msra.mxu3 %v7499_v49  ;;  %v9507_v12 = vpop.f32.mrf.mxu3  ;;  %v7497_v49 = vld [vmem:[%s10341_s4 + $0xa0] sm:$0xff] }
 0x5a3   :  { %v4464_v3 = vadd.f32 %v4463_v42, %v4366_v29  ;;  %v9478_v43 = vpack.c.bf16 %v4164_v55, %v4163_v41  ;;  %v4039_v41 = vadd.f32 %v9073_v26, %v3971_v13  ;;  %v10755_v29 = vld [vmem:[#allocation34_spill] sm:$0xff] }
 0x5a5   :  { %7004 = vmatmul.msk.bf16.gmra.mxu1 %vm4312_vm0, %v9478_v43  ;;  %v4103_v24 = vmax.f32 %v4039_v41, 0.0  ;;  %v10758_v41 = vld [vmem:[#allocation8_spill] sm:$0xff] }
 0x5a6   :  { %v3811_v54 = vpop.f32.mrf.mxu0  ;;  %4731 = vmatpush.bf16.msra.mxu1 %v7491_v59  ;;  %5008 = vmatpush.bf16.msra.mxu3 %v7498_v48  ;;  %v7489_v59 = vld [vmem:[%s10341_s4 + $0x60] sm:$0xff] }
 0x5a7   :  { %v3904_v52 = vadd.f32 %v3811_v54, %v3446_v46  ;;  %v2596_v46 = vadd.f32 %v10756_v33, %v10755_v29 }
 0x5a9   :  { %v3972_v51 = vmul.f32 %v9066_v8, %v3904_v52  ;;  %v3054_v54 = vadd.f32 %v10757_v16, %v2596_v46  ;;  %v9531_v46 = vpop.f32.mrf.mxu2 }
 0x5aa   :  { %4732 = vmatpush.bf16.msra.mxu1 %v7490_v45  ;;  %5009 = vmatpush.bf16.msra.mxu3 %v7497_v49  ;;  %10760 = vst [vmem:[#allocation79_spill] sm:$0xff] %v9531_v46  ;;  %v10763_v49 = vld [vmem:[#allocation69_spill] sm:$0xff] }
 0x5ab   :  { %v4040_v1 = vadd.f32 %v9073_v26, %v3972_v51 }
 0x5ad   :  { %v4104_v31 = vmax.f32 %v4040_v1, 0.0 }
 0x5ae   :  { %v3814_v42 = vpop.f32.mrf.mxu0  ;;  %4733 = vmatpush.bf16.msra.mxu1 %v7489_v59  ;;  %v10762_v59 = vld [vmem:[#allocation56_spill] sm:$0xff] }
 0x5af   :  { %v4149_v13 = vmax.f32 %v4103_v24, %v4104_v31  ;;  %v3905_v51 = vadd.f32 %v3814_v42, %v10758_v41  ;;  %v10759_v24 = vld [vmem:[#allocation11_spill] sm:$0xff] }
 0x5b0   :  { %v3448_v31 = vadd.f32 %v10759_v24, %v3054_v54  ;;  %v2598_v24 = vadd.f32 %v10763_v49, %v10762_v59 }
 0x5b1   :  { %v4165_v52 = vmax.f32 %v9419_v28, %v4149_v13  ;;  %3853 = vmatmul.bf16.gmra.mxu0 %v10666_v5  ;;  %v3973_v28 = vmul.f32 %v9066_v8, %v3905_v51  ;;  %v9533_v13 = vpop.f32.mrf.mxu1 }
 0x5b2   :  { %10761 = vst [vmem:[#allocation89_spill] sm:$0xff] %v9533_v13 }
 0x5b3   :  { %v9519_v1 = vpack.c.bf16 %v4165_v52, %v4164_v55  ;;  %v4041_v29 = vadd.f32 %v9073_v26, %v3973_v28 }
 0x5b5   :  { %7027 = vmatmul.msk.bf16.gmra.mxu2 %vm4312_vm0, %v9519_v1  ;;  %7056 = vmatmul.msk.bf16.gmra.mxu3 %vm4312_vm0, %v9519_v1  ;;  %v4105_v54 = vmax.f32 %v4041_v29, 0.0  ;;  %v10765_v29 = vld [vmem:[#allocation75_spill] sm:$0xff] }
 0x5b6   :  { %v3816_v45 = vpop.f32.mrf.mxu0 }
 0x5b7   :  { %v3906_v48 = vadd.f32 %v3816_v45, %v3448_v31 }
 0x5b8   :  { %v4609_v42 = vpop.f32.mrf.mxu3 }
 0x5b9   :  { %v3974_v55 = vmul.f32 %v9066_v8, %v3906_v48  ;;  %v9529_v33 = vadd.f32 %v4609_v42, %v4464_v3  ;;  %v10764_v8 = vld [vmem:[#allocation70_spill] sm:$0xff]  ;;  %v4468_v42 = vpop.f32.mrf.mxu2 }
 0x5ba   :  { %v3056_v3 = vadd.f32 %v10764_v8, %v2598_v24  ;;  %v10767_v8 = vld [vmem:[#allocation77_spill] sm:$0xff] }
 0x5bb   :  { %v4042_v16 = vadd.f32 %v9073_v26, %v3974_v55 }
 0x5bc   :  { %v3450_v55 = vadd.f32 %v10765_v29, %v3056_v3  ;;  %v10768_v29 = vld [vmem:[#allocation76_spill] sm:$0xff] }
 0x5bd   :  { %v4106_v41 = vmax.f32 %v4042_v16, 0.0  ;;  %v9551_v16 = vld [vmem:[%s10339_s2] ss:$0 sm:$0xff] }
 0x5be   :  { %v3819_v51 = vpop.f32.mrf.mxu0 }
 0x5bf   :  { %v4150_v31 = vmax.f32 %v4105_v54, %v4106_v41  ;;  %v3907_v45 = vadd.f32 %v3819_v51, %v9081_v60  ;;  %v9563_v54 = vld [vmem:[%s10340_s3] ss:$0 sm:$0xff] }
 0x5c0   :  { %v9539_v28 = vpop.f32.mrf.mxu3 }
 0x5c1   :  { %v4166_v48 = vmax.f32 %v9431_v62, %v4150_v31  ;;  %v3975_v60 = vmul.f32 %v9551_v16, %v3907_v45 }
 0x5c2   :  { %v4371_v46 = vpop.f32.mrf.mxu1 }
 0x5c3   :  { %v4469_v13 = vadd.f32 %v4468_v42, %v4371_v46  ;;  %v9543_v5 = vpack.c.bf16 %v4166_v48, %v4165_v52  ;;  %v9545_v26 = vpack.c.bf16 0.0, %v4166_v48  ;;  %v4043_v41 = vadd.f32 %v9563_v54, %v3975_v60 }
 0x5c5   :  { %7005 = vmatmul.msk.bf16.gmra.mxu1 %vm4312_vm0, %v9543_v5  ;;  %7057 = vmatmul.msk.bf16.gmra.mxu3 %vm4312_vm0, %v9545_v26  ;;  %v4107_v24 = vmax.f32 %v4043_v41, 0.0 }
 0x5c6   :  { %7114 = vmatmul.msk.bf16.vlgmr.msra.gmra.mxu2 %vm4312_vm0, %v9227_v0  ;;  %v3821_v62 = vpop.f32.mrf.mxu0  ;;  %v10766_v0 = vld [vmem:[#allocation57_spill] sm:$0xff] }
 0x5c7   :  { %v3908_v52 = vadd.f32 %v3821_v62, %v3450_v55  ;;  %v2600_v3 = vadd.f32 %v10767_v8, %v10766_v0  ;;  %v10769_v62 = vld [vmem:[#allocation3_spill] sm:$0xff]  ;;  %v10771_v0 = vld [vmem:[#allocation80_spill] sm:$0xff] }
 0x5c8   :  { %v4614_v46 = vpop.f32.mrf.mxu3 }
 0x5c9   :  { %v3976_v51 = vmul.f32 %v9551_v16, %v3908_v52  ;;  %v9567_v59 = vadd.f32 %v4614_v46, %v4469_v13  ;;  %v3058_v55 = vadd.f32 %v10768_v29, %v2600_v3  ;;  %v10772_v3 = vld [vmem:[#allocation78_spill] sm:$0xff] }
 0x5ca   :  { %v10773_v29 = vld [vmem:[#allocation82_spill] sm:$0xff] }
 0x5cb   :  { %v4044_v49 = vadd.f32 %v9563_v54, %v3976_v51  ;;  %v3452_v60 = vadd.f32 %v10769_v62, %v3058_v55  ;;  %v10774_v55 = vld [vmem:[#allocation81_spill] sm:$0xff] }
 0x5cd   :  { %v4108_v31 = vmax.f32 %v4044_v49, 0.0 }
 0x5ce   :  { %v3824_v45 = vpop.f32.mrf.mxu0 }
 0x5cf   :  { %v9572_v48 = vmax.f32 %v4107_v24, %v4108_v31  ;;  %v3909_v42 = vadd.f32 %v3824_v45, %v9112_v47  ;;  %v10770_v45 = vld [vmem:[#allocation62_spill] sm:$0xff] }
 0x5d1   :  { %v3977_v52 = vmul.f32 %v9551_v16, %v3909_v42 }
 0x5d3   :  { %v4045_v41 = vadd.f32 %v9563_v54, %v3977_v52  ;;  %v10775_v52 = vpack.c.bf16 0.0, %v9264_v32 }
 0x5d5   :  { %7082 = vmatmul.msk.bf16.vlgmr.msra.gmra.mxu1 %vm4312_vm0, %v9206_v14  ;;  %7146 = vmatmul.msk.bf16.vlgmr.msra.gmra.mxu3 %vm4312_vm0, %v9248_v23  ;;  %v4109_v49 = vmax.f32 %v4045_v41, 0.0  ;;  %v2602_v14 = vadd.f32 %v10771_v0, %v10770_v45  ;;  %v10776_v45 = vld [vmem:[#allocation60_spill] sm:$0xff] }
 0x5d6   :  { %7115 = vmatmul.msk.bf16.gmra.mxu2 %vm4312_vm0, %v9267_v57  ;;  %v3826_v13 = vpop.f32.mrf.mxu0 }
 0x5d7   :  { %v3910_v46 = vadd.f32 %v3826_v13, %v3452_v60  ;;  %v3060_v57 = vadd.f32 %v10773_v29, %v2602_v14  ;;  %v10779_v29 = vld [vmem:[#allocation83_spill] sm:$0xff] }
 0x5d9   :  { %v3978_v47 = vmul.f32 %v9551_v16, %v3910_v46  ;;  %v3454_v62 = vadd.f32 %v10774_v55, %v3060_v57 }
 0x5db   :  { %v4046_v51 = vadd.f32 %v9563_v54, %v3978_v47 }
 0x5dd   :  { %v4110_v24 = vmax.f32 %v4046_v51, 0.0 }
 0x5de   :  { %v3829_v31 = vpop.f32.mrf.mxu0 }
 0x5df   :  { %v9589_v8 = vmax.f32 %v4109_v49, %v4110_v24  ;;  %v3911_v42 = vadd.f32 %v3829_v31, %v10772_v3  ;;  %v10778_v3 = vld [vmem:[#allocation86_spill] sm:$0xff] }
 0x5e1   :  { %v3979_v60 = vmul.f32 %v9551_v16, %v3911_v42 }
 0x5e3   :  { %v4047_v41 = vadd.f32 %v9563_v54, %v3979_v60 }
 0x5e5   :  { %7083 = vmatmul.msk.bf16.gmra.mxu1 %vm4312_vm0, %v9248_v23  ;;  %7147 = vmatmul.msk.bf16.gmra.mxu3 %vm4312_vm0, %v10775_v52  ;;  %v4111_v49 = vmax.f32 %v4047_v41, 0.0  ;;  %v10777_v23 = vld [vmem:[#allocation4_spill] sm:$0xff] }
 0x5e6   :  { %7116 = vmatmul.msk.bf16.gmra.mxu2 %vm4312_vm0, %v9352_v44  ;;  %v3831_v13 = vpop.f32.mrf.mxu0  ;;  %v2604_v0 = vadd.f32 %v10777_v23, %v10776_v45  ;;  %v10782_v23 = vld [vmem:[#allocation5_spill] sm:$0xff] }
 0x5e7   :  { %v3912_v46 = vadd.f32 %v3831_v13, %v3454_v62 }
 0x5e8   :  { %v3062_v42 = vadd.f32 %v10778_v3, %v2604_v0 }
 0x5e9   :  { %v3980_v47 = vmul.f32 %v9551_v16, %v3912_v46 }
 0x5ea   :  { %v3456_v57 = vadd.f32 %v10779_v29, %v3062_v42 }
 0x5eb   :  { %v4048_v51 = vadd.f32 %v9563_v54, %v3980_v47 }
 0x5ed   :  { %v4112_v24 = vmax.f32 %v4048_v51, 0.0  ;;  %v10780_v51 = vld [vmem:[#allocation61_spill] sm:$0xff] }
 0x5ee   :  { %v3834_v31 = vpop.f32.mrf.mxu0 }
 0x5ef   :  { %v9607_v32 = vmax.f32 %v4111_v49, %v4112_v24  ;;  %v3913_v14 = vadd.f32 %v3834_v31, %v9173_v30  ;;  %v10781_v49 = vld [vmem:[#allocation72_spill] sm:$0xff] }
 0x5f0   :  { %v2606_v24 = vadd.f32 %v10781_v49, %v10780_v51 }
 0x5f1   :  { %v3981_v55 = vmul.f32 %v9551_v16, %v3913_v14  ;;  %v10783_v14 = vld [vmem:[#allocation73_spill] sm:$0xff] }
 0x5f2   :  { %v3064_v45 = vadd.f32 %v9197_v58, %v2606_v24 }
 0x5f3   :  { %v4049_v52 = vadd.f32 %v9563_v54, %v3981_v55 }
 0x5f4   :  { %v3458_v3 = vadd.f32 %v10783_v14, %v3064_v45 }
 0x5f5   :  { %7084 = vmatmul.msk.bf16.gmra.mxu1 %vm4312_vm0, %v9334_v61  ;;  %7148 = vmatmul.msk.bf16.gmra.mxu3 %vm4312_vm0, %v9366_v34  ;;  %v4113_v46 = vmax.f32 %v4049_v52, 0.0 }
 0x5f6   :  { %7117 = vmatmul.msk.bf16.gmra.mxu2 %vm4312_vm0, %v9388_v25  ;;  %v3836_v62 = vpop.f32.mrf.mxu0 }
 0x5f7   :  { %v3914_v60 = vadd.f32 %v3836_v62, %v3456_v57 }
 0x5f9   :  { %v3982_v30 = vmul.f32 %v9551_v16, %v3914_v60 }
 0x5fb   :  { %v4050_v13 = vadd.f32 %v9563_v54, %v3982_v30 }
 0x5fd   :  { %v4114_v41 = vmax.f32 %v4050_v13, 0.0  ;;  %v10784_v13 = vld [vmem:[#allocation47_spill] sm:$0xff] }
 0x5fe   :  { %v3839_v47 = vpop.f32.mrf.mxu0 }
 0x5ff   :  { %v9624_v31 = vmax.f32 %v4113_v46, %v4114_v41  ;;  %v3915_v0 = vadd.f32 %v3839_v47, %v10782_v23  ;;  %v10785_v46 = vld [vmem:[#allocation12_spill] sm:$0xff] }
 0x600   :  { %v2608_v41 = vadd.f32 %v10785_v46, %v10784_v13 }
 0x601   :  { %v3983_v42 = vmul.f32 %v9551_v16, %v3915_v0 }
 0x602   :  { %v3066_v51 = vadd.f32 %v9219_v17, %v2608_v41 }
 0x603   :  { %v4051_v55 = vadd.f32 %v9563_v54, %v3983_v42 }
 0x604   :  { %v3460_v45 = vadd.f32 %v9221_v19, %v3066_v51  ;;  %v9658_v19 = vpop.f32.mrf.mxu1 }
 0x605   :  { %7085 = vmatmul.msk.bf16.gmra.mxu1 %vm4312_vm0, %v9366_v34  ;;  %7149 = vmatmul.msk.bf16.gmra.mxu3 %vm4312_vm0, %v9390_v35  ;;  %v4115_v60 = vmax.f32 %v4051_v55, 0.0  ;;  %v10786_v55 = vld [vmem:[#allocation55_spill] sm:$0xff] }
 0x606   :  { %7118 = vmatmul.msk.bf16.gmra.mxu2 %vm4312_vm0, %v9478_v43  ;;  %v3841_v29 = vpop.f32.mrf.mxu0 }
 0x607   :  { %v3916_v57 = vadd.f32 %v3841_v29, %v3458_v3 }
 0x609   :  { %v3984_v58 = vmul.f32 %v9551_v16, %v3916_v57 }
 0x60b   :  { %v4052_v62 = vadd.f32 %v9563_v54, %v3984_v58  ;;  %v10787_v58 = vld [vmem:[#allocation74_spill] sm:$0xff] }
 0x60d   :  { %v4116_v52 = vmax.f32 %v4052_v62, 0.0  ;;  %v2610_v62 = vadd.f32 %v10787_v58, %v10786_v55  ;;  %v7510_v55 = vld [vmem:[%s10341_s4 + $0x108] sm:$0xff] }
 0x60e   :  { %v3844_v30 = vpop.f32.mrf.mxu0 }
 0x60f   :  { %v4151_v47 = vmax.f32 %v4115_v60, %v4116_v52  ;;  %v3917_v24 = vadd.f32 %v3844_v30, %v9214_v2  ;;  %v9656_v2 = vpop.f32.mrf.mxu2  ;;  %v3068_v52 = vadd.f32 %v9240_v38, %v2610_v62  ;;  %v7508_v38 = vld [vmem:[%s10341_s4 + $0xf8] sm:$0xff] }
 0x610   :  { %5314 = vmatpush.bf16.msrb.mxu2 %v7508_v38 }
 0x611   :  { %v9643_v49 = vmax.f32 %v9572_v48, %v4151_v47  ;;  %v3985_v23 = vmul.f32 %v9551_v16, %v3917_v24  ;;  %v3462_v24 = vadd.f32 %v9242_v10, %v3068_v52  ;;  %v7512_v10 = vld [vmem:[%s10341_s4 + $0x118] sm:$0xff]  ;;  %v10788_v52 = vld [vmem:[#allocation71_spill] sm:$0xff] }
 0x612   :  { %5476 = vmatpush.bf16.msrb.mxu3 %v7512_v10  ;;  %v7501_v10 = vld [vmem:[%s10341_s4 + $0xc0] sm:$0xff] }
 0x613   :  { %v4053_v48 = vadd.f32 %v9563_v54, %v3985_v23 }
 0x615   :  { %7086 = vmatmul.msk.bf16.gmra.mxu1 %vm4312_vm0, %v9447_v22  ;;  %7150 = vmatmul.msk.bf16.gmra.mxu3 %vm4312_vm0, %v9519_v1  ;;  %v4117_v42 = vmax.f32 %v4053_v48, 0.0  ;;  %v7503_v48 = vld [vmem:[%s10341_s4 + $0xd0] sm:$0xff] }
 0x616   :  { %7119 = vmatmul.msk.bf16.gmra.mxu2 %vm4312_vm0, %v9543_v5  ;;  %v3846_v0 = vpop.f32.mrf.mxu0 }
 0x617   :  { %v3918_v17 = vadd.f32 %v3846_v0, %v3460_v45 }
 0x618   :  { %v4473_v46 = vpop.f32.mrf.mxu2 }
 0x619   :  { %v3986_v14 = vmul.f32 %v9551_v16, %v3918_v17 }
 0x61b   :  { %v4054_v3 = vadd.f32 %v9563_v54, %v3986_v14  ;;  %v7507_v14 = vld [vmem:[%s10341_s4 + $0xf0] sm:$0xff] }
 0x61c   :  { %5315 = vmatpush.bf16.msrb.mxu2 %v7507_v14 }
 0x61d   :  { %v4118_v29 = vmax.f32 %v4054_v3, 0.0  ;;  %v7511_v3 = vld [vmem:[%s10341_s4 + $0x110] sm:$0xff] }
 0x61e   :  { %v3849_v57 = vpop.f32.mrf.mxu0  ;;  %5477 = vmatpush.bf16.msrb.mxu3 %v7511_v3 }
 0x61f   :  { %v4152_v60 = vmax.f32 %v4117_v42, %v4118_v29  ;;  %v3919_v13 = vadd.f32 %v3849_v57, %v9235_v21  ;;  %v7504_v21 = vld [vmem:[%s10341_s4 + $0xd8] sm:$0xff]  ;;  %v7502_v29 = vld [vmem:[%s10341_s4 + $0xc8] sm:$0xff] }
 0x620   :  { %5168 = vmatpush.bf16.msrb.mxu1 %v7504_v21  ;;  %v7506_v57 = vld [vmem:[%s10341_s4 + $0xe8] sm:$0xff] }
 0x621   :  { %v4168_v30 = vmax.f32 %v9589_v8, %v4152_v60  ;;  %v3987_v45 = vmul.f32 %v9551_v16, %v3919_v13  ;;  %v2612_v13 = vadd.f32 %v9290_v36, %v10788_v52  ;;  %5316 = vmatpush.bf16.msrb.mxu2 %v7506_v57  ;;  %v7505_v36 = vld [vmem:[%s10341_s4 + $0xe0] sm:$0xff] }
 0x622   :  { %v4376_v41 = vpop.f32.mrf.mxu1  ;;  %5478 = vmatpush.bf16.msrb.mxu3 %v7510_v55 }
 0x623   :  { %v4474_v47 = vadd.f32 %v4473_v46, %v4376_v41  ;;  %v9667_v51 = vpack.c.bf16 %v4168_v30, %v9643_v49  ;;  %v4055_v0 = vadd.f32 %v9563_v54, %v3987_v45  ;;  %v9709_v41 = vpop.f32.mrf.mxu3  ;;  %v3070_v45 = vadd.f32 %v9286_v63, %v2612_v13 }
 0x624   :  { %5169 = vmatpush.bf16.msrb.mxu1 %v7503_v48 }
 0x625   :  { %7087 = vmatmul.msk.bf16.gmra.mxu1 %vm4312_vm0, %v9519_v1  ;;  %7151 = vmatmul.msk.bf16.gmra.mxu3 %vm4312_vm0, %v9545_v26  ;;  %v4119_v58 = vmax.f32 %v4055_v0, 0.0 }
 0x626   :  { %7120 = vmatmul.msk.bf16.gmra.mxu2 %vm4312_vm0, %v9667_v51  ;;  %v3851_v8 = vpop.f32.mrf.mxu0 }
 0x627   :  { %v3920_v23 = vadd.f32 %v3851_v8, %v3462_v24  ;;  %v9711_v24 = vpop.f32.mrf.mxu2  ;;  %v7509_v8 = vld [vmem:[%s10341_s4 + $0x100] sm:$0xff]  ;;  %5317 = vmatpush.bf16.msrb.mxu2 %v7505_v36 }
 0x628   :  { %5170 = vmatpush.bf16.msrb.mxu1 %v7502_v29  ;;  %5479 = vmatpush.bf16.msrb.mxu3 %v7509_v8 }
 0x629   :  { %v3988_v17 = vmul.f32 %v9551_v16, %v3920_v23  ;;  %v9727_v23 = vpack.c.bf16 %v9643_v49, %v10721_v56 }
 0x62a   :  { %v9741_v3 = vpop.f32.mrf.mxu1 }
 0x62b   :  { %v4056_v42 = vadd.f32 %v9563_v54, %v3988_v17 }
 0x62c   :  { %5171 = vmatpush.bf16.msrb.mxu1 %v7501_v10 }
 0x62d   :  { %v4120_v62 = vmax.f32 %v4056_v42, 0.0 }
 0x62e   :  { %v3854_v60 = vpop.f32.mrf.mxu0 }
 0x62f   :  { %v4153_v46 = vmax.f32 %v4119_v58, %v4120_v62  ;;  %v3921_v38 = vadd.f32 %v3854_v60, %v9256_v27  ;;  %v3464_v27 = vadd.f32 %v9311_v9, %v3070_v45 }
 0x631   :  { %v4169_v21 = vmax.f32 %v9607_v32, %v4153_v46  ;;  %v3989_v32 = vmul.f32 %v9551_v16, %v3921_v38 }
 0x633   :  { %v9729_v63 = vpack.c.bf16 %v4169_v21, %v4168_v30  ;;  %v4057_v49 = vadd.f32 %v9563_v54, %v3989_v32 }
 0x635   :  { %7088 = vmatmul.msk.bf16.gmra.mxu1 %vm4312_vm0, %v9727_v23  ;;  %7152 = vmatmul.msk.bf16.gmra.mxu3 %vm4312_vm0, %v9729_v63  ;;  %v4121_v42 = vmax.f32 %v4057_v49, 0.0 }
 0x636   :  { %v3856_v0 = vpop.f32.mrf.mxu0 }
 0x637   :  { %v3922_v17 = vadd.f32 %v3856_v0, %v3464_v27  ;;  %v4446_v27 = vadd.f32 %v9301_v7, %v9304_v6 }
 0x638   :  { %v4478_v48 = vpop.f32.mrf.mxu2  ;;  %v4619_v56 = vpop.f32.mrf.mxu3 }
 0x639   :  { %v3990_v30 = vmul.f32 %v9551_v16, %v3922_v17  ;;  %v9739_v14 = vadd.f32 %v4619_v56, %v4474_v47  ;;  %v4630_v17 = vadd.f32 %v9325_v53, %v4446_v27 }
 0x63b   :  { %v4058_v9 = vadd.f32 %v9563_v54, %v3990_v30 }
 0x63d   :  { %v4122_v29 = vmax.f32 %v4058_v9, 0.0 }
 0x63f   :  { %v4154_v57 = vmax.f32 %v4121_v42, %v4122_v29  ;;  %v10789_v42 = vld [vmem:[#allocation87_spill] sm:$0xff]  ;;  %v10790_v29 = vld [vmem:[#allocation17_spill] sm:$0xff] }
 0x640   :  { %v4480_v55 = vpop.f32.mrf.mxu2  ;;  %v9744_v58 = vpop.f32.mrf.mxu3 }
 0x641   :  { %v9747_v62 = vmax.f32 %v9624_v31, %v4154_v57  ;;  %v10791_v57 = vld [vmem:[#allocation88_spill] sm:$0xff] }
 0x642   :  { %v4381_v60 = vpop.f32.mrf.mxu1 }
 0x643   :  { %v4479_v52 = vadd.f32 %v4478_v48, %v4381_v60  ;;  %v9750_v13 = vpack.c.bf16 %v9747_v62, %v4169_v21  ;;  %v4944_v16 = vpack.c.bf16 0.0, %v9747_v62 }
 0x645   :  { %7089 = vmatmul.msk.bf16.gmra.mxu1 %vm4312_vm0, %v9729_v63  ;;  %7121 = vmatmul.msk.bf16.gmra.mxu2 %vm4312_vm0, %v9750_v13 }
 0x646   :  { %7153 = vmatmul.msk.bf16.gmra.mxu3 %vm4312_vm0, %v4944_v16 }
 0x648   :  { %v4624_v54 = vpop.f32.mrf.mxu3 }
 0x649   :  { %v9760_v31 = vadd.f32 %v4624_v54, %v4479_v52  ;;  %v4865_v47 = vpop.f32.mrf.mxu2 }
 0x64a   :  { %v4383_v46 = vpop.f32.mrf.mxu1 }
 0x64b   :  { %v4481_v45 = vadd.f32 %v4480_v55, %v4383_v46  ;;  %v4451_v55 = vadd.f32 %v10791_v57, %v10790_v29 }
 0x64d   :  { %v4632_v52 = vadd.f32 %v9361_v20, %v4451_v55 }
 0x650   :  { %v4626_v21 = vpop.f32.mrf.mxu3 }
 0x651   :  { %v9762_v38 = vadd.f32 %v4626_v21, %v4481_v45  ;;  %v4867_v10 = vpop.f32.mrf.mxu2 }
 0x652   :  { %v4735_v36 = vpop.f32.mrf.mxu1 }
 0x653   :  { %v4775_v8 = vadd.f32 %v4735_v36, %v9319_v11 }
 0x655   :  { %7178 = vmatmul.msk.bf16.vlgmr.msrb.gmra.mxu1 %vm4312_vm0, %v9334_v61  ;;  %7208 = vmatmul.msk.bf16.vlgmr.msrb.gmra.mxu2 %vm4312_vm0, %v9352_v44  ;;  %v4905_v32 = vadd.f32 %v4865_v47, %v4775_v8 }
 0x656   :  { %7238 = vmatmul.msk.bf16.vlgmr.msrb.gmra.mxu3 %vm4312_vm0, %v9366_v34 }
 0x658   :  { %v5011_v0 = vpop.f32.mrf.mxu3 }
 0x659   :  { %v4870_v48 = vpop.f32.mrf.mxu2  ;;  %v9774_v56 = vadd.f32 %v5011_v0, %v4905_v32 }
 0x65a   :  { %v4737_v11 = vpop.f32.mrf.mxu1 }
 0x65b   :  { %v4776_v49 = vadd.f32 %v4737_v11, %v4630_v17 }
 0x65d   :  { %v4906_v30 = vadd.f32 %v4867_v10, %v4776_v49 }
 0x660   :  { %v5013_v7 = vpop.f32.mrf.mxu3 }
 0x661   :  { %v4872_v6 = vpop.f32.mrf.mxu2  ;;  %v9776_v9 = vadd.f32 %v5013_v7, %v4906_v30 }
 0x662   :  { %v4740_v61 = vpop.f32.mrf.mxu1 }
 0x663   :  { %v4777_v44 = vadd.f32 %v4740_v61, %v10789_v42 }
 0x665   :  { %7179 = vmatmul.msk.bf16.gmra.mxu1 %vm4312_vm0, %v9366_v34  ;;  %7209 = vmatmul.msk.bf16.gmra.mxu2 %vm4312_vm0, %v9388_v25  ;;  %v4907_v53 = vadd.f32 %v4870_v48, %v4777_v44 }
 0x666   :  { %7239 = vmatmul.msk.bf16.gmra.mxu3 %vm4312_vm0, %v9390_v35  ;;  %v4456_v35 = vadd.f32 %v9378_v18, %v9380_v39  ;;  %v4461_v39 = vadd.f32 %v9461_v40, %v9463_v50 }
 0x668   :  { %v5016_v60 = vpop.f32.mrf.mxu3  ;;  %v4634_v32 = vadd.f32 %v9384_v37, %v4456_v35 }
 0x669   :  { %v4875_v54 = vpop.f32.mrf.mxu2  ;;  %v9788_v47 = vadd.f32 %v5016_v60, %v4907_v53 }
 0x66a   :  { %v4742_v46 = vpop.f32.mrf.mxu1 }
 0x66b   :  { %v4778_v45 = vadd.f32 %v4742_v46, %v4632_v52 }
 0x66d   :  { %v4908_v21 = vadd.f32 %v4872_v6, %v4778_v45  ;;  %v4636_v6 = vadd.f32 %v9507_v12, %v4461_v39 }
 0x670   :  { %v5018_v10 = vpop.f32.mrf.mxu3 }
 0x671   :  { %v4877_v36 = vpop.f32.mrf.mxu2  ;;  %v9790_v8 = vadd.f32 %v5018_v10, %v4908_v21 }
 0x672   :  { %v4745_v34 = vpop.f32.mrf.mxu1 }
 0x673   :  { %v4779_v25 = vadd.f32 %v4745_v34, %v9376_v4  ;;  %v10792_v34 = vmov 0.0|0.0  }
 0x675   :  { %7180 = vmatmul.msk.bf16.gmra.mxu1 %vm4312_vm0, %v9447_v22  ;;  %7210 = vmatmul.msk.bf16.gmra.mxu2 %vm4312_vm0, %v9478_v43  ;;  %v4909_v20 = vadd.f32 %v4875_v54, %v4779_v25 }
 0x676   :  { %7240 = vmatmul.msk.bf16.gmra.mxu3 %vm4312_vm0, %v9519_v1 }
 0x678   :  { %v5021_v27 = vpop.f32.mrf.mxu3 }
 0x679   :  { %v4880_v0 = vpop.f32.mrf.mxu2  ;;  %v9802_v17 = vadd.f32 %v5021_v27, %v4909_v20 }
 0x67a   :  { %v4747_v4 = vpop.f32.mrf.mxu1 }
 0x67b   :  { %v4780_v48 = vadd.f32 %v4747_v4, %v4634_v32 }
 0x67d   :  { %v4910_v11 = vadd.f32 %v4877_v36, %v4780_v48 }
 0x680   :  { %v5023_v22 = vpop.f32.mrf.mxu3 }
 0x681   :  { %v9804_v49 = vadd.f32 %v5023_v22, %v4910_v11  ;;  %v4882_v43 = vpop.f32.mrf.mxu2 }
 0x682   :  { %v4750_v30 = vpop.f32.mrf.mxu1 }
 0x683   :  { %v4781_v7 = vadd.f32 %v4750_v30, %v9400_v15 }
 0x685   :  { %7181 = vmatmul.msk.bf16.gmra.mxu1 %vm4312_vm0, %v9519_v1  ;;  %7211 = vmatmul.msk.bf16.gmra.mxu2 %vm4312_vm0, %v9543_v5  ;;  %v4911_v18 = vadd.f32 %v4880_v0, %v4781_v7 }
 0x686   :  { %7241 = vmatmul.msk.bf16.gmra.mxu3 %vm4312_vm0, %v9545_v26 }
 0x688   :  { %v5026_v37 = vpop.f32.mrf.mxu3 }
 0x689   :  { %v9816_v61 = vadd.f32 %v5026_v37, %v4911_v18  ;;  %v4885_v44 = vpop.f32.mrf.mxu2 }
 0x68a   :  { %v4752_v42 = vpop.f32.mrf.mxu1 }
 0x68b   :  { %v4782_v15 = vadd.f32 %v4752_v42, %v4636_v6  ;;  %v9879_v42 = vld [vmem:[%s10342_s5] ss:$0 sm:$0xff] }
 0x68d   :  { %v4912_v29 = vadd.f32 %v4882_v43, %v4782_v15 }
 0x690   :  { %v5028_v1 = vpop.f32.mrf.mxu3 }
 0x691   :  { %v9818_v57 = vadd.f32 %v5028_v1, %v4912_v29  ;;  %v9825_v50 = vpop.f32.mrf.mxu2  ;;  %v9886_v1 = vld [vmem:[%s10343_s6] ss:$0 sm:$0xff] }
 0x692   :  { %v4755_v5 = vpop.f32.mrf.mxu1 }
 0x693   :  { %v4783_v55 = vadd.f32 %v4755_v5, %v9529_v33 }
 0x695   :  { %7182 = vmatmul.msk.bf16.gmra.mxu1 %vm4312_vm0, %v9727_v23  ;;  %7212 = vmatmul.msk.bf16.gmra.mxu2 %vm4312_vm0, %v9667_v51  ;;  %v4913_v40 = vadd.f32 %v4885_v44, %v4783_v55 }
 0x696   :  { %7242 = vmatmul.msk.bf16.gmra.mxu3 %vm4312_vm0, %v9729_v63 }
 0x698   :  { %v5031_v12 = vpop.f32.mrf.mxu3 }
 0x699   :  { %v9829_v26 = vadd.f32 %v5031_v12, %v4913_v40  ;;  %v4890_v60 = vpop.f32.mrf.mxu2 }
 0x69a   :  { %v9831_v53 = vpop.f32.mrf.mxu1 }
 0x6a0   :  { %v9833_v52 = vpop.f32.mrf.mxu3 }
 0x6a1   :  { %v9845_v45 = vpop.f32.mrf.mxu2 }
 0x6a2   :  { %v4760_v33 = vpop.f32.mrf.mxu1 }
 0x6a3   :  { %v4785_v23 = vadd.f32 %v4760_v33, %v9567_v59 }
 0x6a5   :  { %7183 = vmatmul.msk.bf16.gmra.mxu1 %vm4312_vm0, %v9729_v63  ;;  %7213 = vmatmul.msk.bf16.gmra.mxu2 %vm4312_vm0, %v9750_v13  ;;  %v4915_v51 = vadd.f32 %v4890_v60, %v4785_v23 }
 0x6a6   :  { %7243 = vmatmul.msk.bf16.gmra.mxu3 %vm4312_vm0, %v4944_v16 }
 0x6a8   :  { %v5036_v54 = vpop.f32.mrf.mxu3 }
 0x6a9   :  { %v9843_v46 = vadd.f32 %v5036_v54, %v4915_v51  ;;  %v4895_v36 = vpop.f32.mrf.mxu2 }
 0x6aa   :  { %v9847_v21 = vpop.f32.mrf.mxu1 }
 0x6b0   :  { %v9849_v10 = vpop.f32.mrf.mxu3 }
 0x6b1   :  { %v9859_v20 = vpop.f32.mrf.mxu2 }
 0x6b2   :  { %v4765_v59 = vpop.f32.mrf.mxu1 }
 0x6b3   :  { %v4787_v63 = vadd.f32 %v4765_v59, %v9739_v14 }
 0x6b5   :  { %5202 = vmatmul.bf16.gmra.mxu1 %v10792_v34  ;;  %5348 = vmatmul.bf16.gmra.mxu2 %v10792_v34  ;;  %v4917_v62 = vadd.f32 %v4895_v36, %v4787_v63 }
 0x6b6   :  { %5510 = vmatmul.bf16.gmra.mxu3 %v10792_v34 }
 0x6b8   :  { %v5041_v13 = vpop.f32.mrf.mxu3 }
 0x6b9   :  { %v9855_v16 = vadd.f32 %v5041_v13, %v4917_v62 }
 0x6ba   :  { %v9857_v25 = vpop.f32.mrf.mxu1 }
 0x6c0   :  { %v9861_v35 = vpop.f32.mrf.mxu3 }
 0x6c2   :  { %v4770_v27 = vpop.f32.mrf.mxu1 }
 0x6c3   :  { %v4789_v14 = vadd.f32 %v4770_v27, %v9760_v31 }
 0x6c5   :  { %5207 = vmatmul.bf16.gmra.mxu1 %v10792_v34  ;;  %5353 = vmatmul.bf16.gmra.mxu2 %v10792_v34 }
 0x6c6   :  { %5515 = vmatmul.bf16.gmra.mxu3 %v10792_v34 }
 0x6c8   :  { %v4900_v32 = vpop.f32.mrf.mxu2 }
 0x6c9   :  { %v4919_v0 = vadd.f32 %v4900_v32, %v4789_v14  ;;  %v5046_v4 = vpop.f32.mrf.mxu3 }
 0x6ca   :  { %v9867_v48 = vpop.f32.mrf.mxu1 }
 0x6cb   :  { %v9869_v11 = vadd.f32 %v5046_v4, %v4919_v0 }
 0x6d0   :  { %v9871_v22 = vpop.f32.mrf.mxu2 }
 0x6d1   :  { %v9873_v43 = vpop.f32.mrf.mxu3 }
 0x6d2   :  { %v5173_v30 = vpop.f32.mrf.mxu1 }
 0x6d3   :  { %v5213_v31 = vadd.f32 %v5173_v30, %v9774_v56 }
 0x6d8   :  { %v5319_v7 = vpop.f32.mrf.mxu2 }
 0x6d9   :  { %v5359_v18 = vadd.f32 %v5319_v7, %v5213_v31  ;;  %v5481_v39 = vpop.f32.mrf.mxu3 }
 0x6da   :  { %v5175_v37 = vpop.f32.mrf.mxu1 }
 0x6db   :  { %v5521_v6 = vadd.f32 %v5481_v39, %v5359_v18  ;;  %v5214_v15 = vadd.f32 %v5175_v37, %v9776_v9 }
 0x6dd   :  { %v5541_v29 = vmul.f32 %v9879_v42, %v5521_v6 }
 0x6df   :  { %v5561_v12 = vadd.f32 %v9886_v1, %v5541_v29 }
 0x6e0   :  { %v5321_v44 = vpop.f32.mrf.mxu2 }
 0x6e1   :  { %v5360_v56 = vadd.f32 %v5321_v44, %v5214_v15  ;;  %v5483_v5 = vpop.f32.mrf.mxu3  ;;  %v5577_v51 = vmax.f32 %v5561_v12, 0.0 }
 0x6e2   :  { %v5178_v55 = vpop.f32.mrf.mxu1 }
 0x6e3   :  { %v5522_v40 = vadd.f32 %v5483_v5, %v5360_v56  ;;  %v5215_v9 = vadd.f32 %v5178_v55, %v9788_v47 }
 0x6e5   :  { %v5542_v60 = vmul.f32 %v9879_v42, %v5522_v40 }
 0x6e7   :  { %v5562_v33 = vadd.f32 %v9886_v1, %v5542_v60 }
 0x6e8   :  { %v5324_v23 = vpop.f32.mrf.mxu2 }
 0x6e9   :  { %v5578_v54 = vmax.f32 %v5562_v33, 0.0  ;;  %v5361_v59 = vadd.f32 %v5324_v23, %v5215_v9  ;;  %v5486_v63 = vpop.f32.mrf.mxu3 }
 0x6ea   :  { %v5180_v36 = vpop.f32.mrf.mxu1 }
 0x6eb   :  { %v5593_v34 = vmax.f32 %v5577_v51, %v5578_v54  ;;  %v5523_v62 = vadd.f32 %v5486_v63, %v5361_v59  ;;  %v5216_v13 = vadd.f32 %v5180_v36, %v9790_v8 }
 0x6ed   :  { %v5543_v14 = vmul.f32 %v9879_v42, %v5523_v62 }
 0x6ef   :  { %v5563_v31 = vadd.f32 %v9886_v1, %v5543_v14 }
 0x6f0   :  { %v5326_v27 = vpop.f32.mrf.mxu2 }
 0x6f1   :  { %v5362_v32 = vadd.f32 %v5326_v27, %v5216_v13  ;;  %v5488_v0 = vpop.f32.mrf.mxu3  ;;  %v5579_v37 = vmax.f32 %v5563_v31, 0.0 }
 0x6f2   :  { %v5183_v4 = vpop.f32.mrf.mxu1 }
 0x6f3   :  { %v5524_v30 = vadd.f32 %v5488_v0, %v5362_v32  ;;  %v5217_v18 = vadd.f32 %v5183_v4, %v9802_v17 }
 0x6f5   :  { %v5544_v47 = vmul.f32 %v9879_v42, %v5524_v30 }
 0x6f7   :  { %v5564_v7 = vadd.f32 %v9886_v1, %v5544_v47 }
 0x6f8   :  { %v5329_v39 = vpop.f32.mrf.mxu2 }
 0x6f9   :  { %v5580_v6 = vmax.f32 %v5564_v7, 0.0  ;;  %v5363_v15 = vadd.f32 %v5329_v39, %v5217_v18  ;;  %v5491_v8 = vpop.f32.mrf.mxu3 }
 0x6fa   :  { %v5185_v44 = vpop.f32.mrf.mxu1 }
 0x6fb   :  { %v5594_v29 = vmax.f32 %v5579_v37, %v5580_v6  ;;  %v5525_v56 = vadd.f32 %v5491_v8, %v5363_v15  ;;  %v5218_v5 = vadd.f32 %v5185_v44, %v9804_v49 }
 0x6fd   :  { %v5545_v40 = vmul.f32 %v9879_v42, %v5525_v56 }
 0x6ff   :  { %v5565_v23 = vadd.f32 %v9886_v1, %v5545_v40 }
 0x700   :  { %v5331_v55 = vpop.f32.mrf.mxu2 }
 0x701   :  { %v5364_v12 = vadd.f32 %v5331_v55, %v5218_v5  ;;  %v5493_v60 = vpop.f32.mrf.mxu3  ;;  %v5581_v63 = vmax.f32 %v5565_v23, 0.0 }
 0x702   :  { %v5188_v33 = vpop.f32.mrf.mxu1 }
 0x703   :  { %v5526_v9 = vadd.f32 %v5493_v60, %v5364_v12  ;;  %v5219_v54 = vadd.f32 %v5188_v33, %v9816_v61 }
 0x705   :  { %v5546_v17 = vmul.f32 %v9879_v42, %v5526_v9 }
 0x707   :  { %v5566_v51 = vadd.f32 %v9886_v1, %v5546_v17  ;;  %v10793_v17 = vld [vmem:[#allocation89_spill] sm:$0xff] }
 0x708   :  { %v5334_v59 = vpop.f32.mrf.mxu2 }
 0x709   :  { %v5582_v36 = vmax.f32 %v5566_v51, 0.0  ;;  %v5365_v62 = vadd.f32 %v5334_v59, %v5219_v54  ;;  %v5496_v49 = vpop.f32.mrf.mxu3  ;;  %v10794_v51 = vld [vmem:[#allocation79_spill] sm:$0xff] }
 0x70a   :  { %v5190_v13 = vpop.f32.mrf.mxu1  ;;  %v4466_v54 = vadd.f32 %v10794_v51, %v10793_v17  ;;  %v6257_v17 = vld [vmem:[%s10344_s8 + $0x38] sm:$0xff] }
 0x70b   :  { %v5597_v27 = vmax.f32 %v5581_v63, %v5582_v36  ;;  %v5527_v14 = vadd.f32 %v5496_v49, %v5365_v62  ;;  %v5220_v0 = vadd.f32 %v5190_v13, %v9818_v57 }
 0x70c   :  { %v4638_v36 = vadd.f32 %v9539_v28, %v4466_v54  ;;  %v4476_v28 = vadd.f32 %v9711_v24, %v9741_v3 }
 0x70d   :  { %v5601_v32 = vmax.f32 %v5593_v34, %v5597_v27  ;;  %v5547_v31 = vmul.f32 %v9879_v42, %v5527_v14  ;;  %v7592_v27 = vmov 0   ;;  %v6250_v14 = vld [vmem:[%s10344_s8] sm:$0xff] }
 0x70e   :  { %7572 = vset.pattern.permute.xlu0 %v7592_v27  ;;  %7573 = vset.pattern.permute.xlu1 %v7592_v27 }
 0x70f   :  { %v5605_v4 = vpack.c.bf16 %v5601_v32, %v5601_v32  ;;  %v5567_v37 = vadd.f32 %v9886_v1, %v5547_v31  ;;  %6268 = vperm.xlu0 %7572, %v6250_v14   ;;  %7574 = vset.pattern.permute.xlu2 %v7592_v27  ;;  %v7521_v31 = vld [vmem:[%s10345_s7 + $0x40] sm:$0xff] }
 0x710   :  { %v5336_v30 = vpop.f32.mrf.mxu2 }
 0x711   :  { %v5366_v47 = vadd.f32 %v5336_v30, %v5220_v0  ;;  %v5498_v7 = vpop.f32.mrf.mxu3  ;;  %v5738_v18 = vsel %vm4312_vm0, %v5605_v4, 0  ;;  %v5583_v8 = vmax.f32 %v5567_v37, 0.0  ;;  %v4642_v0 = vadd.f32 %v9744_v58, %v4476_v28 }
 0x712   :  { %v5193_v61 = vpop.f32.mrf.mxu1  ;;  %5747 = vmatpush.bf16.xpose.msra.mxu1 %v5738_v18  ;;  %v4471_v18 = vadd.f32 %v9656_v2, %v9658_v19  ;;  %v7513_v2 = vld [vmem:[%s10345_s7] sm:$0xff] }
 0x713   :  { %v5528_v39 = vadd.f32 %v5498_v7, %v5366_v47  ;;  %v5221_v30 = vadd.f32 %v5193_v61, %v9829_v26  ;;  %v4788_v47 = vadd.f32 %v9857_v25, %v4642_v0  ;;  %v6251_v26 = vld [vmem:[%s10344_s8 + $0x8] sm:$0xff] }
 0x714   :  { %v4640_v25 = vadd.f32 %v9709_v41, %v4471_v18 }
 0x715   :  { %v5548_v6 = vmul.f32 %v9879_v42, %v5528_v39  ;;  %v4918_v37 = vadd.f32 %v9859_v20, %v4788_v47 }
 0x716   :  { %v4786_v19 = vadd.f32 %v9847_v21, %v4640_v25  ;;  %v6256_v21 = vld [vmem:[%s10344_s8 + $0x30] sm:$0xff]  ;;  %v6262_v25 = vld [vmem:[%s10344_s8 + $0x60] sm:$0xff] }
 0x717   :  { %v5568_v15 = vadd.f32 %v9886_v1, %v5548_v6  ;;  %6273 = vperm.xlu0 %7572, %v6251_v26   ;;  %v6253_v6 = vld [vmem:[%s10344_s8 + $0x18] sm:$0xff] }
 0x718   :  { %v5339_v34 = vpop.f32.mrf.mxu2 }
 0x719   :  { %v5584_v57 = vmax.f32 %v5568_v15, 0.0  ;;  %v5501_v44 = vpop.f32.mrf.mxu3  ;;  %v5367_v3 = vadd.f32 %v5339_v34, %v5221_v30  ;;  %v5064_v34 = vadd.f32 %v9861_v35, %v4918_v37  ;;  %7276 = vmatmul.msk.bf16.vlgmr.msra.gmra.mxu1 %vm4312_vm0, %v7513_v2 }
 0x71a   :  { %v5195_v56 = vpop.f32.mrf.mxu1 }
 0x71b   :  { %v5598_v5 = vmax.f32 %v5583_v8, %v5584_v57  ;;  %v5529_v15 = vadd.f32 %v5501_v44, %v5367_v3  ;;  %v4916_v44 = vadd.f32 %v9845_v45, %v4786_v19 }
 0x71d   :  { %v5602_v55 = vmax.f32 %v5594_v29, %v5598_v5  ;;  %v4784_v29 = vadd.f32 %v9831_v53, %v4638_v36  ;;  %v5549_v57 = vmul.f32 %v9879_v42, %v5529_v15  ;;  %v6263_v15 = vld [vmem:[%s10344_s8 + $0x68] sm:$0xff] }
 0x71f   :  { %v5606_v40 = vpack.c.bf16 %v5602_v55, %v5602_v55  ;;  %v4914_v49 = vadd.f32 %v9825_v50, %v4784_v29  ;;  %v6252_v50 = vld [vmem:[%s10344_s8 + $0x10] sm:$0xff]  ;;  %6298 = vperm.xlu0 %7572, %v6256_v21   ;;  %v5569_v45 = vadd.f32 %v9886_v1, %v5549_v57  ;;  %v4790_v29 = vadd.f32 %v9867_v48, %v9762_v38 }
 0x720   :  { %v5341_v12 = vpop.f32.mrf.mxu2  ;;  %6278 = vperm.xlu1 %7573, %v6252_v50  }
 0x721   :  { %v5503_v60 = vpop.f32.mrf.mxu3  ;;  %v5854_v33 = vsel %vm4312_vm0, %v5606_v40, 0  ;;  %v5060_v53 = vadd.f32 %v9833_v52, %v4914_v49  ;;  %v7522_v49 = vld [vmem:[%s10345_s7 + $0x48] sm:$0xff]  ;;  %v4920_v28 = vadd.f32 %v9871_v22, %v4790_v29  ;;  %v7524_v29 = vld [vmem:[%s10345_s7 + $0x58] sm:$0xff] }
 0x722   :  { %v9911_v9 = vpop.f32.mrf.mxu1  ;;  %5863 = vmatpush.bf16.xpose.msra.mxu2 %v5854_v33 }
 0x723   :  { %v5222_v4 = vadd.f32 %v5195_v56, %v5060_v53  ;;  %v5585_v53 = vmax.f32 %v5569_v45, 0.0  ;;  %v5066_v47 = vadd.f32 %v9873_v43, %v4920_v28  ;;  %v6382_v45 = vld [vmem:[%s10346_s9 + $0x20] sm:$0xff]  ;;  %v6389_v28 = vld [vmem:[%s10346_s9 + $0x58] sm:$0xff] }
 0x725   :  { %v5368_v7 = vadd.f32 %v5341_v12, %v5222_v4  ;;  %v5062_v12 = vadd.f32 %v9849_v10, %v4916_v44  ;;  %v5223_v10 = vadd.f32 %v9911_v9, %v9843_v46 }
 0x728   :  { %v9913_v23 = vpop.f32.mrf.mxu2  ;;  %6283 = vperm.xlu1 %7573, %v6253_v6  }
 0x729   :  { %v9917_v59 = vpop.f32.mrf.mxu3  ;;  %7316 = vmatmul.msk.bf16.vlgmr.msra.gmra.mxu2 %vm4312_vm0, %v7521_v31  ;;  %v5369_v38 = vadd.f32 %v9913_v23, %v5223_v10  ;;  %v6260_v23 = vld [vmem:[%s10344_s8 + $0x50] sm:$0xff]  ;;  %v6261_v10 = vld [vmem:[%s10344_s8 + $0x58] sm:$0xff] }
 0x72a   :  { %v9919_v63 = vpop.f32.mrf.mxu1 }
 0x72b   :  { %v5224_v51 = vadd.f32 %v9919_v63, %v5062_v12 }
 0x730   :  { %v9923_v62 = vpop.f32.mrf.mxu2  ;;  %6303 = vperm.xlu1 %7573, %v6257_v17  }
 0x731   :  { %v9926_v13 = vpop.f32.mrf.mxu3  ;;  %v5370_v14 = vadd.f32 %v9923_v62, %v5224_v51  ;;  %v6259_v62 = vld [vmem:[%s10344_s8 + $0x48] sm:$0xff] }
 0x732   :  { %v5203_v32 = vpop.f32.mrf.mxu1  ;;  %6313 = vperm.xlu0 %7572, %v6259_v62   ;;  %v6383_v51 = vld [vmem:[%s10346_s9 + $0x28] sm:$0xff]  ;;  %v6384_v62 = vld [vmem:[%s10346_s9 + $0x30] sm:$0xff] }
 0x733   :  { %v5225_v24 = vadd.f32 %v5203_v32, %v9855_v16  ;;  %v5530_v16 = vadd.f32 %v5503_v60, %v5368_v7  ;;  %v5532_v4 = vadd.f32 %v9926_v13, %v5370_v14  ;;  %v5531_v7 = vadd.f32 %v9917_v59, %v5369_v38  ;;  %v6254_v13 = vld [vmem:[%s10344_s8 + $0x20] sm:$0xff] }
 0x734   :  { %6288 = vperm.xlu2 %7574, %v6254_v13   ;;  %v6386_v14 = vld [vmem:[%s10346_s9 + $0x40] sm:$0xff]  ;;  %v7519_v13 = vld [vmem:[%s10345_s7 + $0x30] sm:$0xff] }
 0x735   :  { %v5550_v41 = vmul.f32 %v9879_v42, %v5530_v16  ;;  %v5551_v26 = vmul.f32 %v9879_v42, %v5531_v7  ;;  %v7525_v38 = vld [vmem:[%s10345_s7 + $0x60] sm:$0xff]  ;;  %v6264_v7 = vld [vmem:[%s10344_s8 + $0x70] sm:$0xff] }
 0x737   :  { %v5570_v60 = vadd.f32 %v9886_v1, %v5550_v41  ;;  %v5571_v2 = vadd.f32 %v9886_v1, %v5551_v26  ;;  %v7523_v41 = vld [vmem:[%s10345_s7 + $0x50] sm:$0xff]  ;;  %v7541_v26 = vld [vmem:[%s10345_s7 + $0xe0] sm:$0xff] }
 0x738   :  { %v5349_v52 = vpop.f32.mrf.mxu2  ;;  %6318 = vperm.xlu1 %7573, %v6260_v23   ;;  %v7526_v23 = vld [vmem:[%s10345_s7 + $0x68] sm:$0xff] }
 0x739   :  { %v5371_v58 = vadd.f32 %v5349_v52, %v5225_v24  ;;  %v5511_v39 = vpop.f32.mrf.mxu3  ;;  %v5586_v27 = vmax.f32 %v5570_v60, 0.0  ;;  %7317 = vmatmul.msk.bf16.gmra.mxu2 %vm4312_vm0, %v7522_v49  ;;  %v5552_v52 = vmul.f32 %v9879_v42, %v5532_v4  ;;  %v5587_v44 = vmax.f32 %v5571_v2, 0.0  ;;  %v6385_v49 = vld [vmem:[%s10346_s9 + $0x38] sm:$0xff]  ;;  %v7539_v4 = vld [vmem:[%s10345_s7 + $0xd0] sm:$0xff] }
 0x73a   :  { %v5205_v61 = vpop.f32.mrf.mxu1  ;;  %6328 = vperm.xlu0 %7572, %v6262_v25   ;;  %v7542_v25 = vld [vmem:[%s10345_s7 + $0xe8] sm:$0xff] }
 0x73b   :  { %v5533_v8 = vadd.f32 %v5511_v39, %v5371_v58  ;;  %v5226_v20 = vadd.f32 %v5205_v61, %v5064_v34  ;;  %v5595_v22 = vmax.f32 %v5585_v53, %v5586_v27  ;;  %v5572_v16 = vadd.f32 %v9886_v1, %v5552_v52  ;;  %v7516_v27 = vld [vmem:[%s10345_s7 + $0x18] sm:$0xff]  ;;  %v7538_v53 = vld [vmem:[%s10345_s7 + $0xc8] sm:$0xff]  ;;  %v7527_v52 = vld [vmem:[%s10345_s7 + $0x70] sm:$0xff] }
 0x73d   :  { %v5553_v5 = vmul.f32 %v9879_v42, %v5533_v8  ;;  %v7529_v8 = vld [vmem:[%s10345_s7 + $0x80] sm:$0xff] }
 0x73f   :  { %v5573_v54 = vadd.f32 %v9886_v1, %v5553_v5 }
 0x740   :  { %v5351_v56 = vpop.f32.mrf.mxu2  ;;  %6333 = vperm.xlu1 %7573, %v6263_v15  }
 0x741   :  { %v5372_v55 = vadd.f32 %v5351_v56, %v5226_v20  ;;  %v5513_v40 = vpop.f32.mrf.mxu3  ;;  %v5589_v46 = vmax.f32 %v5573_v54, 0.0  ;;  %v5588_v20 = vmax.f32 %v5572_v16, 0.0  ;;  %v6255_v56 = vld [vmem:[%s10344_s8 + $0x28] sm:$0xff]  ;;  %v7537_v54 = vld [vmem:[%s10345_s7 + $0xc0] sm:$0xff] }
 0x742   :  { %v5208_v35 = vpop.f32.mrf.mxu1  ;;  %6293 = vperm.xlu2 %7574, %v6255_v56   ;;  %v7543_v56 = vld [vmem:[%s10345_s7 + $0xf0] sm:$0xff] }
 0x743   :  { %v5534_v33 = vadd.f32 %v5513_v40, %v5372_v55  ;;  %v5227_v63 = vadd.f32 %v5208_v35, %v9869_v11  ;;  %v7514_v11 = vld [vmem:[%s10345_s7 + $0x8] sm:$0xff]  ;;  %v5596_v40 = vmax.f32 %v5587_v44, %v5588_v20  ;;  %v6380_v35 = vld [vmem:[%s10346_s9 + $0x10] sm:$0xff]  ;;  %v7536_v44 = vld [vmem:[%s10345_s7 + $0xb8] sm:$0xff] }
 0x744   :  { %7277 = vmatmul.msk.bf16.gmra.mxu1 %vm4312_vm0, %v7514_v11  ;;  %v6379_v55 = vld [vmem:[%s10346_s9 + $0x8] sm:$0xff]  ;;  %v6392_v11 = vld [vmem:[%s10346_s9 + $0x70] sm:$0xff] }
 0x745   :  { %v5554_v36 = vmul.f32 %v9879_v42, %v5534_v33  ;;  %6401 = vperm.xlu0 %7572, %v6379_v55   ;;  %v6258_v33 = vld [vmem:[%s10344_s8 + $0x40] sm:$0xff] }
 0x747   :  { %v5574_v32 = vadd.f32 %v9886_v1, %v5554_v36  ;;  %v7530_v36 = vld [vmem:[%s10345_s7 + $0x88] sm:$0xff] }
 0x748   :  { %v5354_v50 = vpop.f32.mrf.mxu2  ;;  %6406 = vperm.xlu1 %7573, %v6380_v35  }
 0x749   :  { %v5590_v48 = vmax.f32 %v5574_v32, 0.0  ;;  %v5373_v9 = vadd.f32 %v5354_v50, %v5227_v63  ;;  %v5516_v0 = vpop.f32.mrf.mxu3  ;;  %7318 = vmatmul.msk.bf16.gmra.mxu2 %vm4312_vm0, %v7523_v41  ;;  %v6378_v32 = vld [vmem:[%s10346_s9] sm:$0xff]  ;;  %v6388_v63 = vld [vmem:[%s10346_s9 + $0x50] sm:$0xff] }
 0x74a   :  { %v5210_v31 = vpop.f32.mrf.mxu1  ;;  %6308 = vperm.xlu2 %7574, %v6258_v33   ;;  %v7531_v50 = vld [vmem:[%s10345_s7 + $0x90] sm:$0xff] }
 0x74b   :  { %v5599_v30 = vmax.f32 %v5589_v46, %v5590_v48  ;;  %v5535_v24 = vadd.f32 %v5516_v0, %v5373_v9  ;;  %v5228_v18 = vadd.f32 %v5210_v31, %v5066_v47  ;;  %v6381_v46 = vld [vmem:[%s10346_s9 + $0x18] sm:$0xff]  ;;  %v6390_v48 = vld [vmem:[%s10346_s9 + $0x60] sm:$0xff]  ;;  %v6387_v31 = vld [vmem:[%s10346_s9 + $0x48] sm:$0xff] }
 0x74c   :  { %v7517_v9 = vld [vmem:[%s10345_s7 + $0x20] sm:$0xff]  ;;  %v6265_v0 = vld [vmem:[%s10344_s8 + $0x78] sm:$0xff]  ;;  %v7518_v47 = vld [vmem:[%s10345_s7 + $0x28] sm:$0xff] }
 0x74d   :  { %v5603_v3 = vmax.f32 %v5595_v22, %v5599_v30  ;;  %v5555_v43 = vmul.f32 %v9879_v42, %v5535_v24  ;;  %6416 = vperm.xlu0 %7572, %v6382_v45   ;;  %v6393_v22 = vld [vmem:[%s10346_s9 + $0x78] sm:$0xff] }
 0x74e   :  { %v7532_v30 = vld [vmem:[%s10345_s7 + $0x98] sm:$0xff] }
 0x74f   :  { %v5607_v58 = vpack.c.bf16 %v5603_v3, %v5603_v3  ;;  %v5575_v19 = vadd.f32 %v9886_v1, %v5555_v43  ;;  %v7540_v24 = vld [vmem:[%s10345_s7 + $0xd8] sm:$0xff]  ;;  %v7533_v3 = vld [vmem:[%s10345_s7 + $0xa0] sm:$0xff]  ;;  %v7534_v43 = vld [vmem:[%s10345_s7 + $0xa8] sm:$0xff] }
 0x750   :  { %v5356_v39 = vpop.f32.mrf.mxu2  ;;  %6421 = vperm.xlu1 %7573, %v6383_v51  }
 0x751   :  { %v5374_v61 = vadd.f32 %v5356_v39, %v5228_v18  ;;  %v5970_v59 = vsel %vm4312_vm0, %v5607_v58, 0  ;;  %v5518_v37 = vpop.f32.mrf.mxu3  ;;  %v6391_v18 = vld [vmem:[%s10346_s9 + $0x68] sm:$0xff]  ;;  %v16_v58 = vstv %s10347_s10 }
 0x752   :  { %5979 = vmatpush.bf16.xpose.msra.mxu3 %v5970_v59  ;;  %6323 = vperm.xlu2 %7574, %v6261_v10   ;;  %17 = vst [vmem:[#allocation2] sm:$0x1] %v16_v58  ;;  %v7520_v59 = vld [vmem:[%s10345_s7 + $0x38] sm:$0xff] }
 0x753   :  { %v5536_v6 = vadd.f32 %v5518_v37, %v5374_v61  ;;  %v7528_v61 = vld [vmem:[%s10345_s7 + $0x78] sm:$0xff]  ;;  %v7535_v37 = vld [vmem:[%s10345_s7 + $0xb0] sm:$0xff] }
 0x755   :  { %v5556_v34 = vmul.f32 %v9879_v42, %v5536_v6  ;;  %v5591_v42 = vmax.f32 %v5575_v19, 0.0  ;;  %6431 = vperm.xlu0 %7572, %v6385_v49  }
 0x757   :  { %v5576_v57 = vadd.f32 %v9886_v1, %v5556_v34  ;;  %v7515_v1 = vld [vmem:[%s10345_s7 + $0x10] sm:$0xff] }
 0x758   :  { %7278 = vmatmul.msk.bf16.gmra.mxu1 %vm4312_vm0, %v7515_v1  ;;  %6436 = vperm.xlu1 %7573, %v6386_v14  }
 0x759   :  { %v5592_v5 = vmax.f32 %v5576_v57, 0.0  ;;  %7356 = vmatmul.msk.bf16.vlgmr.msra.gmra.mxu3 %vm4312_vm0, %v7529_v8  ;;  %7319 = vmatmul.msk.bf16.gmra.mxu2 %vm4312_vm0, %v7524_v29  ;;  %v6527_v39 = vld [vmem:[#allocation2] sm:$0x1]  ;;  %v7544_v29 = vld [vmem:[%s10345_s7 + $0xf8] sm:$0xff] }
 0x75a   :  { %6396 = vperm.xlu2 %7574, %v6378_v32  }
 0x75b   :  { %v5600_v21 = vmax.f32 %v5591_v42, %v5592_v5 }
 0x75d   :  { %v5604_v12 = vmax.f32 %v5596_v40, %v5600_v21  ;;  %6446 = vperm.xlu0 %7572, %v6388_v63  }
 0x75f   :  { %v5608_v60 = vpack.c.bf16 %v5604_v12, %v5604_v12 }
 0x760   :  { %6451 = vperm.xlu1 %7573, %v6389_v28  }
 0x761   :  { %v6086_v17 = vsel %vm4312_vm0, %v5608_v60, 0 }
 0x762   :  { %6095 = vmatpush.bf16.xpose.msrb.mxu0 %v6086_v17  ;;  %6411 = vperm.xlu2 %7574, %v6381_v46  }
 0x765   :  { %6456 = vperm.xlu0 %7572, %v6390_v48  }
 0x768   :  { %7279 = vmatmul.msk.bf16.gmra.mxu1 %vm4312_vm0, %v7516_v27  ;;  %6343 = vperm.xlu1 %7573, %v6265_v0  }
 0x769   :  { %7396 = vmatmul.msk.bf16.vlgmr.msrb.gmra.mxu0 %vm4312_vm0, %v7537_v54  ;;  %7357 = vmatmul.msk.bf16.gmra.mxu3 %vm4312_vm0, %v7530_v36 }
 0x76a   :  { %7320 = vmatmul.msk.bf16.gmra.mxu2 %vm4312_vm0, %v7525_v38  ;;  %6426 = vperm.xlu2 %7574, %v6384_v62  }
 0x76d   :  { %6466 = vperm.xlu0 %7572, %v6392_v11  }
 0x770   :  { %6471 = vperm.xlu1 %7573, %v6393_v22  }
 0x772   :  { %6441 = vperm.xlu2 %7574, %v6387_v31  }
 0x778   :  { %7280 = vmatmul.msk.bf16.gmra.mxu1 %vm4312_vm0, %v7517_v9 }
 0x779   :  { %7397 = vmatmul.msk.bf16.gmra.mxu0 %vm4312_vm0, %v7538_v53  ;;  %7358 = vmatmul.msk.bf16.gmra.mxu3 %vm4312_vm0, %v7531_v50 }
 0x77a   :  { %7321 = vmatmul.msk.bf16.gmra.mxu2 %vm4312_vm0, %v7526_v23  ;;  %6338 = vperm.xlu2 %7574, %v6264_v7  }
 0x781   :  { %v6269_v34 = vpop.permute.xlu0 %6268 }
 0x782   :  { %6461 = vperm.xlu2 %7574, %v6391_v18  }
 0x788   :  { %7281 = vmatmul.msk.bf16.gmra.mxu1 %vm4312_vm0, %v7518_v47 }
 0x789   :  { %7398 = vmatmul.msk.bf16.gmra.mxu0 %vm4312_vm0, %v7539_v4  ;;  %7359 = vmatmul.msk.bf16.gmra.mxu3 %vm4312_vm0, %v7532_v30  ;;  %v6274_v21 = vpop.permute.xlu0 %6273 }
 0x78a   :  { %7322 = vmatmul.msk.bf16.gmra.mxu2 %vm4312_vm0, %v7527_v52  ;;  %6530 = vperm.xlu2 %7574, %v6527_v39  }
 0x78e   :  { %v10202_v55 = vpop.permute.xlu2 %6288 }
 0x791   :  { %v10215_v49 = vpop.permute.xlu0 %6298 }
 0x792   :  { %v10200_v5 = vpop.permute.xlu1 %6278 }
 0x796   :  { %v5749_v16 = vpop.f32.mrf.mxu1 }
 0x797   :  { %v6138_v15 = vsel %vm6137_vm1, %v5749_v16, 0.0 }
 0x798   :  { %7282 = vmatmul.msk.bf16.gmra.mxu1 %vm4312_vm0, %v7519_v13 }
 0x799   :  { %7399 = vmatmul.msk.bf16.gmra.mxu0 %vm4312_vm0, %v7540_v24  ;;  %7360 = vmatmul.msk.bf16.gmra.mxu3 %vm4312_vm0, %v7533_v3 }
 0x79a   :  { %7323 = vmatmul.msk.bf16.gmra.mxu2 %vm4312_vm0, %v7528_v61  ;;  %v10208_v54 = vpop.permute.xlu1 %6283 }
 0x79c   :  { %v10210_v36 = vpop.permute.xlu2 %6293 }
 0x79e   :  { %v5751_v8 = vpop.f32.mrf.mxu1 }
 0x79f   :  { %v6145_v20 = vsel %vm6137_vm1, %v5751_v8, 0.0 }
 0x7a2   :  { %v10219_v63 = vpop.permute.xlu1 %6303 }
 0x7a4   :  { %v10221_v28 = vpop.permute.xlu2 %6308  ;;  %v10225_v9 = vpop.permute.xlu0 %6313 }
 0x7a8   :  { %7283 = vmatmul.msk.bf16.gmra.mxu1 %vm4312_vm0, %v7520_v59 }
 0x7a9   :  { %7400 = vmatmul.msk.bf16.gmra.mxu0 %vm4312_vm0, %v7541_v26  ;;  %7361 = vmatmul.msk.bf16.gmra.mxu3 %vm4312_vm0, %v7534_v43 }
 0x7aa   :  { %v10229_v23 = vpop.permute.xlu1 %6318 }
 0x7ac   :  { %v5865_v6 = vpop.f32.mrf.mxu2  ;;  %v10231_v31 = vpop.permute.xlu2 %6323 }
 0x7ad   :  { %v6139_v2 = vsel %vm6137_vm1, %v5865_v6, 0.0  ;;  %v10233_v47 = vpop.permute.xlu0 %6328 }
 0x7ae   :  { %v6140_v19 = vadd.f32 %v6139_v2, %v6138_v15 }
 0x7b2   :  { %v10241_v59 = vpop.permute.xlu1 %6333 }
 0x7b4   :  { %v5867_v41 = vpop.f32.mrf.mxu2 }
 0x7b5   :  { %v6146_v57 = vsel %vm6137_vm1, %v5867_v41, 0.0 }
 0x7b6   :  { %v6147_v42 = vadd.f32 %v6146_v57, %v6145_v20 }
 0x7b7   :  { %v6402_v2 = vpop.permute.xlu0 %6401 }
 0x7b9   :  { %7401 = vmatmul.msk.bf16.gmra.mxu0 %vm4312_vm0, %v7542_v25  ;;  %7362 = vmatmul.msk.bf16.gmra.mxu3 %vm4312_vm0, %v7535_v37  ;;  %v6397_v25 = vpop.permute.xlu2 %6396 }
 0x7bc   :  { %v5870_v40 = vpop.f32.mrf.mxu2 }
 0x7bd   :  { %v6153_v12 = vsel %vm6137_vm1, %v5870_v40, 0.0 }
 0x7c1   :  { %v5754_v1 = vpop.f32.mrf.mxu1 }
 0x7c2   :  { %v6152_v35 = vsel %vm6137_vm1, %v5754_v1, 0.0 }
 0x7c3   :  { %v6154_v60 = vadd.f32 %v6153_v12, %v6152_v35 }
 0x7c4   :  { %v5872_v17 = vpop.f32.mrf.mxu2 }
 0x7c5   :  { %v6160_v51 = vsel %vm6137_vm1, %v5872_v17, 0.0 }
 0x7c9   :  { %7402 = vmatmul.msk.bf16.gmra.mxu0 %vm4312_vm0, %v7543_v56  ;;  %7363 = vmatmul.msk.bf16.gmra.mxu3 %vm4312_vm0, %v7536_v44  ;;  %v5756_v33 = vpop.f32.mrf.mxu1 }
 0x7ca   :  { %v6159_v45 = vsel %vm6137_vm1, %v5756_v33, 0.0 }
 0x7cb   :  { %v6161_v10 = vadd.f32 %v6160_v51, %v6159_v45 }
 0x7cc   :  { %v5875_v50 = vpop.f32.mrf.mxu2 }
 0x7cd   :  { %v6167_v46 = vsel %vm6137_vm1, %v5875_v50, 0.0 }
 0x7d4   :  { %v10239_v39 = vpop.f32.mrf.mxu2 }
 0x7d5   :  { %v5759_v53 = vpop.f32.mrf.mxu1 }
 0x7d6   :  { %v6166_v38 = vsel %vm6137_vm1, %v5759_v53, 0.0 }
 0x7d7   :  { %v6168_v48 = vadd.f32 %v6167_v46, %v6166_v38  ;;  %v6412_v38 = vpop.permute.xlu2 %6411 }
 0x7d9   :  { %7403 = vmatmul.msk.bf16.gmra.mxu0 %vm4312_vm0, %v7544_v29 }
 0x7dc   :  { %v5981_v27 = vpop.f32.mrf.mxu3 }
 0x7dd   :  { %v6141_v14 = vsel %vm6137_vm1, %v5981_v27, 0.0  ;;  %v10236_v58 = vpop.f32.mrf.mxu1 }
 0x7de   :  { %v6142_v32 = vadd.f32 %v6141_v14, %v6140_v19 }
 0x7e4   :  { %v5983_v0 = vpop.f32.mrf.mxu3 }
 0x7e5   :  { %v6148_v62 = vsel %vm6137_vm1, %v5983_v0, 0.0  ;;  %v5764_v57 = vpop.f32.mrf.mxu1 }
 0x7e6   :  { %v6097_v11 = vpop.f32.mrf.mxu0  ;;  %v6149_v22 = vadd.f32 %v6148_v62, %v6147_v42  ;;  %v5880_v42 = vpop.f32.mrf.mxu2 }
 0x7e7   :  { %v6143_v4 = vsel %vm6137_vm1, %v6097_v11, 0.0 }
 0x7e8   :  { %v6144_v30 = vadd.f32 %v6143_v4, %v6142_v32 }
 0x7ea   :  { %v6346_v24 = vadd.f32 %v6269_v34, %v6144_v30 }
 0x7ec   :  { %v5986_v7 = vpop.f32.mrf.mxu3  ;;  %v6362_v43 = vmax.f32 %v6346_v24, 0.0 }
 0x7ed   :  { %v6155_v3 = vsel %vm6137_vm1, %v5986_v7, 0.0  ;;  %v5766_v14 = vpop.f32.mrf.mxu1 }
 0x7ee   :  { %v6099_v52 = vpop.f32.mrf.mxu0  ;;  %v6156_v18 = vadd.f32 %v6155_v3, %v6154_v60  ;;  %v6474_v6 = vmul.f32 %v6397_v25, %v6362_v43  ;;  %v6407_v60 = vpop.permute.xlu1 %6406 }
 0x7ef   :  { %v6150_v13 = vsel %vm6137_vm1, %v6099_v52, 0.0  ;;  %v5882_v53 = vpop.f32.mrf.mxu2  ;;  %v6417_v52 = vpop.permute.xlu0 %6416 }
 0x7f0   :  { %v6151_v26 = vadd.f32 %v6150_v13, %v6149_v22  ;;  %v6490_v56 = vsel %vm6137_vm1, %v6474_v6, 0.0 }
 0x7f2   :  { %v6347_v61 = vadd.f32 %v6274_v21, %v6151_v26 }
 0x7f4   :  { %v5988_v37 = vpop.f32.mrf.mxu3  ;;  %v6363_v16 = vmax.f32 %v6347_v61, 0.0 }
 0x7f5   :  { %v6162_v15 = vsel %vm6137_vm1, %v5988_v37, 0.0  ;;  %v5769_v24 = vpop.f32.mrf.mxu1 }
 0x7f6   :  { %v6102_v19 = vpop.f32.mrf.mxu0  ;;  %v6163_v34 = vadd.f32 %v6162_v15, %v6161_v10  ;;  %v6475_v8 = vmul.f32 %v6402_v2, %v6363_v16 }
 0x7f7   :  { %v6157_v41 = vsel %vm6137_vm1, %v6102_v19, 0.0  ;;  %v5885_v3 = vpop.f32.mrf.mxu2 }
 0x7f8   :  { %v6158_v20 = vadd.f32 %v6157_v41, %v6156_v18  ;;  %v6491_v44 = vsel %vm6137_vm1, %v6475_v8, 0.0 }
 0x7f9   :  { %v6492_v1 = vadd.f32 %v6491_v44, %v6490_v56 }
 0x7fa   :  { %v6348_v40 = vadd.f32 %v10200_v5, %v6158_v20 }
 0x7fc   :  { %v5991_v21 = vpop.f32.mrf.mxu3  ;;  %v6364_v35 = vmax.f32 %v6348_v40, 0.0 }
 0x7fd   :  { %v6169_v12 = vsel %vm6137_vm1, %v5991_v21, 0.0  ;;  %v5771_v25 = vpop.f32.mrf.mxu1  ;;  %v6180_v21 = vsel %vm6137_vm1, %v5764_v57, 0.0  ;;  %v6195_v57 = vsel %vm6137_vm1, %v5885_v3, 0.0 }
 0x7fe   :  { %v6104_v33 = vpop.f32.mrf.mxu0  ;;  %v6170_v17 = vadd.f32 %v6169_v12, %v6168_v48  ;;  %v6476_v45 = vmul.f32 %v6407_v60, %v6364_v35  ;;  %v6181_v35 = vsel %vm6137_vm1, %v5880_v42, 0.0  ;;  %v6173_v12 = vsel %vm6137_vm1, %v10236_v58, 0.0  ;;  %v10272_v58 = vpop.permute.xlu1 %6421 }
 0x7ff   :  { %v6164_v51 = vsel %vm6137_vm1, %v6104_v33, 0.0  ;;  %v5887_v37 = vpop.f32.mrf.mxu2  ;;  %v6174_v60 = vsel %vm6137_vm1, %v10239_v39, 0.0  ;;  %v6187_v33 = vsel %vm6137_vm1, %v5766_v14, 0.0 }
 0x800   :  { %v6165_v29 = vadd.f32 %v6164_v51, %v6163_v34  ;;  %v6493_v10 = vsel %vm6137_vm1, %v6476_v45, 0.0  ;;  %v6182_v45 = vadd.f32 %v6181_v35, %v6180_v21  ;;  %v6175_v51 = vadd.f32 %v6174_v60, %v6173_v12 }
 0x801   :  { %v6494_v27 = vadd.f32 %v6493_v10, %v6492_v1  ;;  %v6194_v10 = vsel %vm6137_vm1, %v5769_v24, 0.0 }
 0x802   :  { %v6349_v32 = vadd.f32 %v10208_v54, %v6165_v29 }
 0x804   :  { %v5993_v50 = vpop.f32.mrf.mxu3  ;;  %v6365_v5 = vmax.f32 %v6349_v32, 0.0 }
 0x805   :  { %v5774_v15 = vpop.f32.mrf.mxu1  ;;  %v6176_v42 = vsel %vm6137_vm1, %v5993_v50, 0.0 }
 0x806   :  { %v6107_v46 = vpop.f32.mrf.mxu0  ;;  %v6477_v0 = vmul.f32 %v6412_v38, %v6365_v5  ;;  %v6208_v24 = vsel %vm6137_vm1, %v5774_v15, 0.0 }
 0x807   :  { %v6171_v62 = vsel %vm6137_vm1, %v6107_v46, 0.0  ;;  %v5890_v2 = vpop.f32.mrf.mxu2  ;;  %v6196_v46 = vadd.f32 %v6195_v57, %v6194_v10 }
 0x808   :  { %v6172_v11 = vadd.f32 %v6171_v62, %v6170_v17  ;;  %v6495_v48 = vsel %vm6137_vm1, %v6477_v0, 0.0  ;;  %v6188_v17 = vsel %vm6137_vm1, %v5882_v53, 0.0  ;;  %v6201_v0 = vsel %vm6137_vm1, %v5771_v25, 0.0  ;;  %v10277_v62 = vpop.permute.xlu2 %6426 }
 0x809   :  { %v6496_v22 = vadd.f32 %v6495_v48, %v6494_v27  ;;  %v6189_v32 = vadd.f32 %v6188_v17, %v6187_v33  ;;  %v6177_v48 = vadd.f32 %v6176_v42, %v6175_v51  ;;  %v6209_v3 = vsel %vm6137_vm1, %v5890_v2, 0.0  ;;  %v6437_v51 = vpop.permute.xlu1 %6436 }
 0x80a   :  { %v6350_v4 = vadd.f32 %v10202_v55, %v6172_v11 }
 0x80c   :  { %v5996_v30 = vpop.f32.mrf.mxu3  ;;  %v6366_v7 = vmax.f32 %v6350_v4, 0.0 }
 0x80d   :  { %v5776_v34 = vpop.f32.mrf.mxu1  ;;  %v6183_v29 = vsel %vm6137_vm1, %v5996_v30, 0.0 }
 0x80e   :  { %v6109_v54 = vpop.f32.mrf.mxu0  ;;  %v6478_v18 = vmul.f32 %v6417_v52, %v6366_v7  ;;  %v6184_v38 = vadd.f32 %v6183_v29, %v6182_v45  ;;  %v6202_v7 = vsel %vm6137_vm1, %v5887_v37, 0.0  ;;  %v6432_v52 = vpop.permute.xlu0 %6431 }
 0x80f   :  { %v5892_v8 = vpop.f32.mrf.mxu2  ;;  %v6178_v53 = vsel %vm6137_vm1, %v6109_v54, 0.0  ;;  %v6203_v21 = vadd.f32 %v6202_v7, %v6201_v0 }
 0x810   :  { %v6497_v13 = vsel %vm6137_vm1, %v6478_v18, 0.0  ;;  %v6179_v54 = vadd.f32 %v6178_v53, %v6177_v48  ;;  %v6215_v18 = vsel %vm6137_vm1, %v5776_v34, 0.0 }
 0x811   :  { %v10256_v26 = vadd.f32 %v6497_v13, %v6496_v22 }
 0x812   :  { %v6351_v34 = vadd.f32 %v10210_v36, %v6179_v54 }
 0x814   :  { %v5998_v43 = vpop.f32.mrf.mxu3 }
 0x815   :  { %v5779_v44 = vpop.f32.mrf.mxu1  ;;  %v6190_v39 = vsel %vm6137_vm1, %v5998_v43, 0.0 }
 0x816   :  { %v6112_v61 = vpop.f32.mrf.mxu0  ;;  %v6191_v30 = vadd.f32 %v6190_v39, %v6189_v32  ;;  %v6222_v2 = vsel %vm6137_vm1, %v5779_v44, 0.0  ;;  %v6367_v32 = vmax.f32 %v6351_v34, 0.0 }
 0x817   :  { %v5895_v1 = vpop.f32.mrf.mxu2  ;;  %v6185_v22 = vsel %vm6137_vm1, %v6112_v61, 0.0  ;;  %v6216_v61 = vsel %vm6137_vm1, %v5892_v8, 0.0 }
 0x818   :  { %v6186_v13 = vadd.f32 %v6185_v22, %v6184_v38  ;;  %v6223_v12 = vsel %vm6137_vm1, %v5895_v1, 0.0  ;;  %v6217_v60 = vadd.f32 %v6216_v61, %v6215_v18 }
 0x819   :  { %v6224_v10 = vadd.f32 %v6223_v12, %v6222_v2 }
 0x81a   :  { %v6352_v17 = vadd.f32 %v10215_v49, %v6186_v13 }
 0x81c   :  { %v6001_v16 = vpop.f32.mrf.mxu3  ;;  %v6368_v39 = vmax.f32 %v6352_v17, 0.0 }
 0x81d   :  { %v5781_v14 = vpop.f32.mrf.mxu1  ;;  %v6197_v4 = vsel %vm6137_vm1, %v6001_v16, 0.0  ;;  %v6210_v16 = vadd.f32 %v6209_v3, %v6208_v24 }
 0x81e   :  { %v6114_v6 = vpop.f32.mrf.mxu0  ;;  %v6198_v25 = vadd.f32 %v6197_v4, %v6196_v46  ;;  %v6447_v46 = vpop.permute.xlu0 %6446  ;;  %v6480_v3 = vmul.f32 %v10277_v62, %v6368_v39 }
 0x81f   :  { %v5897_v11 = vpop.f32.mrf.mxu2  ;;  %v6192_v50 = vsel %vm6137_vm1, %v6114_v6, 0.0 }
 0x820   :  { %v6193_v43 = vadd.f32 %v6192_v50, %v6191_v30  ;;  %v6230_v49 = vsel %vm6137_vm1, %v5897_v11, 0.0  ;;  %v6479_v30 = vmul.f32 %v10272_v58, %v6367_v32  ;;  %v6501_v62 = vsel %vm6137_vm1, %v6480_v3, 0.0 }
 0x822   :  { %v6353_v8 = vadd.f32 %v10219_v63, %v6193_v43  ;;  %v6442_v63 = vpop.permute.xlu2 %6441  ;;  %v6499_v58 = vsel %vm6137_vm1, %v6479_v30, 0.0 }
 0x824   :  { %v6003_v55 = vpop.f32.mrf.mxu3  ;;  %v6369_v53 = vmax.f32 %v6353_v8, 0.0 }
 0x825   :  { %v6204_v37 = vsel %vm6137_vm1, %v6003_v55, 0.0  ;;  %v5784_v44 = vpop.f32.mrf.mxu1 }
 0x826   :  { %v6117_v19 = vpop.f32.mrf.mxu0  ;;  %v6205_v29 = vadd.f32 %v6204_v37, %v6203_v21  ;;  %v6236_v11 = vsel %vm6137_vm1, %v5784_v44, 0.0  ;;  %v6481_v61 = vmul.f32 %v6432_v52, %v6369_v53  ;;  %v6452_v21 = vpop.permute.xlu1 %6451  ;;  %v6500_v52 = vadd.f32 %v6499_v58, %v10256_v26 }
 0x827   :  { %v6199_v6 = vsel %vm6137_vm1, %v6117_v19, 0.0  ;;  %v5900_v42 = vpop.f32.mrf.mxu2  ;;  %v6457_v8 = vpop.permute.xlu0 %6456 }
 0x828   :  { %v6200_v19 = vadd.f32 %v6199_v6, %v6198_v25  ;;  %v6237_v50 = vsel %vm6137_vm1, %v5900_v42, 0.0 }
 0x829   :  { %v6238_v43 = vadd.f32 %v6237_v50, %v6236_v11 }
 0x82a   :  { %v6354_v38 = vadd.f32 %v10221_v28, %v6200_v19 }
 0x82c   :  { %v6006_v41 = vpop.f32.mrf.mxu3  ;;  %v6370_v24 = vmax.f32 %v6354_v38, 0.0 }
 0x82d   :  { %v6211_v15 = vsel %vm6137_vm1, %v6006_v41, 0.0  ;;  %v6229_v41 = vsel %vm6137_vm1, %v5781_v14, 0.0  ;;  %v5786_v37 = vpop.f32.mrf.mxu1 }
 0x82e   :  { %v6119_v20 = vpop.f32.mrf.mxu0  ;;  %v6212_v55 = vadd.f32 %v6211_v15, %v6210_v16  ;;  %v6231_v22 = vadd.f32 %v6230_v49, %v6229_v41  ;;  %v6339_v15 = vpop.permute.xlu2 %6338  ;;  %v6482_v12 = vmul.f32 %v6437_v51, %v6370_v24  ;;  %v6243_v17 = vsel %vm6137_vm1, %v5786_v37, 0.0 }
 0x82f   :  { %v6206_v45 = vsel %vm6137_vm1, %v6119_v20, 0.0  ;;  %v5902_v2 = vpop.f32.mrf.mxu2  ;;  %v6467_v50 = vpop.permute.xlu0 %6466 }
 0x830   :  { %v6207_v20 = vadd.f32 %v6206_v45, %v6205_v29  ;;  %v6244_v29 = vsel %vm6137_vm1, %v5902_v2, 0.0  ;;  %v6505_v41 = vsel %vm6137_vm1, %v6482_v12, 0.0 }
 0x832   :  { %v6355_v28 = vadd.f32 %v10225_v9, %v6207_v20 }
 0x834   :  { %v10258_v56 = vpop.f32.mrf.mxu3 }
 0x835   :  { %v6218_v36 = vsel %vm6137_vm1, %v10258_v56, 0.0 }
 0x836   :  { %v6122_v40 = vpop.f32.mrf.mxu0 }
 0x837   :  { %v6213_v1 = vsel %vm6137_vm1, %v6122_v40, 0.0  ;;  %v6219_v40 = vadd.f32 %v6218_v36, %v6217_v60 }
 0x838   :  { %v6214_v0 = vadd.f32 %v6213_v1, %v6212_v55 }
 0x83a   :  { %v6356_v25 = vadd.f32 %v10229_v23, %v6214_v0 }
 0x83c   :  { %v6011_v27 = vpop.f32.mrf.mxu3  ;;  %v6372_v34 = vmax.f32 %v6356_v25, 0.0 }
 0x83d   :  { %v6225_v57 = vsel %vm6137_vm1, %v6011_v27, 0.0 }
 0x83e   :  { %v6124_v5 = vpop.f32.mrf.mxu0  ;;  %v6226_v48 = vadd.f32 %v6225_v57, %v6224_v10  ;;  %v6502_v10 = vadd.f32 %v6501_v62, %v6500_v52  ;;  %v6245_v57 = vadd.f32 %v6244_v29, %v6243_v17 }
 0x83f   :  { %v6220_v14 = vsel %vm6137_vm1, %v6124_v5, 0.0 }
 0x840   :  { %v6221_v4 = vadd.f32 %v6220_v14, %v6219_v40 }
 0x842   :  { %v6357_v9 = vadd.f32 %v10231_v31, %v6221_v4 }
 0x844   :  { %v6013_v35 = vpop.f32.mrf.mxu3  ;;  %v6373_v45 = vmax.f32 %v6357_v9, 0.0 }
 0x845   :  { %v6232_v27 = vsel %vm6137_vm1, %v6013_v35, 0.0  ;;  %v6371_v35 = vmax.f32 %v6355_v28, 0.0 }
 0x846   :  { %v6127_v33 = vpop.f32.mrf.mxu0  ;;  %v6233_v13 = vadd.f32 %v6232_v27, %v6231_v22 }
 0x847   :  { %v6227_v56 = vsel %vm6137_vm1, %v6127_v33, 0.0  ;;  %v6503_v33 = vsel %vm6137_vm1, %v6481_v61, 0.0  ;;  %v6483_v19 = vmul.f32 %v6442_v63, %v6371_v35  ;;  %v6485_v63 = vmul.f32 %v6452_v21, %v6373_v45 }
 0x848   :  { %v6228_v18 = vadd.f32 %v6227_v56, %v6226_v48  ;;  %v6504_v36 = vadd.f32 %v6503_v33, %v6502_v10 }
 0x849   :  { %v6507_v49 = vsel %vm6137_vm1, %v6483_v19, 0.0  ;;  %v6511_v40 = vsel %vm6137_vm1, %v6485_v63, 0.0 }
 0x84a   :  { %v6358_v23 = vadd.f32 %v10233_v47, %v6228_v18  ;;  %v6484_v47 = vmul.f32 %v6447_v46, %v6372_v34  ;;  %v6506_v20 = vadd.f32 %v6505_v41, %v6504_v36  ;;  %v6462_v46 = vpop.permute.xlu2 %6461 }
 0x84c   :  { %v6016_v5 = vpop.f32.mrf.mxu3  ;;  %v6374_v26 = vmax.f32 %v6358_v23, 0.0  ;;  %v6509_v53 = vsel %vm6137_vm1, %v6484_v47, 0.0  ;;  %v6508_v0 = vadd.f32 %v6507_v49, %v6506_v20 }
 0x84d   :  { %v6239_v6 = vsel %vm6137_vm1, %v6016_v5, 0.0 }
 0x84e   :  { %v6129_v7 = vpop.f32.mrf.mxu0  ;;  %v6240_v60 = vadd.f32 %v6239_v6, %v6238_v43  ;;  %v6486_v14 = vmul.f32 %v6457_v8, %v6374_v26  ;;  %v6510_v27 = vadd.f32 %v6509_v53, %v6508_v0 }
 0x84f   :  { %v6234_v54 = vsel %vm6137_vm1, %v6129_v7, 0.0 }
 0x850   :  { %v6235_v16 = vadd.f32 %v6234_v54, %v6233_v13  ;;  %v6513_v4 = vsel %vm6137_vm1, %v6486_v14, 0.0  ;;  %v6512_v28 = vadd.f32 %v6511_v40, %v6510_v27 }
 0x852   :  { %v6359_v55 = vadd.f32 %v10241_v59, %v6235_v16  ;;  %v6344_v59 = vpop.permute.xlu1 %6343  ;;  %v6514_v3 = vadd.f32 %v6513_v4, %v6512_v28  ;;  %v6531_v37 = vpop.permute.xlu2 %6530 }
 0x853   :  { %v6533_v2 = vperm.slane %v6531_v37, 0 }
 0x854   :  { %v6018_v1 = vpop.f32.mrf.mxu3  ;;  %v6375_v32 = vmax.f32 %v6359_v55, 0.0 }
 0x855   :  { %v6246_v39 = vsel %vm6137_vm1, %v6018_v1, 0.0 }
 0x856   :  { %v6132_v31 = vpop.f32.mrf.mxu0  ;;  %v6247_v48 = vadd.f32 %v6246_v39, %v6245_v57  ;;  %v6487_v56 = vmul.f32 %v6462_v46, %v6375_v32 }
 0x857   :  { %v6241_v51 = vsel %vm6137_vm1, %v6132_v31, 0.0 }
 0x858   :  { %v6242_v44 = vadd.f32 %v6241_v51, %v6240_v60  ;;  %v6515_v5 = vsel %vm6137_vm1, %v6487_v56, 0.0 }
 0x859   :  { %v6516_v13 = vadd.f32 %v6515_v5, %v6514_v3 }
 0x85a   :  { %v6360_v42 = vadd.f32 %v6339_v15, %v6242_v44  ;;  %v6472_v43 = vpop.permute.xlu1 %6471 }
 0x85c   :  { %v6376_v38 = vmax.f32 %v6360_v42, 0.0 }
 0x85e   :  { %v6134_v22 = vpop.f32.mrf.mxu0  ;;  %v6488_v7 = vmul.f32 %v6467_v50, %v6376_v38 }
 0x85f   :  { %v6248_v11 = vsel %vm6137_vm1, %v6134_v22, 0.0 }
 0x860   :  { %v6249_v30 = vadd.f32 %v6248_v11, %v6247_v48  ;;  %v6517_v54 = vsel %vm6137_vm1, %v6488_v7, 0.0 }
 0x861   :  { %v6518_v61 = vadd.f32 %v6517_v54, %v6516_v13 }
 0x862   :  { %v6361_v24 = vadd.f32 %v6344_v59, %v6249_v30 }
 0x864   :  { %v6377_v18 = vmax.f32 %v6361_v24, 0.0 }
 0x866   :  { %v6489_v25 = vmul.f32 %v6472_v43, %v6377_v18 }
 0x868   :  { %v6519_v6 = vsel %vm6137_vm1, %v6489_v25, 0.0 }
 0x869   :  { %v6520_v21 = vadd.f32 %v6519_v6, %v6518_v61 }
 0x86b   :  { %v6521_v58 = vrot.slane %v6520_v21, 4 }
 0x86d   :  { %v6522_v16 = vadd.f32 %v6521_v58, %v6520_v21 }
 0x86f   :  { %v6523_v35 = vrot.slane %v6522_v16, 2 }
 0x871   :  { %v6524_v9 = vadd.f32 %v6523_v35, %v6522_v16 }
 0x873   :  { %v6525_v62 = vrot.slane %v6524_v9, 1 }
 0x875   :  { %v6526_v15 = vadd.f32 %v6525_v62, %v6524_v9 }
 0x877   :  { %v6534_v12 = vadd.f32 %v6533_v2, %v6526_v15 }
 0x879   :  { %v7404_v34 = vmul.f32 -1.442695, %v6534_v12 }
 0x87b   :  { %7579 = vpow2.f32 %v7404_v34 }
 0x881   :  { %v7580_v60 = vpop.eup %7579 }
 0x882   :  { %v6538_v23 = vadd.f32 1.0, %v7580_v60 }
 0x884   :  { %7581 = vrcp.f32 %v6538_v23  ;;  %v6550_v8 = vand.u32 2147483648, %v6538_v23  ;;  %v6548_v45 = vand.u32 2147483647, %v6538_v23  ;;  %vm6544_vm3 = vweird.f32 %v6538_v23 }
 0x886   :  { %v6551_v29 = vor.u32 1.1754944e-38, %v6550_v8  ;;  %vm6549_vm6 = vcmp.eq.f32.partialorder %v6548_v45, 8.507059e+37 }
 0x88a   :  { %v7582_v52 = vpop.eup %7581 }
 0x88b   :  { %v6540_v33 = vmul.f32 %v7582_v52, %v6538_v23  ;;  %vm6545_vm2 = vweird.f32 %v7582_v52 }
 0x88c   :  { %vm6546_vm5 = vmor %vm6544_vm3, %vm6545_vm2 }
 0x88d   :  { %v6541_v17 = vsub.f32 1.0, %v6540_v33 }
 0x88f   :  { %v6542_v19 = vmul.f32 %v7582_v52, %v6541_v17 }
 0x891   :  { %v6543_v31 = vadd.f32 %v7582_v52, %v6542_v19 }
 0x893   :  { %v6547_v55 = vsel %vm6546_vm5, %v7582_v52, %v6543_v31 }
 0x894   :  { %v6552_v10 = vsel %vm6549_vm6, %v6551_v29, %v6547_v55 }
 0x895   :  { %6555 = vst.msk [vmem:[%s10348_s11] sm:$0x1] %vm6554_vm4, %v6552_v10 }

</bundles_post_ra>
